<compile_context>
chip_gen: v5e
topology: v5e:2x2
jax: 0.10.0
libtpu: 0.0.40
codegen_flags: <defaults>
</compile_context>

<pallas_src>
import functools

import jax
import jax.numpy as jnp
from jax import lax
from jax.experimental import pallas as pl
from jax.experimental.pallas import tpu as pltpu

BN_EPS = 1e-5
LEAKY_SLOPE = 0.2
LANES = 128


def _round_up(x, m):
    return (x + m - 1) // m * m


# ----------------------------------------------------------------------------
# Generation-aware VMEM / tile budget.
# ----------------------------------------------------------------------------
def _hw_budget():
    vmem_limit = 32 * 1024 * 1024   # safe on v7x (64 MiB physical per TC)
    tile_max = 512
    try:
        info = pltpu.get_tpu_info()
        cap = getattr(info, "vmem_capacity_bytes", None)
        if cap is not None and cap >= 100 * 1024 * 1024:   # 128 MiB parts (v5e/v6e)
            vmem_limit = 64 * 1024 * 1024
            tile_max = 1024
    except Exception:
        pass
    return vmem_limit, tile_max


def _choose_tile(n_rows, k, cp, vmem_limit, tile_max):
    """Largest row tile (multiple of 16, <= tile_max) whose double-buffered
    working set fits comfortably inside the scoped VMEM budget."""
    budget = int(vmem_limit * 0.7)
    resident = 2 * k * cp * 2                    # double-buffered bf16 weights
    per_row = 2 * (k * 2 + cp * 4 + cp * 2)      # bf16 patches + f32 out + bf16 out
    tile = min(tile_max, max(16, _round_up(n_rows, 16)))
    while tile > 16 and resident + tile * per_row > budget:
        tile //= 2
    return max(16, (tile // 16) * 16)


# ----------------------------------------------------------------------------
# Pallas kernels
# ----------------------------------------------------------------------------
def _conv_act_kernel(p_ref, w_ref, o_ref, *, last):
    """Conv-as-matmul + LeakyReLU (bf16 out) or Sigmoid (f32 out, last layer)."""
    x = jnp.dot(p_ref[...], w_ref[...], preferred_element_type=jnp.float32)
    if last:
        y = pl.reciprocal(1.0 + jnp.exp(-x), approx=True)   # sigmoid via EUP
    else:
        y = jnp.where(x > 0.0, x, LEAKY_SLOPE * x)
    o_ref[...] = y.astype(o_ref.dtype)


def _conv_stats_kernel(p_ref, w_ref, conv_ref, stats_ref):
    """Fused conv-as-matmul + per-tile (sum, sum-of-squares) partial stats."""
    x = jnp.dot(p_ref[...], w_ref[...], preferred_element_type=jnp.float32)
    conv_ref[...] = x
    stats_ref[0, 0:1, :] = jnp.sum(x, axis=0, keepdims=True)
    stats_ref[0, 1:2, :] = jnp.sum(x * x, axis=0, keepdims=True)


def _bn_act_kernel(x_ref, scale_ref, shift_ref, o_ref):
    """Elementwise BN (precomputed scale/shift) + LeakyReLU, bf16 out."""
    y = x_ref[...] * scale_ref[...] + shift_ref[...]
    o_ref[...] = jnp.where(y > 0.0, y, LEAKY_SLOPE * y).astype(o_ref.dtype)


# ----------------------------------------------------------------------------
# pallas_call wrappers
# ----------------------------------------------------------------------------
def _conv_act(patches, wmat, *, tile_n, last, out_dtype, vmem_limit):
    n, k = patches.shape
    cp = wmat.shape[1]
    return pl.pallas_call(
        functools.partial(_conv_act_kernel, last=last),
        out_shape=jax.ShapeDtypeStruct((n, cp), out_dtype),
        grid=(n // tile_n,),
        in_specs=[pl.BlockSpec((tile_n, k), lambda i: (i, 0)),
                  pl.BlockSpec((k, cp), lambda i: (0, 0))],
        out_specs=pl.BlockSpec((tile_n, cp), lambda i: (i, 0)),
        compiler_params=pltpu.CompilerParams(
            dimension_semantics=("parallel",),
            vmem_limit_bytes=vmem_limit),
        cost_estimate=pl.CostEstimate(
            flops=2 * n * k * cp,
            transcendentals=n * cp if last else 0,
            bytes_accessed=n * k * 2 + k * cp * 2
            + n * cp * jnp.dtype(out_dtype).itemsize),
    )(patches, wmat)


def _conv_stats(patches, wmat, *, tile_n, vmem_limit):
    n, k = patches.shape
    cp = wmat.shape[1]
    nt = n // tile_n
    return pl.pallas_call(
        _conv_stats_kernel,
        out_shape=(jax.ShapeDtypeStruct((n, cp), jnp.float32),
                   jax.ShapeDtypeStruct((nt, 2, cp), jnp.float32)),
        grid=(nt,),
        in_specs=[pl.BlockSpec((tile_n, k), lambda i: (i, 0)),
                  pl.BlockSpec((k, cp), lambda i: (0, 0))],
        out_specs=(pl.BlockSpec((tile_n, cp), lambda i: (i, 0)),
                   pl.BlockSpec((1, 2, cp), lambda i: (i, 0, 0))),
        compiler_params=pltpu.CompilerParams(
            dimension_semantics=("parallel",),
            vmem_limit_bytes=vmem_limit),
        cost_estimate=pl.CostEstimate(
            flops=2 * n * k * cp + 3 * n * cp,
            transcendentals=0,
            bytes_accessed=n * k * 2 + k * cp * 2 + n * cp * 4),
    )(patches, wmat)


def _bn_act(conv, scale, shift, *, tile_n, vmem_limit):
    n, cp = conv.shape
    return pl.pallas_call(
        _bn_act_kernel,
        out_shape=jax.ShapeDtypeStruct((n, cp), jnp.bfloat16),
        grid=(n // tile_n,),
        in_specs=[pl.BlockSpec((tile_n, cp), lambda i: (i, 0)),
                  pl.BlockSpec((1, cp), lambda i: (0, 0)),
                  pl.BlockSpec((1, cp), lambda i: (0, 0))],
        out_specs=pl.BlockSpec((tile_n, cp), lambda i: (i, 0)),
        compiler_params=pltpu.CompilerParams(
            dimension_semantics=("parallel",),
            vmem_limit_bytes=vmem_limit),
        cost_estimate=pl.CostEstimate(
            flops=3 * n * cp, transcendentals=0,
            bytes_accessed=n * cp * 4 + 2 * cp * 4 + n * cp * 2),
    )(conv, scale, shift)


# ----------------------------------------------------------------------------
# im2col on NHWC activations (plain-JAX glue); k/stride/pad are Python ints.
# ----------------------------------------------------------------------------
def _im2col_nhwc(x, k, stride, pad):
    """NHWC activations -> [B*OH*OW, C*k*k] patches (same dtype as x)."""
    B, H, W, C = x.shape
    if pad:
        x = jnp.pad(x, ((0, 0), (pad, pad), (pad, pad), (0, 0)))
    OH = (H + 2 * pad - k) // stride + 1
    OW = (W + 2 * pad - k) // stride + 1
    cols = []
    for kh in range(k):
        for kw in range(k):
            cols.append(
                x[:, kh:kh + stride * OH:stride, kw:kw + stride * OW:stride, :])
    patches = jnp.stack(cols, axis=-1)                  # [B,OH,OW,C,k*k]
    patches = patches.reshape(B * OH * OW, C * k * k)   # K order = (C, kh, kw)
    return patches, OH, OW


# ----------------------------------------------------------------------------
# One DiscriminatorBlock: Conv2d(bias=False) + [BatchNorm2d] + LeakyReLU/Sigmoid
# ----------------------------------------------------------------------------
def discriminator_block(x, w, gamma, beta, cfg, hw):
    _cin, cout, k, stride, pad, use_bn, last = cfg
    vmem_limit, tile_max = hw
    B = x.shape[0]

    patches, OH, OW = _im2col_nhwc(x, k, stride, pad)   # bf16 [N, K]
    N, K = patches.shape
    cp = _round_up(cout, LANES)                         # lane-dense matmul out

    wmat = jnp.transpose(w.reshape(cout, K)).astype(jnp.bfloat16)   # [K, cout]
    if cp != cout:
        wmat = jnp.pad(wmat, ((0, 0), (0, cp - cout)))

    tile_n = _choose_tile(N, K, cp, vmem_limit, tile_max)
    n_pad = _round_up(N, tile_n)
    if n_pad != N:   # zero rows contribute 0 to sum/sumsq and are sliced off
        patches = jnp.pad(patches, ((0, n_pad - N), (0, 0)))

    if use_bn:
        conv, partials = _conv_stats(patches, wmat, tile_n=tile_n,
                                     vmem_limit=vmem_limit)
        totals = jnp.sum(partials, axis=0)              # tiny [2, cp] reduce
        mean = totals[0] / N                            # divide by the TRUE N
        var = jnp.maximum(totals[1] / N - mean * mean, 0.0)
        g = jnp.pad(gamma, (0, cp - cout)) if cp != cout else gamma
        b = jnp.pad(beta, (0, cp - cout)) if cp != cout else beta
        scale = g * lax.rsqrt(var + BN_EPS)
        shift = b - mean * scale
        out = _bn_act(conv, scale.reshape(1, cp), shift.reshape(1, cp),
                      tile_n=tile_n, vmem_limit=vmem_limit)
    else:
        out_dtype = jnp.float32 if last else jnp.bfloat16
        out = _conv_act(patches, wmat, tile_n=tile_n, last=last,
                        out_dtype=out_dtype, vmem_limit=vmem_limit)

    # [n_pad, cp] -> [B, OH, OW, cout] (NHWC); slices are no-ops when aligned.
    return out[:N, :cout].reshape(B, OH, OW, cout)


# ----------------------------------------------------------------------------
# Full Discriminator forward
# ----------------------------------------------------------------------------
def make_config(feature_maps, img_channels):
    fm = feature_maps
    return (
        # (in_ch, out_ch, k, stride, pad, batch_norm, last)
        (img_channels, fm,     4, 2, 1, False, False),
        (fm,           fm * 2, 4, 2, 1, True,  False),
        (fm * 2,       fm * 4, 4, 2, 1, True,  False),
        (fm * 4,       fm * 8, 4, 2, 1, True,  False),
        (fm * 8,       1,      4, 1, 0, False, True),
    )


def make_params(key, config):
    """Deterministic parameter init (DCGAN-style N(0, 0.02) conv weights)."""
    params = []
    for (cin, cout, k, _s, _p, _bn, _last) in config:
        key, wk = jax.random.split(key)
        w = 0.02 * jax.random.normal(wk, (cout, cin, k, k), dtype=jnp.float32)
        params.append(dict(w=w,
                           gamma=jnp.ones((cout,), jnp.float32),
                           beta=jnp.zeros((cout,), jnp.float32)))
    return params


def discriminator_forward(images, params, config):
    hw = _hw_budget()   # Python ints, resolved at trace time
    x = jnp.transpose(images, (0, 2, 3, 1)).astype(jnp.bfloat16)  # NCHW->NHWC
    for cfg, p in zip(config, params):
        x = discriminator_block(x, p["w"], p["gamma"], p["beta"], cfg, hw)
    return jnp.transpose(x, (0, 3, 1, 2))     # [B, 1, 1, 1] f32


# ----------------------------------------------------------------------------
# Pure-JAX reference (mirrors the kernel's bf16-operand / f32-accumulate math)
# ----------------------------------------------------------------------------
def reference_forward(images, params, config):
    x = images
    for cfg, p in zip(config, params):
        _, _cout, _k, s, pad, use_bn, last = cfg
        x = lax.conv_general_dilated(
            x.astype(jnp.bfloat16), p["w"].astype(jnp.bfloat16),
            (s, s), [(pad, pad), (pad, pad)],
            dimension_numbers=("NCHW", "OIHW", "NCHW"),
            preferred_element_type=jnp.float32)
        if use_bn:
            mean = jnp.mean(x, axis=(0, 2, 3), keepdims=True)
            var = jnp.mean(jnp.square(x - mean), axis=(0, 2, 3), keepdims=True)
            x = (x - mean) / jnp.sqrt(var + BN_EPS)
            x = x * p["gamma"].reshape(1, -1, 1, 1) + p["beta"].reshape(1, -1, 1, 1)
        if last:
            x = jax.nn.sigmoid(x)
        else:
            x = jnp.where(x > 0, x, LEAKY_SLOPE * x)
    return x


# ----------------------------------------------------------------------------
if __name__ == "__main__":
    key = jax.random.PRNGKey(0)
    feature_maps = 8
    img_channels = 3
    batch = 2

    config = make_config(feature_maps, img_channels)
    key, pkey, xkey = jax.random.split(key, 3)
    params = make_params(pkey, config)
    # Architecture requires 64x64 input (5 blocks down to 1x1).
    images = jax.random.normal(xkey, (batch, img_channels, 64, 64),
                               dtype=jnp.float32)

    fwd = jax.jit(functools.partial(discriminator_forward, config=config))
    out = jax.block_until_ready(fwd(images, params))
    assert out.shape == (batch, 1, 1, 1), out.shape

    ref = jax.block_until_ready(reference_forward(images, params, config))
    max_diff = float(jnp.max(jnp.abs(out - ref)))
    assert jnp.allclose(out, ref, rtol=5e-3, atol=5e-3), (
        f"max abs diff {max_diff}")

    print("KERNEL_OK")
</pallas_src>

<mosaic_0001>
module attributes {stable_mosaic.version = 11 : i64} {
  func.func @_conv_act_kernel(%arg0: i32, %arg1: memref<512x48xbf16, #tpu.memory_space<vmem>>, %arg2: memref<48x128xbf16, #tpu.memory_space<vmem>>, %arg3: memref<512x128xbf16, #tpu.memory_space<vmem>>) attributes {dimension_semantics = [#tpu.dimension_semantics<parallel>], iteration_bounds = array<i64: 4>, scalar_prefetch = 0 : i64, scratch_operands = 0 : i64, tpu.core_type = #tpu.core_type<tc>, window_params = [{transform_indices = @transform_0, window_bounds = array<i64: 512, 48>}, {pipeline_mode = #tpu.pipeline_mode<synchronous>, transform_indices = @transform_1, window_bounds = array<i64: 48, 128>}, {transform_indices = @transform_2, window_bounds = array<i64: 512, 128>}]} {
    %c0 = arith.constant 0 : index
    %c0_0 = arith.constant 0 : index
    %0 = vector.load %arg1[%c0, %c0_0] : memref<512x48xbf16, #tpu.memory_space<vmem>>, vector<512x48xbf16>
    %c0_1 = arith.constant 0 : index
    %c0_2 = arith.constant 0 : index
    %1 = vector.load %arg2[%c0_1, %c0_2] : memref<48x128xbf16, #tpu.memory_space<vmem>>, vector<48x128xbf16>
    %cst = arith.constant dense<0.000000e+00> : vector<512x128xf32>
    %2 = tpu.matmul %0, %1, %cst {dimension_numbers = #tpu.dot_dimension_numbers<[1], [0], [0], [1], [0, 0, 1, 1], [], []>} : vector<512x48xbf16>, vector<48x128xbf16>, vector<512x128xf32> -> vector<512x128xf32>
    %cst_3 = arith.constant 0.000000e+00 : f32
    %3 = vector.broadcast %cst_3 : f32 to vector<512x128xf32>
    %4 = arith.cmpf ogt, %2, %3 : vector<512x128xf32>
    %cst_4 = arith.constant 2.000000e-01 : f32
    %5 = vector.broadcast %cst_4 : f32 to vector<512x128xf32>
    %6 = arith.mulf %5, %2 : vector<512x128xf32>
    %7 = arith.select %4, %2, %6 : vector<512x128xi1>, vector<512x128xf32>
    %8 = arith.truncf %7 : vector<512x128xf32> to vector<512x128xbf16>
    %c0_5 = arith.constant 0 : index
    %c0_6 = arith.constant 0 : index
    %9 = vector.load %arg3[%c0_5, %c0_6] : memref<512x128xbf16, #tpu.memory_space<vmem>>, vector<512x128xbf16>
    tpu.vector_store %arg3[%c0_5, %c0_6], %8 {strides = array<i32>} : memref<512x128xbf16, #tpu.memory_space<vmem>>, vector<512x128xbf16>,
    return
  }
  func.func @transform_0(%arg0: i32) -> (i32, i32) {
    %c0_i32 = arith.constant 0 : i32
    %c0_i32_0 = arith.constant 0 : i32
    return %arg0, %c0_i32 : i32, i32
  }
  func.func @transform_1(%arg0: i32) -> (i32, i32) {
    %c0_i32 = arith.constant 0 : i32
    %c0_i32_0 = arith.constant 0 : i32
    %c0_i32_1 = arith.constant 0 : i32
    return %c0_i32, %c0_i32_0 : i32, i32
  }
  func.func @transform_2(%arg0: i32) -> (i32, i32) {
    %c0_i32 = arith.constant 0 : i32
    %c0_i32_0 = arith.constant 0 : i32
    return %arg0, %c0_i32 : i32, i32
  }
}

module attributes {stable_mosaic.version = 11 : i64} {
  func.func @_conv_stats_kernel(%arg0: i32, %arg1: memref<512x128xbf16, #tpu.memory_space<vmem>>, %arg2: memref<128x128xbf16, #tpu.memory_space<vmem>>, %arg3: memref<512x128xf32, #tpu.memory_space<vmem>>, %arg4: memref<1x2x128xf32, #tpu.memory_space<vmem>>) attributes {dimension_semantics = [#tpu.dimension_semantics<parallel>], iteration_bounds = array<i64: 1>, scalar_prefetch = 0 : i64, scratch_operands = 0 : i64, tpu.core_type = #tpu.core_type<tc>, window_params = [{transform_indices = @transform_0, window_bounds = array<i64: 512, 128>}, {pipeline_mode = #tpu.pipeline_mode<synchronous>, transform_indices = @transform_1, window_bounds = array<i64: 128, 128>}, {transform_indices = @transform_2, window_bounds = array<i64: 512, 128>}, {transform_indices = @transform_3, window_bounds = array<i64: 1, 2, 128>}]} {
    %c0 = arith.constant 0 : index
    %c0_0 = arith.constant 0 : index
    %0 = vector.load %arg1[%c0, %c0_0] : memref<512x128xbf16, #tpu.memory_space<vmem>>, vector<512x128xbf16>
    %c0_1 = arith.constant 0 : index
    %c0_2 = arith.constant 0 : index
    %1 = vector.load %arg2[%c0_1, %c0_2] : memref<128x128xbf16, #tpu.memory_space<vmem>>, vector<128x128xbf16>
    %cst = arith.constant dense<0.000000e+00> : vector<512x128xf32>
    %2 = tpu.matmul %0, %1, %cst {dimension_numbers = #tpu.dot_dimension_numbers<[1], [0], [0], [1], [0, 0, 1, 1], [], []>} : vector<512x128xbf16>, vector<128x128xbf16>, vector<512x128xf32> -> vector<512x128xf32>
    %c0_3 = arith.constant 0 : index
    %c0_4 = arith.constant 0 : index
    %3 = vector.load %arg3[%c0_3, %c0_4] : memref<512x128xf32, #tpu.memory_space<vmem>>, vector<512x128xf32>
    tpu.vector_store %arg3[%c0_3, %c0_4], %2 {strides = array<i32>} : memref<512x128xf32, #tpu.memory_space<vmem>>, vector<512x128xf32>,
    %cst_5 = arith.constant dense<0.000000e+00> : vector<128xf32>
    %4 = vector.multi_reduction <add>, %2, %cst_5 [0] : vector<512x128xf32> to vector<128xf32>
    %5 = vector.shape_cast %4 : vector<128xf32> to vector<1x128xf32>
    %c0_6 = arith.constant 0 : index
    %c0_7 = arith.constant 0 : index
    %c0_8 = arith.constant 0 : index
    %6 = vector.load %arg4[%c0_6, %c0_7, %c0_8] : memref<1x2x128xf32, #tpu.memory_space<vmem>>, vector<1x1x128xf32>
    %7 = vector.shape_cast %6 : vector<1x1x128xf32> to vector<1x128xf32>
    %8 = vector.shape_cast %5 : vector<1x128xf32> to vector<1x1x128xf32>
    tpu.vector_store %arg4[%c0_6, %c0_7, %c0_8], %8 {strides = array<i32>} : memref<1x2x128xf32, #tpu.memory_space<vmem>>, vector<1x1x128xf32>,
    %9 = arith.mulf %2, %2 : vector<512x128xf32>
    %cst_9 = arith.constant dense<0.000000e+00> : vector<128xf32>
    %10 = vector.multi_reduction <add>, %9, %cst_9 [0] : vector<512x128xf32> to vector<128xf32>
    %11 = vector.shape_cast %10 : vector<128xf32> to vector<1x128xf32>
    %c0_10 = arith.constant 0 : index
    %c1 = arith.constant 1 : index
    %c0_11 = arith.constant 0 : index
    %12 = vector.load %arg4[%c0_10, %c1, %c0_11] : memref<1x2x128xf32, #tpu.memory_space<vmem>>, vector<1x1x128xf32>
    %13 = vector.shape_cast %12 : vector<1x1x128xf32> to vector<1x128xf32>
    %14 = vector.shape_cast %11 : vector<1x128xf32> to vector<1x1x128xf32>
    tpu.vector_store %arg4[%c0_10, %c1, %c0_11], %14 {strides = array<i32>} : memref<1x2x128xf32, #tpu.memory_space<vmem>>, vector<1x1x128xf32>,
    return
  }
  func.func @transform_0(%arg0: i32) -> (i32, i32) {
    %c0_i32 = arith.constant 0 : i32
    %c0_i32_0 = arith.constant 0 : i32
    return %arg0, %c0_i32 : i32, i32
  }
  func.func @transform_1(%arg0: i32) -> (i32, i32) {
    %c0_i32 = arith.constant 0 : i32
    %c0_i32_0 = arith.constant 0 : i32
    %c0_i32_1 = arith.constant 0 : i32
    return %c0_i32, %c0_i32_0 : i32, i32
  }
  func.func @transform_2(%arg0: i32) -> (i32, i32) {
    %c0_i32 = arith.constant 0 : i32
    %c0_i32_0 = arith.constant 0 : i32
    return %arg0, %c0_i32 : i32, i32
  }
  func.func @transform_3(%arg0: i32) -> (i32, i32, i32) {
    %c0_i32 = arith.constant 0 : i32
    %c0_i32_0 = arith.constant 0 : i32
    %c0_i32_1 = arith.constant 0 : i32
    return %arg0, %c0_i32, %c0_i32_0 : i32, i32, i32
  }
}

module attributes {stable_mosaic.version = 11 : i64} {
  func.func @_bn_act_kernel(%arg0: i32, %arg1: memref<512x128xf32, #tpu.memory_space<vmem>>, %arg2: memref<1x128xf32, #tpu.memory_space<vmem>>, %arg3: memref<1x128xf32, #tpu.memory_space<vmem>>, %arg4: memref<512x128xbf16, #tpu.memory_space<vmem>>) attributes {dimension_semantics = [#tpu.dimension_semantics<parallel>], iteration_bounds = array<i64: 1>, scalar_prefetch = 0 : i64, scratch_operands = 0 : i64, tpu.core_type = #tpu.core_type<tc>, window_params = [{transform_indices = @transform_0, window_bounds = array<i64: 512, 128>}, {pipeline_mode = #tpu.pipeline_mode<synchronous>, transform_indices = @transform_1, window_bounds = array<i64: 1, 128>}, {pipeline_mode = #tpu.pipeline_mode<synchronous>, transform_indices = @transform_2, window_bounds = array<i64: 1, 128>}, {transform_indices = @transform_3, window_bounds = array<i64: 512, 128>}]} {
    %c0 = arith.constant 0 : index
    %c0_0 = arith.constant 0 : index
    %0 = vector.load %arg1[%c0, %c0_0] : memref<512x128xf32, #tpu.memory_space<vmem>>, vector<512x128xf32>
    %c0_1 = arith.constant 0 : index
    %c0_2 = arith.constant 0 : index
    %1 = vector.load %arg2[%c0_1, %c0_2] : memref<1x128xf32, #tpu.memory_space<vmem>>, vector<1x128xf32>
    %2 = vector.broadcast %1 : vector<1x128xf32> to vector<512x128xf32>
    %3 = arith.mulf %0, %2 : vector<512x128xf32>
    %c0_3 = arith.constant 0 : index
    %c0_4 = arith.constant 0 : index
    %4 = vector.load %arg3[%c0_3, %c0_4] : memref<1x128xf32, #tpu.memory_space<vmem>>, vector<1x128xf32>
    %5 = vector.broadcast %4 : vector<1x128xf32> to vector<512x128xf32>
    %6 = arith.addf %3, %5 : vector<512x128xf32>
    %cst = arith.constant 0.000000e+00 : f32
    %7 = vector.broadcast %cst : f32 to vector<512x128xf32>
    %8 = arith.cmpf ogt, %6, %7 : vector<512x128xf32>
    %cst_5 = arith.constant 2.000000e-01 : f32
    %9 = vector.broadcast %cst_5 : f32 to vector<512x128xf32>
    %10 = arith.mulf %9, %6 : vector<512x128xf32>
    %11 = arith.select %8, %6, %10 : vector<512x128xi1>, vector<512x128xf32>
    %12 = arith.truncf %11 : vector<512x128xf32> to vector<512x128xbf16>
    %c0_6 = arith.constant 0 : index
    %c0_7 = arith.constant 0 : index
    %13 = vector.load %arg4[%c0_6, %c0_7] : memref<512x128xbf16, #tpu.memory_space<vmem>>, vector<512x128xbf16>
    tpu.vector_store %arg4[%c0_6, %c0_7], %12 {strides = array<i32>} : memref<512x128xbf16, #tpu.memory_space<vmem>>, vector<512x128xbf16>,
    return
  }
  func.func @transform_0(%arg0: i32) -> (i32, i32) {
    %c0_i32 = arith.constant 0 : i32
    %c0_i32_0 = arith.constant 0 : i32
    return %arg0, %c0_i32 : i32, i32
  }
  func.func @transform_1(%arg0: i32) -> (i32, i32) {
    %c0_i32 = arith.constant 0 : i32
    %c0_i32_0 = arith.constant 0 : i32
    %c0_i32_1 = arith.constant 0 : i32
    return %c0_i32, %c0_i32_0 : i32, i32
  }
  func.func @transform_2(%arg0: i32) -> (i32, i32) {
    %c0_i32 = arith.constant 0 : i32
    %c0_i32_0 = arith.constant 0 : i32
    %c0_i32_1 = arith.constant 0 : i32
    return %c0_i32, %c0_i32_0 : i32, i32
  }
  func.func @transform_3(%arg0: i32) -> (i32, i32) {
    %c0_i32 = arith.constant 0 : i32
    %c0_i32_0 = arith.constant 0 : i32
    return %arg0, %c0_i32 : i32, i32
  }
}

module attributes {stable_mosaic.version = 11 : i64} {
  func.func @_conv_stats_kernel(%arg0: i32, %arg1: memref<128x256xbf16, #tpu.memory_space<vmem>>, %arg2: memref<256x128xbf16, #tpu.memory_space<vmem>>, %arg3: memref<128x128xf32, #tpu.memory_space<vmem>>, %arg4: memref<1x2x128xf32, #tpu.memory_space<vmem>>) attributes {dimension_semantics = [#tpu.dimension_semantics<parallel>], iteration_bounds = array<i64: 1>, scalar_prefetch = 0 : i64, scratch_operands = 0 : i64, tpu.core_type = #tpu.core_type<tc>, window_params = [{transform_indices = @transform_0, window_bounds = array<i64: 128, 256>}, {pipeline_mode = #tpu.pipeline_mode<synchronous>, transform_indices = @transform_1, window_bounds = array<i64: 256, 128>}, {transform_indices = @transform_2, window_bounds = array<i64: 128, 128>}, {transform_indices = @transform_3, window_bounds = array<i64: 1, 2, 128>}]} {
    %c0 = arith.constant 0 : index
    %c0_0 = arith.constant 0 : index
    %0 = vector.load %arg1[%c0, %c0_0] : memref<128x256xbf16, #tpu.memory_space<vmem>>, vector<128x256xbf16>
    %c0_1 = arith.constant 0 : index
    %c0_2 = arith.constant 0 : index
    %1 = vector.load %arg2[%c0_1, %c0_2] : memref<256x128xbf16, #tpu.memory_space<vmem>>, vector<256x128xbf16>
    %cst = arith.constant dense<0.000000e+00> : vector<128x128xf32>
    %2 = tpu.matmul %0, %1, %cst {dimension_numbers = #tpu.dot_dimension_numbers<[1], [0], [0], [1], [0, 0, 1, 1], [], []>} : vector<128x256xbf16>, vector<256x128xbf16>, vector<128x128xf32> -> vector<128x128xf32>
    %c0_3 = arith.constant 0 : index
    %c0_4 = arith.constant 0 : index
    %3 = vector.load %arg3[%c0_3, %c0_4] : memref<128x128xf32, #tpu.memory_space<vmem>>, vector<128x128xf32>
    tpu.vector_store %arg3[%c0_3, %c0_4], %2 {strides = array<i32>} : memref<128x128xf32, #tpu.memory_space<vmem>>, vector<128x128xf32>,
    %cst_5 = arith.constant dense<0.000000e+00> : vector<128xf32>
    %4 = vector.multi_reduction <add>, %2, %cst_5 [0] : vector<128x128xf32> to vector<128xf32>
    %5 = vector.shape_cast %4 : vector<128xf32> to vector<1x128xf32>
    %c0_6 = arith.constant 0 : index
    %c0_7 = arith.constant 0 : index
    %c0_8 = arith.constant 0 : index
    %6 = vector.load %arg4[%c0_6, %c0_7, %c0_8] : memref<1x2x128xf32, #tpu.memory_space<vmem>>, vector<1x1x128xf32>
    %7 = vector.shape_cast %6 : vector<1x1x128xf32> to vector<1x128xf32>
    %8 = vector.shape_cast %5 : vector<1x128xf32> to vector<1x1x128xf32>
    tpu.vector_store %arg4[%c0_6, %c0_7, %c0_8], %8 {strides = array<i32>} : memref<1x2x128xf32, #tpu.memory_space<vmem>>, vector<1x1x128xf32>,
    %9 = arith.mulf %2, %2 : vector<128x128xf32>
    %cst_9 = arith.constant dense<0.000000e+00> : vector<128xf32>
    %10 = vector.multi_reduction <add>, %9, %cst_9 [0] : vector<128x128xf32> to vector<128xf32>
    %11 = vector.shape_cast %10 : vector<128xf32> to vector<1x128xf32>
    %c0_10 = arith.constant 0 : index
    %c1 = arith.constant 1 : index
    %c0_11 = arith.constant 0 : index
    %12 = vector.load %arg4[%c0_10, %c1, %c0_11] : memref<1x2x128xf32, #tpu.memory_space<vmem>>, vector<1x1x128xf32>
    %13 = vector.shape_cast %12 : vector<1x1x128xf32> to vector<1x128xf32>
    %14 = vector.shape_cast %11 : vector<1x128xf32> to vector<1x1x128xf32>
    tpu.vector_store %arg4[%c0_10, %c1, %c0_11], %14 {strides = array<i32>} : memref<1x2x128xf32, #tpu.memory_space<vmem>>, vector<1x1x128xf32>,
    return
  }
  func.func @transform_0(%arg0: i32) -> (i32, i32) {
    %c0_i32 = arith.constant 0 : i32
    %c0_i32_0 = arith.constant 0 : i32
    return %arg0, %c0_i32 : i32, i32
  }
  func.func @transform_1(%arg0: i32) -> (i32, i32) {
    %c0_i32 = arith.constant 0 : i32
    %c0_i32_0 = arith.constant 0 : i32
    %c0_i32_1 = arith.constant 0 : i32
    return %c0_i32, %c0_i32_0 : i32, i32
  }
  func.func @transform_2(%arg0: i32) -> (i32, i32) {
    %c0_i32 = arith.constant 0 : i32
    %c0_i32_0 = arith.constant 0 : i32
    return %arg0, %c0_i32 : i32, i32
  }
  func.func @transform_3(%arg0: i32) -> (i32, i32, i32) {
    %c0_i32 = arith.constant 0 : i32
    %c0_i32_0 = arith.constant 0 : i32
    %c0_i32_1 = arith.constant 0 : i32
    return %arg0, %c0_i32, %c0_i32_0 : i32, i32, i32
  }
}

module attributes {stable_mosaic.version = 11 : i64} {
  func.func @_bn_act_kernel(%arg0: i32, %arg1: memref<128x128xf32, #tpu.memory_space<vmem>>, %arg2: memref<1x128xf32, #tpu.memory_space<vmem>>, %arg3: memref<1x128xf32, #tpu.memory_space<vmem>>, %arg4: memref<128x128xbf16, #tpu.memory_space<vmem>>) attributes {dimension_semantics = [#tpu.dimension_semantics<parallel>], iteration_bounds = array<i64: 1>, scalar_prefetch = 0 : i64, scratch_operands = 0 : i64, tpu.core_type = #tpu.core_type<tc>, window_params = [{transform_indices = @transform_0, window_bounds = array<i64: 128, 128>}, {pipeline_mode = #tpu.pipeline_mode<synchronous>, transform_indices = @transform_1, window_bounds = array<i64: 1, 128>}, {pipeline_mode = #tpu.pipeline_mode<synchronous>, transform_indices = @transform_2, window_bounds = array<i64: 1, 128>}, {transform_indices = @transform_3, window_bounds = array<i64: 128, 128>}]} {
    %c0 = arith.constant 0 : index
    %c0_0 = arith.constant 0 : index
    %0 = vector.load %arg1[%c0, %c0_0] : memref<128x128xf32, #tpu.memory_space<vmem>>, vector<128x128xf32>
    %c0_1 = arith.constant 0 : index
    %c0_2 = arith.constant 0 : index
    %1 = vector.load %arg2[%c0_1, %c0_2] : memref<1x128xf32, #tpu.memory_space<vmem>>, vector<1x128xf32>
    %2 = vector.broadcast %1 : vector<1x128xf32> to vector<128x128xf32>
    %3 = arith.mulf %0, %2 : vector<128x128xf32>
    %c0_3 = arith.constant 0 : index
    %c0_4 = arith.constant 0 : index
    %4 = vector.load %arg3[%c0_3, %c0_4] : memref<1x128xf32, #tpu.memory_space<vmem>>, vector<1x128xf32>
    %5 = vector.broadcast %4 : vector<1x128xf32> to vector<128x128xf32>
    %6 = arith.addf %3, %5 : vector<128x128xf32>
    %cst = arith.constant 0.000000e+00 : f32
    %7 = vector.broadcast %cst : f32 to vector<128x128xf32>
    %8 = arith.cmpf ogt, %6, %7 : vector<128x128xf32>
    %cst_5 = arith.constant 2.000000e-01 : f32
    %9 = vector.broadcast %cst_5 : f32 to vector<128x128xf32>
    %10 = arith.mulf %9, %6 : vector<128x128xf32>
    %11 = arith.select %8, %6, %10 : vector<128x128xi1>, vector<128x128xf32>
    %12 = arith.truncf %11 : vector<128x128xf32> to vector<128x128xbf16>
    %c0_6 = arith.constant 0 : index
    %c0_7 = arith.constant 0 : index
    %13 = vector.load %arg4[%c0_6, %c0_7] : memref<128x128xbf16, #tpu.memory_space<vmem>>, vector<128x128xbf16>
    tpu.vector_store %arg4[%c0_6, %c0_7], %12 {strides = array<i32>} : memref<128x128xbf16, #tpu.memory_space<vmem>>, vector<128x128xbf16>,
    return
  }
  func.func @transform_0(%arg0: i32) -> (i32, i32) {
    %c0_i32 = arith.constant 0 : i32
    %c0_i32_0 = arith.constant 0 : i32
    return %arg0, %c0_i32 : i32, i32
  }
  func.func @transform_1(%arg0: i32) -> (i32, i32) {
    %c0_i32 = arith.constant 0 : i32
    %c0_i32_0 = arith.constant 0 : i32
    %c0_i32_1 = arith.constant 0 : i32
    return %c0_i32, %c0_i32_0 : i32, i32
  }
  func.func @transform_2(%arg0: i32) -> (i32, i32) {
    %c0_i32 = arith.constant 0 : i32
    %c0_i32_0 = arith.constant 0 : i32
    %c0_i32_1 = arith.constant 0 : i32
    return %c0_i32, %c0_i32_0 : i32, i32
  }
  func.func @transform_3(%arg0: i32) -> (i32, i32) {
    %c0_i32 = arith.constant 0 : i32
    %c0_i32_0 = arith.constant 0 : i32
    return %arg0, %c0_i32 : i32, i32
  }
}

module attributes {stable_mosaic.version = 11 : i64} {
  func.func @_conv_stats_kernel(%arg0: i32, %arg1: memref<32x512xbf16, #tpu.memory_space<vmem>>, %arg2: memref<512x128xbf16, #tpu.memory_space<vmem>>, %arg3: memref<32x128xf32, #tpu.memory_space<vmem>>, %arg4: memref<1x2x128xf32, #tpu.memory_space<vmem>>) attributes {dimension_semantics = [#tpu.dimension_semantics<parallel>], iteration_bounds = array<i64: 1>, scalar_prefetch = 0 : i64, scratch_operands = 0 : i64, tpu.core_type = #tpu.core_type<tc>, window_params = [{transform_indices = @transform_0, window_bounds = array<i64: 32, 512>}, {pipeline_mode = #tpu.pipeline_mode<synchronous>, transform_indices = @transform_1, window_bounds = array<i64: 512, 128>}, {transform_indices = @transform_2, window_bounds = array<i64: 32, 128>}, {transform_indices = @transform_3, window_bounds = array<i64: 1, 2, 128>}]} {
    %c0 = arith.constant 0 : index
    %c0_0 = arith.constant 0 : index
    %0 = vector.load %arg1[%c0, %c0_0] : memref<32x512xbf16, #tpu.memory_space<vmem>>, vector<32x512xbf16>
    %c0_1 = arith.constant 0 : index
    %c0_2 = arith.constant 0 : index
    %1 = vector.load %arg2[%c0_1, %c0_2] : memref<512x128xbf16, #tpu.memory_space<vmem>>, vector<512x128xbf16>
    %cst = arith.constant dense<0.000000e+00> : vector<32x128xf32>
    %2 = tpu.matmul %0, %1, %cst {dimension_numbers = #tpu.dot_dimension_numbers<[1], [0], [0], [1], [0, 0, 1, 1], [], []>} : vector<32x512xbf16>, vector<512x128xbf16>, vector<32x128xf32> -> vector<32x128xf32>
    %c0_3 = arith.constant 0 : index
    %c0_4 = arith.constant 0 : index
    %3 = vector.load %arg3[%c0_3, %c0_4] : memref<32x128xf32, #tpu.memory_space<vmem>>, vector<32x128xf32>
    tpu.vector_store %arg3[%c0_3, %c0_4], %2 {strides = array<i32>} : memref<32x128xf32, #tpu.memory_space<vmem>>, vector<32x128xf32>,
    %cst_5 = arith.constant dense<0.000000e+00> : vector<128xf32>
    %4 = vector.multi_reduction <add>, %2, %cst_5 [0] : vector<32x128xf32> to vector<128xf32>
    %5 = vector.shape_cast %4 : vector<128xf32> to vector<1x128xf32>
    %c0_6 = arith.constant 0 : index
    %c0_7 = arith.constant 0 : index
    %c0_8 = arith.constant 0 : index
    %6 = vector.load %arg4[%c0_6, %c0_7, %c0_8] : memref<1x2x128xf32, #tpu.memory_space<vmem>>, vector<1x1x128xf32>
    %7 = vector.shape_cast %6 : vector<1x1x128xf32> to vector<1x128xf32>
    %8 = vector.shape_cast %5 : vector<1x128xf32> to vector<1x1x128xf32>
    tpu.vector_store %arg4[%c0_6, %c0_7, %c0_8], %8 {strides = array<i32>} : memref<1x2x128xf32, #tpu.memory_space<vmem>>, vector<1x1x128xf32>,
    %9 = arith.mulf %2, %2 : vector<32x128xf32>
    %cst_9 = arith.constant dense<0.000000e+00> : vector<128xf32>
    %10 = vector.multi_reduction <add>, %9, %cst_9 [0] : vector<32x128xf32> to vector<128xf32>
    %11 = vector.shape_cast %10 : vector<128xf32> to vector<1x128xf32>
    %c0_10 = arith.constant 0 : index
    %c1 = arith.constant 1 : index
    %c0_11 = arith.constant 0 : index
    %12 = vector.load %arg4[%c0_10, %c1, %c0_11] : memref<1x2x128xf32, #tpu.memory_space<vmem>>, vector<1x1x128xf32>
    %13 = vector.shape_cast %12 : vector<1x1x128xf32> to vector<1x128xf32>
    %14 = vector.shape_cast %11 : vector<1x128xf32> to vector<1x1x128xf32>
    tpu.vector_store %arg4[%c0_10, %c1, %c0_11], %14 {strides = array<i32>} : memref<1x2x128xf32, #tpu.memory_space<vmem>>, vector<1x1x128xf32>,
    return
  }
  func.func @transform_0(%arg0: i32) -> (i32, i32) {
    %c0_i32 = arith.constant 0 : i32
    %c0_i32_0 = arith.constant 0 : i32
    return %arg0, %c0_i32 : i32, i32
  }
  func.func @transform_1(%arg0: i32) -> (i32, i32) {
    %c0_i32 = arith.constant 0 : i32
    %c0_i32_0 = arith.constant 0 : i32
    %c0_i32_1 = arith.constant 0 : i32
    return %c0_i32, %c0_i32_0 : i32, i32
  }
  func.func @transform_2(%arg0: i32) -> (i32, i32) {
    %c0_i32 = arith.constant 0 : i32
    %c0_i32_0 = arith.constant 0 : i32
    return %arg0, %c0_i32 : i32, i32
  }
  func.func @transform_3(%arg0: i32) -> (i32, i32, i32) {
    %c0_i32 = arith.constant 0 : i32
    %c0_i32_0 = arith.constant 0 : i32
    %c0_i32_1 = arith.constant 0 : i32
    return %arg0, %c0_i32, %c0_i32_0 : i32, i32, i32
  }
}

module attributes {stable_mosaic.version = 11 : i64} {
  func.func @_bn_act_kernel(%arg0: i32, %arg1: memref<32x128xf32, #tpu.memory_space<vmem>>, %arg2: memref<1x128xf32, #tpu.memory_space<vmem>>, %arg3: memref<1x128xf32, #tpu.memory_space<vmem>>, %arg4: memref<32x128xbf16, #tpu.memory_space<vmem>>) attributes {dimension_semantics = [#tpu.dimension_semantics<parallel>], iteration_bounds = array<i64: 1>, scalar_prefetch = 0 : i64, scratch_operands = 0 : i64, tpu.core_type = #tpu.core_type<tc>, window_params = [{transform_indices = @transform_0, window_bounds = array<i64: 32, 128>}, {pipeline_mode = #tpu.pipeline_mode<synchronous>, transform_indices = @transform_1, window_bounds = array<i64: 1, 128>}, {pipeline_mode = #tpu.pipeline_mode<synchronous>, transform_indices = @transform_2, window_bounds = array<i64: 1, 128>}, {transform_indices = @transform_3, window_bounds = array<i64: 32, 128>}]} {
    %c0 = arith.constant 0 : index
    %c0_0 = arith.constant 0 : index
    %0 = vector.load %arg1[%c0, %c0_0] : memref<32x128xf32, #tpu.memory_space<vmem>>, vector<32x128xf32>
    %c0_1 = arith.constant 0 : index
    %c0_2 = arith.constant 0 : index
    %1 = vector.load %arg2[%c0_1, %c0_2] : memref<1x128xf32, #tpu.memory_space<vmem>>, vector<1x128xf32>
    %2 = vector.broadcast %1 : vector<1x128xf32> to vector<32x128xf32>
    %3 = arith.mulf %0, %2 : vector<32x128xf32>
    %c0_3 = arith.constant 0 : index
    %c0_4 = arith.constant 0 : index
    %4 = vector.load %arg3[%c0_3, %c0_4] : memref<1x128xf32, #tpu.memory_space<vmem>>, vector<1x128xf32>
    %5 = vector.broadcast %4 : vector<1x128xf32> to vector<32x128xf32>
    %6 = arith.addf %3, %5 : vector<32x128xf32>
    %cst = arith.constant 0.000000e+00 : f32
    %7 = vector.broadcast %cst : f32 to vector<32x128xf32>
    %8 = arith.cmpf ogt, %6, %7 : vector<32x128xf32>
    %cst_5 = arith.constant 2.000000e-01 : f32
    %9 = vector.broadcast %cst_5 : f32 to vector<32x128xf32>
    %10 = arith.mulf %9, %6 : vector<32x128xf32>
    %11 = arith.select %8, %6, %10 : vector<32x128xi1>, vector<32x128xf32>
    %12 = arith.truncf %11 : vector<32x128xf32> to vector<32x128xbf16>
    %c0_6 = arith.constant 0 : index
    %c0_7 = arith.constant 0 : index
    %13 = vector.load %arg4[%c0_6, %c0_7] : memref<32x128xbf16, #tpu.memory_space<vmem>>, vector<32x128xbf16>
    tpu.vector_store %arg4[%c0_6, %c0_7], %12 {strides = array<i32>} : memref<32x128xbf16, #tpu.memory_space<vmem>>, vector<32x128xbf16>,
    return
  }
  func.func @transform_0(%arg0: i32) -> (i32, i32) {
    %c0_i32 = arith.constant 0 : i32
    %c0_i32_0 = arith.constant 0 : i32
    return %arg0, %c0_i32 : i32, i32
  }
  func.func @transform_1(%arg0: i32) -> (i32, i32) {
    %c0_i32 = arith.constant 0 : i32
    %c0_i32_0 = arith.constant 0 : i32
    %c0_i32_1 = arith.constant 0 : i32
    return %c0_i32, %c0_i32_0 : i32, i32
  }
  func.func @transform_2(%arg0: i32) -> (i32, i32) {
    %c0_i32 = arith.constant 0 : i32
    %c0_i32_0 = arith.constant 0 : i32
    %c0_i32_1 = arith.constant 0 : i32
    return %c0_i32, %c0_i32_0 : i32, i32
  }
  func.func @transform_3(%arg0: i32) -> (i32, i32) {
    %c0_i32 = arith.constant 0 : i32
    %c0_i32_0 = arith.constant 0 : i32
    return %arg0, %c0_i32 : i32, i32
  }
}

module attributes {stable_mosaic.version = 11 : i64} {
  func.func @_conv_act_kernel(%arg0: i32, %arg1: memref<16x1024xbf16, #tpu.memory_space<vmem>>, %arg2: memref<1024x128xbf16, #tpu.memory_space<vmem>>, %arg3: memref<16x128xf32, #tpu.memory_space<vmem>>) attributes {dimension_semantics = [#tpu.dimension_semantics<parallel>], iteration_bounds = array<i64: 1>, scalar_prefetch = 0 : i64, scratch_operands = 0 : i64, tpu.core_type = #tpu.core_type<tc>, window_params = [{transform_indices = @transform_0, window_bounds = array<i64: 16, 1024>}, {pipeline_mode = #tpu.pipeline_mode<synchronous>, transform_indices = @transform_1, window_bounds = array<i64: 1024, 128>}, {transform_indices = @transform_2, window_bounds = array<i64: 16, 128>}]} {
    %c0 = arith.constant 0 : index
    %c0_0 = arith.constant 0 : index
    %0 = vector.load %arg1[%c0, %c0_0] : memref<16x1024xbf16, #tpu.memory_space<vmem>>, vector<16x1024xbf16>
    %c0_1 = arith.constant 0 : index
    %c0_2 = arith.constant 0 : index
    %1 = vector.load %arg2[%c0_1, %c0_2] : memref<1024x128xbf16, #tpu.memory_space<vmem>>, vector<1024x128xbf16>
    %cst = arith.constant dense<0.000000e+00> : vector<16x128xf32>
    %2 = tpu.matmul %0, %1, %cst {dimension_numbers = #tpu.dot_dimension_numbers<[1], [0], [0], [1], [0, 0, 1, 1], [], []>} : vector<16x1024xbf16>, vector<1024x128xbf16>, vector<16x128xf32> -> vector<16x128xf32>
    %cst_3 = arith.constant 0.000000e+00 : f32
    %3 = vector.broadcast %cst_3 : f32 to vector<16x128xf32>
    %4 = arith.subf %3, %2 : vector<16x128xf32>
    %5 = math.exp %4 : vector<16x128xf32>
    %cst_4 = arith.constant 1.000000e+00 : f32
    %6 = vector.broadcast %cst_4 : f32 to vector<16x128xf32>
    %7 = arith.addf %6, %5 : vector<16x128xf32>
    %8 = tpu.reciprocal %7 {approx = true} : vector<16x128xf32> -> vector<16x128xf32>
    %c0_5 = arith.constant 0 : index
    %c0_6 = arith.constant 0 : index
    %9 = vector.load %arg3[%c0_5, %c0_6] : memref<16x128xf32, #tpu.memory_space<vmem>>, vector<16x128xf32>
    tpu.vector_store %arg3[%c0_5, %c0_6], %8 {strides = array<i32>} : memref<16x128xf32, #tpu.memory_space<vmem>>, vector<16x128xf32>,
    return
  }
  func.func @transform_0(%arg0: i32) -> (i32, i32) {
    %c0_i32 = arith.constant 0 : i32
    %c0_i32_0 = arith.constant 0 : i32
    return %arg0, %c0_i32 : i32, i32
  }
  func.func @transform_1(%arg0: i32) -> (i32, i32) {
    %c0_i32 = arith.constant 0 : i32
    %c0_i32_0 = arith.constant 0 : i32
    %c0_i32_1 = arith.constant 0 : i32
    return %c0_i32, %c0_i32_0 : i32, i32
  }
  func.func @transform_2(%arg0: i32) -> (i32, i32) {
    %c0_i32 = arith.constant 0 : i32
    %c0_i32_0 = arith.constant 0 : i32
    return %arg0, %c0_i32 : i32, i32
  }
}

</mosaic_0001>

<bundles_post_ra>
// kernel: discriminator_forward.8
= control target key start
LH: loop header
LB: loop body
LE: loop exit
PB: predicated region body
PF: predicated region fallthrough
CT: control target
= control target key end

     0   :  { %s1487_s9 = smov 0   ;;  %s1620_s0 = inlined_call_operand.vmem [shape: bf16[2048,48], index: 0, kind: input, shape index: {}]   ;;  %s1621_s1 = inlined_call_operand.vmem [shape: bf16[48,128], index: 1, kind: input, shape index: {}]   ;;  %s1622_s2 = inlined_call_operand.vmem [shape: bf16[2048,128], index: 2, kind: output, shape index: {}]  }
   0x1 LB: > { %s1038_s10 = sadd.s32 4294967295, %s1470_s9   ;;  %p1042_p0 = scmp.ge.s32.totalorder %s1470_s9, 1  ;;  %s1470_s9 = sphi %s1487_s9, %s12_s9  }
   0x2   : > { %p113_p1 = scmp.lt.s32.totalorder %s1470_s9, 5 }
   0x4   : > { %p114_p2 = pnand %p1042_p0, %p113_p1 }
   0x5   : > { %s1043_s13 = sshll.u32 (!%p114_p2), %s1038_s10, 6 }
   0x6   : > { %117 = sbr.rel (%p114_p2) target bundleno = 283 (0x11b), region = 28  ;;  %p136_p3 = scmp.lt.s32.totalorder (!%p114_p2), %s1043_s13, 255 }
   0xb   : > { %v1255_v0 = vld [vmem:[%s1621_s1 + $0x10] sm:$0xff]  ;;  %v1254_v1 = vld [vmem:[%s1621_s1 + $0x8] sm:$0xff]  ;;  %s1624_s13 = smov (!%p136_p3, %s1043_s13), 255  ;;  %v1253_v2 = vld [vmem:[%s1621_s1] sm:$0xff]  ;;  %vm396_vm0 = vcmask 392192  }
   0xc   : > { %498 = vmatpush.bf16.msra.mxu0 %v1255_v0  ;;  %1447 = vmatpush.bf16.msra.mxu1 %v1255_v0  ;;  %s1044_s16 = sshll.u32 %s1624_s13, 2 }
   0xd   : > { %1448 = vmatpush.bf16.msra.mxu2 %v1255_v0  ;;  %1449 = vmatpush.bf16.msra.mxu3 %v1255_v0  ;;  %s1512_s21 = scalar_lea.vmem %s1620_s0, %s1044_s16  ;;  %s1583_s24 = scalar_lea.vmem %s1622_s2, %s1044_s16 }
   0xe   : > { %v1221_v3 = vld [vmem:[%s1512_s21] sm:$0xff]  ;;  %v1222_v7 = vld [vmem:[%s1512_s21 + $0x8] sm:$0xff]  ;;  %v1223_v11 = vld [vmem:[%s1512_s21 + $0x10] sm:$0xff] }
   0xf   : > { %v1229_v4 = vld [vmem:[%s1512_s21 + $0x40] sm:$0xff]  ;;  %v1230_v8 = vld [vmem:[%s1512_s21 + $0x48] sm:$0xff]  ;;  %v1231_v12 = vld [vmem:[%s1512_s21 + $0x50] sm:$0xff] }
  0x10   : > { %499 = vmatpush.bf16.msra.mxu0 %v1254_v1  ;;  %1450 = vmatpush.bf16.msra.mxu1 %v1254_v1  ;;  %v1237_v5 = vld [vmem:[%s1512_s21 + $0x80] sm:$0xff]  ;;  %v1238_v9 = vld [vmem:[%s1512_s21 + $0x88] sm:$0xff]  ;;  %v1239_v13 = vld [vmem:[%s1512_s21 + $0x90] sm:$0xff] }
  0x11   : > { %1451 = vmatpush.bf16.msra.mxu2 %v1254_v1  ;;  %1452 = vmatpush.bf16.msra.mxu3 %v1254_v1  ;;  %v1245_v6 = vld [vmem:[%s1512_s21 + $0xc0] sm:$0xff]  ;;  %v1246_v10 = vld [vmem:[%s1512_s21 + $0xc8] sm:$0xff]  ;;  %v1247_v14 = vld [vmem:[%s1512_s21 + $0xd0] sm:$0xff] }
  0x12   : > { %v1224_v15 = vld [vmem:[%s1512_s21 + $0x18] sm:$0xff]  ;;  %v1225_v19 = vld [vmem:[%s1512_s21 + $0x20] sm:$0xff]  ;;  %v1226_v23 = vld [vmem:[%s1512_s21 + $0x28] sm:$0xff] }
  0x13   : > { %v1232_v16 = vld [vmem:[%s1512_s21 + $0x58] sm:$0xff]  ;;  %v1233_v20 = vld [vmem:[%s1512_s21 + $0x60] sm:$0xff]  ;;  %v1234_v24 = vld [vmem:[%s1512_s21 + $0x68] sm:$0xff] }
  0x14   : > { %500 = vmatpush.bf16.msra.mxu0 %v1253_v2  ;;  %1453 = vmatpush.bf16.msra.mxu1 %v1253_v2  ;;  %v1240_v17 = vld [vmem:[%s1512_s21 + $0x98] sm:$0xff]  ;;  %v1241_v21 = vld [vmem:[%s1512_s21 + $0xa0] sm:$0xff]  ;;  %v1242_v25 = vld [vmem:[%s1512_s21 + $0xa8] sm:$0xff] }
  0x15   : > { %1454 = vmatpush.bf16.msra.mxu2 %v1253_v2  ;;  %1455 = vmatpush.bf16.msra.mxu3 %v1253_v2  ;;  %v1248_v18 = vld [vmem:[%s1512_s21 + $0xd8] sm:$0xff]  ;;  %v1249_v22 = vld [vmem:[%s1512_s21 + $0xe0] sm:$0xff]  ;;  %v1250_v26 = vld [vmem:[%s1512_s21 + $0xe8] sm:$0xff] }
  0x16   : > { %v1227_v27 = vld [vmem:[%s1512_s21 + $0x30] sm:$0xff]  ;;  %v1228_v31 = vld [vmem:[%s1512_s21 + $0x38] sm:$0xff] }
  0x17   : > { %1187 = vmatmul.msk.bf16.vlgmr.msra.gmra.mxu0 %vm396_vm0, %v1221_v3  ;;  %1195 = vmatmul.msk.bf16.vlgmr.msra.gmra.mxu1 %vm396_vm0, %v1229_v4  ;;  %v1235_v28 = vld [vmem:[%s1512_s21 + $0x70] sm:$0xff]  ;;  %v1236_v32 = vld [vmem:[%s1512_s21 + $0x78] sm:$0xff] }
  0x18   : > { %1203 = vmatmul.msk.bf16.vlgmr.msra.gmra.mxu2 %vm396_vm0, %v1237_v5  ;;  %1211 = vmatmul.msk.bf16.vlgmr.msra.gmra.mxu3 %vm396_vm0, %v1245_v6  ;;  %v1243_v29 = vld [vmem:[%s1512_s21 + $0xb0] sm:$0xff]  ;;  %v1244_v33 = vld [vmem:[%s1512_s21 + $0xb8] sm:$0xff] }
  0x19   : > { %v1251_v30 = vld [vmem:[%s1512_s21 + $0xf0] sm:$0xff]  ;;  %v1252_v34 = vld [vmem:[%s1512_s21 + $0xf8] sm:$0xff] }
  0x27   : > { %1188 = vmatmul.msk.bf16.gmra.mxu0 %vm396_vm0, %v1222_v7  ;;  %1196 = vmatmul.msk.bf16.gmra.mxu1 %vm396_vm0, %v1230_v8 }
  0x28   : > { %1204 = vmatmul.msk.bf16.gmra.mxu2 %vm396_vm0, %v1238_v9  ;;  %1212 = vmatmul.msk.bf16.gmra.mxu3 %vm396_vm0, %v1246_v10 }
  0x37   : > { %1189 = vmatmul.msk.bf16.gmra.mxu0 %vm396_vm0, %v1223_v11  ;;  %1197 = vmatmul.msk.bf16.gmra.mxu1 %vm396_vm0, %v1231_v12 }
  0x38   : > { %1205 = vmatmul.msk.bf16.gmra.mxu2 %vm396_vm0, %v1239_v13  ;;  %1213 = vmatmul.msk.bf16.gmra.mxu3 %vm396_vm0, %v1247_v14 }
  0x47   : > { %1190 = vmatmul.msk.bf16.gmra.mxu0 %vm396_vm0, %v1224_v15  ;;  %1198 = vmatmul.msk.bf16.gmra.mxu1 %vm396_vm0, %v1232_v16 }
  0x48   : > { %1206 = vmatmul.msk.bf16.gmra.mxu2 %vm396_vm0, %v1240_v17  ;;  %1214 = vmatmul.msk.bf16.gmra.mxu3 %vm396_vm0, %v1248_v18 }
  0x57   : > { %1191 = vmatmul.msk.bf16.gmra.mxu0 %vm396_vm0, %v1225_v19  ;;  %1199 = vmatmul.msk.bf16.gmra.mxu1 %vm396_vm0, %v1233_v20 }
  0x58   : > { %1207 = vmatmul.msk.bf16.gmra.mxu2 %vm396_vm0, %v1241_v21  ;;  %1215 = vmatmul.msk.bf16.gmra.mxu3 %vm396_vm0, %v1249_v22 }
  0x67   : > { %1192 = vmatmul.msk.bf16.gmra.mxu0 %vm396_vm0, %v1226_v23  ;;  %1200 = vmatmul.msk.bf16.gmra.mxu1 %vm396_vm0, %v1234_v24 }
  0x68   : > { %1208 = vmatmul.msk.bf16.gmra.mxu2 %vm396_vm0, %v1242_v25  ;;  %1216 = vmatmul.msk.bf16.gmra.mxu3 %vm396_vm0, %v1250_v26 }
  0x77   : > { %1193 = vmatmul.msk.bf16.gmra.mxu0 %vm396_vm0, %v1227_v27  ;;  %1201 = vmatmul.msk.bf16.gmra.mxu1 %vm396_vm0, %v1235_v28 }
  0x78   : > { %1209 = vmatmul.msk.bf16.gmra.mxu2 %vm396_vm0, %v1243_v29  ;;  %1217 = vmatmul.msk.bf16.gmra.mxu3 %vm396_vm0, %v1251_v30 }
  0x87   : > { %1194 = vmatmul.msk.bf16.gmra.mxu0 %vm396_vm0, %v1228_v31  ;;  %1202 = vmatmul.msk.bf16.gmra.mxu1 %vm396_vm0, %v1236_v32 }
  0x88   : > { %1210 = vmatmul.msk.bf16.gmra.mxu2 %vm396_vm0, %v1244_v33  ;;  %1218 = vmatmul.msk.bf16.gmra.mxu3 %vm396_vm0, %v1252_v34 }
  0x94   : > { %v502_v35 = vpop.f32.mrf.mxu0  ;;  %v542_v36 = vpop.f32.mrf.mxu1 }
  0x95   : > { %v726_v37 = vmul.f32 0.2, %v502_v35  ;;  %v742_v38 = vmul.f32 0.2, %v542_v36  ;;  %vm662_vm1 = vcmp.gt.f32.partialorder %v502_v35, 0.0  ;;  %vm678_vm2 = vcmp.gt.f32.partialorder %v542_v36, 0.0 }
  0x97   : > { %v790_v45 = vsel %vm662_vm1, %v502_v35, %v726_v37  ;;  %v806_v46 = vsel %vm678_vm2, %v542_v36, %v742_v38 }
  0x9b   : > { %v582_v39 = vpop.f32.mrf.mxu2  ;;  %v622_v40 = vpop.f32.mrf.mxu3 }
  0x9c   : > { %v504_v41 = vpop.f32.mrf.mxu0  ;;  %v544_v42 = vpop.f32.mrf.mxu1  ;;  %v758_v51 = vmul.f32 0.2, %v582_v39  ;;  %v774_v52 = vmul.f32 0.2, %v622_v40  ;;  %vm694_vm5 = vcmp.gt.f32.partialorder %v582_v39, 0.0  ;;  %vm710_vm6 = vcmp.gt.f32.partialorder %v622_v40, 0.0 }
  0x9d   : > { %vm663_vm3 = vcmp.gt.f32.partialorder %v504_v41, 0.0  ;;  %v727_v43 = vmul.f32 0.2, %v504_v41  ;;  %vm679_vm4 = vcmp.gt.f32.partialorder %v544_v42, 0.0  ;;  %v743_v44 = vmul.f32 0.2, %v544_v42 }
  0x9e   : > { %v822_v59 = vsel %vm694_vm5, %v582_v39, %v758_v51  ;;  %v838_v60 = vsel %vm710_vm6, %v622_v40, %v774_v52 }
  0x9f   : > { %v791_v47 = vsel %vm663_vm3, %v504_v41, %v727_v43  ;;  %v807_v48 = vsel %vm679_vm4, %v544_v42, %v743_v44 }
  0xa0   : > { %v1259_v49 = vpack.c.bf16 %v791_v47, %v790_v45  ;;  %v1299_v50 = vpack.c.bf16 %v807_v48, %v806_v46 }
  0xa2   : > { %1260 = vst [vmem:[%s1583_s24] sm:$0xff] %v1259_v49  }
  0xa3   : > { %1423 = vst [vmem:[%s1583_s24 + $0x40] sm:$0xff] %v1299_v50   ;;  %v584_v53 = vpop.f32.mrf.mxu2  ;;  %v624_v54 = vpop.f32.mrf.mxu3 }
  0xa4   : > { %vm695_vm7 = vcmp.gt.f32.partialorder %v584_v53, 0.0  ;;  %v759_v55 = vmul.f32 0.2, %v584_v53  ;;  %vm711_vm8 = vcmp.gt.f32.partialorder %v624_v54, 0.0  ;;  %v775_v56 = vmul.f32 0.2, %v624_v54  ;;  %v507_v57 = vpop.f32.mrf.mxu0  ;;  %v547_v58 = vpop.f32.mrf.mxu1 }
  0xa5   : > { %v728_v1 = vmul.f32 0.2, %v507_v57  ;;  %v744_v2 = vmul.f32 0.2, %v547_v58  ;;  %vm664_vm9 = vcmp.gt.f32.partialorder %v507_v57, 0.0  ;;  %vm680_vm10 = vcmp.gt.f32.partialorder %v547_v58, 0.0 }
  0xa6   : > { %v823_v61 = vsel %vm695_vm7, %v584_v53, %v759_v55  ;;  %v839_v62 = vsel %vm711_vm8, %v624_v54, %v775_v56 }
  0xa7   : > { %v1339_v63 = vpack.c.bf16 %v823_v61, %v822_v59  ;;  %v1379_v0 = vpack.c.bf16 %v839_v62, %v838_v60  ;;  %v792_v9 = vsel %vm664_vm9, %v507_v57, %v728_v1  ;;  %v808_v10 = vsel %vm680_vm10, %v547_v58, %v744_v2 }
  0xa9   : > { %1431 = vst [vmem:[%s1583_s24 + $0x80] sm:$0xff] %v1339_v63  }
  0xaa   : > { %1439 = vst [vmem:[%s1583_s24 + $0xc0] sm:$0xff] %v1379_v0  }
  0xab   : > { %v587_v3 = vpop.f32.mrf.mxu2  ;;  %v627_v4 = vpop.f32.mrf.mxu3 }
  0xac   : > { %v509_v5 = vpop.f32.mrf.mxu0  ;;  %v549_v6 = vpop.f32.mrf.mxu1  ;;  %v760_v15 = vmul.f32 0.2, %v587_v3  ;;  %v776_v16 = vmul.f32 0.2, %v627_v4  ;;  %vm696_vm13 = vcmp.gt.f32.partialorder %v587_v3, 0.0  ;;  %vm712_vm14 = vcmp.gt.f32.partialorder %v627_v4, 0.0 }
  0xad   : > { %vm665_vm11 = vcmp.gt.f32.partialorder %v509_v5, 0.0  ;;  %v729_v7 = vmul.f32 0.2, %v509_v5  ;;  %vm681_vm12 = vcmp.gt.f32.partialorder %v549_v6, 0.0  ;;  %v745_v8 = vmul.f32 0.2, %v549_v6 }
  0xae   : > { %v824_v23 = vsel %vm696_vm13, %v587_v3, %v760_v15  ;;  %v840_v24 = vsel %vm712_vm14, %v627_v4, %v776_v16 }
  0xaf   : > { %v793_v11 = vsel %vm665_vm11, %v509_v5, %v729_v7  ;;  %v809_v12 = vsel %vm681_vm12, %v549_v6, %v745_v8 }
  0xb0   : > { %v1264_v13 = vpack.c.bf16 %v793_v11, %v792_v9  ;;  %v1304_v14 = vpack.c.bf16 %v809_v12, %v808_v10 }
  0xb2   : > { %1416 = vst [vmem:[%s1583_s24 + $0x8] sm:$0xff] %v1264_v13  }
  0xb3   : > { %1424 = vst [vmem:[%s1583_s24 + $0x48] sm:$0xff] %v1304_v14   ;;  %v589_v17 = vpop.f32.mrf.mxu2  ;;  %v629_v18 = vpop.f32.mrf.mxu3 }
  0xb4   : > { %vm697_vm15 = vcmp.gt.f32.partialorder %v589_v17, 0.0  ;;  %v761_v19 = vmul.f32 0.2, %v589_v17  ;;  %vm713_vm0 = vcmp.gt.f32.partialorder %v629_v18, 0.0  ;;  %v777_v20 = vmul.f32 0.2, %v629_v18  ;;  %v512_v21 = vpop.f32.mrf.mxu0  ;;  %v552_v22 = vpop.f32.mrf.mxu1 }
  0xb5   : > { %v730_v29 = vmul.f32 0.2, %v512_v21  ;;  %v746_v30 = vmul.f32 0.2, %v552_v22  ;;  %vm666_vm1 = vcmp.gt.f32.partialorder %v512_v21, 0.0  ;;  %vm682_vm2 = vcmp.gt.f32.partialorder %v552_v22, 0.0 }
  0xb6   : > { %v825_v25 = vsel %vm697_vm15, %v589_v17, %v761_v19  ;;  %v841_v26 = vsel %vm713_vm0, %v629_v18, %v777_v20 }
  0xb7   : > { %v1344_v27 = vpack.c.bf16 %v825_v25, %v824_v23  ;;  %v1384_v28 = vpack.c.bf16 %v841_v26, %v840_v24  ;;  %v794_v37 = vsel %vm666_vm1, %v512_v21, %v730_v29  ;;  %v810_v38 = vsel %vm682_vm2, %v552_v22, %v746_v30 }
  0xb9   : > { %1432 = vst [vmem:[%s1583_s24 + $0x88] sm:$0xff] %v1344_v27  }
  0xba   : > { %1440 = vst [vmem:[%s1583_s24 + $0xc8] sm:$0xff] %v1384_v28  }
  0xbb   : > { %v592_v31 = vpop.f32.mrf.mxu2  ;;  %v632_v32 = vpop.f32.mrf.mxu3 }
  0xbc   : > { %v514_v33 = vpop.f32.mrf.mxu0  ;;  %v554_v34 = vpop.f32.mrf.mxu1  ;;  %v762_v43 = vmul.f32 0.2, %v592_v31  ;;  %v778_v44 = vmul.f32 0.2, %v632_v32  ;;  %vm698_vm5 = vcmp.gt.f32.partialorder %v592_v31, 0.0  ;;  %vm714_vm6 = vcmp.gt.f32.partialorder %v632_v32, 0.0 }
  0xbd   : > { %vm667_vm3 = vcmp.gt.f32.partialorder %v514_v33, 0.0  ;;  %v731_v35 = vmul.f32 0.2, %v514_v33  ;;  %vm683_vm4 = vcmp.gt.f32.partialorder %v554_v34, 0.0  ;;  %v747_v36 = vmul.f32 0.2, %v554_v34 }
  0xbe   : > { %v826_v51 = vsel %vm698_vm5, %v592_v31, %v762_v43  ;;  %v842_v52 = vsel %vm714_vm6, %v632_v32, %v778_v44 }
  0xbf   : > { %v795_v39 = vsel %vm667_vm3, %v514_v33, %v731_v35  ;;  %v811_v40 = vsel %vm683_vm4, %v554_v34, %v747_v36 }
  0xc0   : > { %v1269_v41 = vpack.c.bf16 %v795_v39, %v794_v37  ;;  %v1309_v42 = vpack.c.bf16 %v811_v40, %v810_v38 }
  0xc2   : > { %1417 = vst [vmem:[%s1583_s24 + $0x10] sm:$0xff] %v1269_v41  }
  0xc3   : > { %1425 = vst [vmem:[%s1583_s24 + $0x50] sm:$0xff] %v1309_v42   ;;  %v594_v45 = vpop.f32.mrf.mxu2  ;;  %v634_v46 = vpop.f32.mrf.mxu3 }
  0xc4   : > { %vm699_vm7 = vcmp.gt.f32.partialorder %v594_v45, 0.0  ;;  %v763_v47 = vmul.f32 0.2, %v594_v45  ;;  %vm715_vm8 = vcmp.gt.f32.partialorder %v634_v46, 0.0  ;;  %v779_v48 = vmul.f32 0.2, %v634_v46  ;;  %v517_v49 = vpop.f32.mrf.mxu0  ;;  %v557_v50 = vpop.f32.mrf.mxu1 }
  0xc5   : > { %v732_v57 = vmul.f32 0.2, %v517_v49  ;;  %v748_v58 = vmul.f32 0.2, %v557_v50  ;;  %vm668_vm9 = vcmp.gt.f32.partialorder %v517_v49, 0.0  ;;  %vm684_vm10 = vcmp.gt.f32.partialorder %v557_v50, 0.0 }
  0xc6   : > { %v827_v53 = vsel %vm699_vm7, %v594_v45, %v763_v47  ;;  %v843_v54 = vsel %vm715_vm8, %v634_v46, %v779_v48 }
  0xc7   : > { %v1349_v55 = vpack.c.bf16 %v827_v53, %v826_v51  ;;  %v1389_v56 = vpack.c.bf16 %v843_v54, %v842_v52  ;;  %v796_v1 = vsel %vm668_vm9, %v517_v49, %v732_v57  ;;  %v812_v2 = vsel %vm684_vm10, %v557_v50, %v748_v58 }
  0xc9   : > { %1433 = vst [vmem:[%s1583_s24 + $0x90] sm:$0xff] %v1349_v55  }
  0xca   : > { %1441 = vst [vmem:[%s1583_s24 + $0xd0] sm:$0xff] %v1389_v56  }
  0xcb   : > { %v597_v59 = vpop.f32.mrf.mxu2  ;;  %v637_v60 = vpop.f32.mrf.mxu3 }
  0xcc   : > { %v519_v61 = vpop.f32.mrf.mxu0  ;;  %v559_v62 = vpop.f32.mrf.mxu1  ;;  %v764_v7 = vmul.f32 0.2, %v597_v59  ;;  %v780_v8 = vmul.f32 0.2, %v637_v60  ;;  %vm700_vm13 = vcmp.gt.f32.partialorder %v597_v59, 0.0  ;;  %vm716_vm14 = vcmp.gt.f32.partialorder %v637_v60, 0.0 }
  0xcd   : > { %vm669_vm11 = vcmp.gt.f32.partialorder %v519_v61, 0.0  ;;  %v733_v63 = vmul.f32 0.2, %v519_v61  ;;  %vm685_vm12 = vcmp.gt.f32.partialorder %v559_v62, 0.0  ;;  %v749_v0 = vmul.f32 0.2, %v559_v62 }
  0xce   : > { %v828_v15 = vsel %vm700_vm13, %v597_v59, %v764_v7  ;;  %v844_v16 = vsel %vm716_vm14, %v637_v60, %v780_v8 }
  0xcf   : > { %v797_v3 = vsel %vm669_vm11, %v519_v61, %v733_v63  ;;  %v813_v4 = vsel %vm685_vm12, %v559_v62, %v749_v0 }
  0xd0   : > { %v1274_v5 = vpack.c.bf16 %v797_v3, %v796_v1  ;;  %v1314_v6 = vpack.c.bf16 %v813_v4, %v812_v2 }
  0xd2   : > { %1418 = vst [vmem:[%s1583_s24 + $0x18] sm:$0xff] %v1274_v5  }
  0xd3   : > { %1426 = vst [vmem:[%s1583_s24 + $0x58] sm:$0xff] %v1314_v6   ;;  %v599_v9 = vpop.f32.mrf.mxu2  ;;  %v639_v10 = vpop.f32.mrf.mxu3 }
  0xd4   : > { %vm701_vm15 = vcmp.gt.f32.partialorder %v599_v9, 0.0  ;;  %v765_v11 = vmul.f32 0.2, %v599_v9  ;;  %vm717_vm0 = vcmp.gt.f32.partialorder %v639_v10, 0.0  ;;  %v781_v12 = vmul.f32 0.2, %v639_v10  ;;  %v522_v13 = vpop.f32.mrf.mxu0  ;;  %v562_v14 = vpop.f32.mrf.mxu1 }
  0xd5   : > { %v734_v21 = vmul.f32 0.2, %v522_v13  ;;  %v750_v22 = vmul.f32 0.2, %v562_v14  ;;  %vm670_vm1 = vcmp.gt.f32.partialorder %v522_v13, 0.0  ;;  %vm686_vm2 = vcmp.gt.f32.partialorder %v562_v14, 0.0 }
  0xd6   : > { %v829_v17 = vsel %vm701_vm15, %v599_v9, %v765_v11  ;;  %v845_v18 = vsel %vm717_vm0, %v639_v10, %v781_v12 }
  0xd7   : > { %v1354_v19 = vpack.c.bf16 %v829_v17, %v828_v15  ;;  %v1394_v20 = vpack.c.bf16 %v845_v18, %v844_v16  ;;  %v798_v29 = vsel %vm670_vm1, %v522_v13, %v734_v21  ;;  %v814_v30 = vsel %vm686_vm2, %v562_v14, %v750_v22 }
  0xd9   : > { %1434 = vst [vmem:[%s1583_s24 + $0x98] sm:$0xff] %v1354_v19  }
  0xda   : > { %1442 = vst [vmem:[%s1583_s24 + $0xd8] sm:$0xff] %v1394_v20  }
  0xdb   : > { %v602_v23 = vpop.f32.mrf.mxu2  ;;  %v642_v24 = vpop.f32.mrf.mxu3 }
  0xdc   : > { %v524_v25 = vpop.f32.mrf.mxu0  ;;  %v564_v26 = vpop.f32.mrf.mxu1  ;;  %v766_v35 = vmul.f32 0.2, %v602_v23  ;;  %v782_v36 = vmul.f32 0.2, %v642_v24  ;;  %vm702_vm5 = vcmp.gt.f32.partialorder %v602_v23, 0.0  ;;  %vm718_vm6 = vcmp.gt.f32.partialorder %v642_v24, 0.0 }
  0xdd   : > { %vm671_vm3 = vcmp.gt.f32.partialorder %v524_v25, 0.0  ;;  %v735_v27 = vmul.f32 0.2, %v524_v25  ;;  %vm687_vm4 = vcmp.gt.f32.partialorder %v564_v26, 0.0  ;;  %v751_v28 = vmul.f32 0.2, %v564_v26 }
  0xde   : > { %v830_v43 = vsel %vm702_vm5, %v602_v23, %v766_v35  ;;  %v846_v44 = vsel %vm718_vm6, %v642_v24, %v782_v36 }
  0xdf   : > { %v799_v31 = vsel %vm671_vm3, %v524_v25, %v735_v27  ;;  %v815_v32 = vsel %vm687_vm4, %v564_v26, %v751_v28 }
  0xe0   : > { %v1279_v33 = vpack.c.bf16 %v799_v31, %v798_v29  ;;  %v1319_v34 = vpack.c.bf16 %v815_v32, %v814_v30 }
  0xe2   : > { %1419 = vst [vmem:[%s1583_s24 + $0x20] sm:$0xff] %v1279_v33  }
  0xe3   : > { %1427 = vst [vmem:[%s1583_s24 + $0x60] sm:$0xff] %v1319_v34   ;;  %v604_v37 = vpop.f32.mrf.mxu2  ;;  %v644_v38 = vpop.f32.mrf.mxu3 }
  0xe4   : > { %vm703_vm7 = vcmp.gt.f32.partialorder %v604_v37, 0.0  ;;  %v767_v39 = vmul.f32 0.2, %v604_v37  ;;  %vm719_vm8 = vcmp.gt.f32.partialorder %v644_v38, 0.0  ;;  %v783_v40 = vmul.f32 0.2, %v644_v38  ;;  %v527_v41 = vpop.f32.mrf.mxu0  ;;  %v567_v42 = vpop.f32.mrf.mxu1 }
  0xe5   : > { %v736_v49 = vmul.f32 0.2, %v527_v41  ;;  %v752_v50 = vmul.f32 0.2, %v567_v42  ;;  %vm672_vm9 = vcmp.gt.f32.partialorder %v527_v41, 0.0  ;;  %vm688_vm10 = vcmp.gt.f32.partialorder %v567_v42, 0.0 }
  0xe6   : > { %v831_v45 = vsel %vm703_vm7, %v604_v37, %v767_v39  ;;  %v847_v46 = vsel %vm719_vm8, %v644_v38, %v783_v40 }
  0xe7   : > { %v1359_v47 = vpack.c.bf16 %v831_v45, %v830_v43  ;;  %v1399_v48 = vpack.c.bf16 %v847_v46, %v846_v44  ;;  %v800_v57 = vsel %vm672_vm9, %v527_v41, %v736_v49  ;;  %v816_v58 = vsel %vm688_vm10, %v567_v42, %v752_v50 }
  0xe9   : > { %1435 = vst [vmem:[%s1583_s24 + $0xa0] sm:$0xff] %v1359_v47  }
  0xea   : > { %1443 = vst [vmem:[%s1583_s24 + $0xe0] sm:$0xff] %v1399_v48  }
  0xeb   : > { %v607_v51 = vpop.f32.mrf.mxu2  ;;  %v647_v52 = vpop.f32.mrf.mxu3 }
  0xec   : > { %v529_v53 = vpop.f32.mrf.mxu0  ;;  %v569_v54 = vpop.f32.mrf.mxu1  ;;  %v768_v63 = vmul.f32 0.2, %v607_v51  ;;  %v784_v0 = vmul.f32 0.2, %v647_v52  ;;  %vm704_vm13 = vcmp.gt.f32.partialorder %v607_v51, 0.0  ;;  %vm720_vm14 = vcmp.gt.f32.partialorder %v647_v52, 0.0 }
  0xed   : > { %vm673_vm11 = vcmp.gt.f32.partialorder %v529_v53, 0.0  ;;  %v737_v55 = vmul.f32 0.2, %v529_v53  ;;  %vm689_vm12 = vcmp.gt.f32.partialorder %v569_v54, 0.0  ;;  %v753_v56 = vmul.f32 0.2, %v569_v54 }
  0xee   : > { %v832_v7 = vsel %vm704_vm13, %v607_v51, %v768_v63  ;;  %v848_v8 = vsel %vm720_vm14, %v647_v52, %v784_v0 }
  0xef   : > { %v801_v59 = vsel %vm673_vm11, %v529_v53, %v737_v55  ;;  %v817_v60 = vsel %vm689_vm12, %v569_v54, %v753_v56 }
  0xf0   : > { %v1284_v61 = vpack.c.bf16 %v801_v59, %v800_v57  ;;  %v1324_v62 = vpack.c.bf16 %v817_v60, %v816_v58 }
  0xf2   : > { %1420 = vst [vmem:[%s1583_s24 + $0x28] sm:$0xff] %v1284_v61  }
  0xf3   : > { %1428 = vst [vmem:[%s1583_s24 + $0x68] sm:$0xff] %v1324_v62   ;;  %v609_v1 = vpop.f32.mrf.mxu2  ;;  %v649_v2 = vpop.f32.mrf.mxu3 }
  0xf4   : > { %vm705_vm15 = vcmp.gt.f32.partialorder %v609_v1, 0.0  ;;  %v769_v3 = vmul.f32 0.2, %v609_v1  ;;  %vm721_vm0 = vcmp.gt.f32.partialorder %v649_v2, 0.0  ;;  %v785_v4 = vmul.f32 0.2, %v649_v2  ;;  %v532_v5 = vpop.f32.mrf.mxu0  ;;  %v572_v6 = vpop.f32.mrf.mxu1 }
  0xf5   : > { %v738_v13 = vmul.f32 0.2, %v532_v5  ;;  %v754_v14 = vmul.f32 0.2, %v572_v6  ;;  %vm674_vm1 = vcmp.gt.f32.partialorder %v532_v5, 0.0  ;;  %vm690_vm2 = vcmp.gt.f32.partialorder %v572_v6, 0.0 }
  0xf6   : > { %v833_v9 = vsel %vm705_vm15, %v609_v1, %v769_v3  ;;  %v849_v10 = vsel %vm721_vm0, %v649_v2, %v785_v4 }
  0xf7   : > { %v1364_v11 = vpack.c.bf16 %v833_v9, %v832_v7  ;;  %v1404_v12 = vpack.c.bf16 %v849_v10, %v848_v8  ;;  %v802_v21 = vsel %vm674_vm1, %v532_v5, %v738_v13  ;;  %v818_v22 = vsel %vm690_vm2, %v572_v6, %v754_v14 }
  0xf9   : > { %1436 = vst [vmem:[%s1583_s24 + $0xa8] sm:$0xff] %v1364_v11  }
  0xfa   : > { %1444 = vst [vmem:[%s1583_s24 + $0xe8] sm:$0xff] %v1404_v12  }
  0xfb   : > { %v612_v15 = vpop.f32.mrf.mxu2  ;;  %v652_v16 = vpop.f32.mrf.mxu3 }
  0xfc   : > { %v534_v17 = vpop.f32.mrf.mxu0  ;;  %v574_v18 = vpop.f32.mrf.mxu1  ;;  %v770_v27 = vmul.f32 0.2, %v612_v15  ;;  %v786_v28 = vmul.f32 0.2, %v652_v16  ;;  %vm706_vm5 = vcmp.gt.f32.partialorder %v612_v15, 0.0  ;;  %vm722_vm6 = vcmp.gt.f32.partialorder %v652_v16, 0.0 }
  0xfd   : > { %vm675_vm3 = vcmp.gt.f32.partialorder %v534_v17, 0.0  ;;  %v739_v19 = vmul.f32 0.2, %v534_v17  ;;  %vm691_vm4 = vcmp.gt.f32.partialorder %v574_v18, 0.0  ;;  %v755_v20 = vmul.f32 0.2, %v574_v18 }
  0xfe   : > { %v834_v35 = vsel %vm706_vm5, %v612_v15, %v770_v27  ;;  %v850_v36 = vsel %vm722_vm6, %v652_v16, %v786_v28 }
  0xff   : > { %v803_v23 = vsel %vm675_vm3, %v534_v17, %v739_v19  ;;  %v819_v24 = vsel %vm691_vm4, %v574_v18, %v755_v20 }
 0x100   : > { %v1289_v25 = vpack.c.bf16 %v803_v23, %v802_v21  ;;  %v1329_v26 = vpack.c.bf16 %v819_v24, %v818_v22 }
 0x102   : > { %1421 = vst [vmem:[%s1583_s24 + $0x30] sm:$0xff] %v1289_v25  }
 0x103   : > { %1429 = vst [vmem:[%s1583_s24 + $0x70] sm:$0xff] %v1329_v26   ;;  %v614_v29 = vpop.f32.mrf.mxu2  ;;  %v654_v30 = vpop.f32.mrf.mxu3 }
 0x104   : > { %vm707_vm7 = vcmp.gt.f32.partialorder %v614_v29, 0.0  ;;  %v771_v31 = vmul.f32 0.2, %v614_v29  ;;  %vm723_vm8 = vcmp.gt.f32.partialorder %v654_v30, 0.0  ;;  %v787_v32 = vmul.f32 0.2, %v654_v30  ;;  %v537_v33 = vpop.f32.mrf.mxu0  ;;  %v577_v34 = vpop.f32.mrf.mxu1 }
 0x105   : > { %v740_v41 = vmul.f32 0.2, %v537_v33  ;;  %v756_v42 = vmul.f32 0.2, %v577_v34  ;;  %vm676_vm9 = vcmp.gt.f32.partialorder %v537_v33, 0.0  ;;  %vm692_vm10 = vcmp.gt.f32.partialorder %v577_v34, 0.0 }
 0x106   : > { %v835_v37 = vsel %vm707_vm7, %v614_v29, %v771_v31  ;;  %v851_v38 = vsel %vm723_vm8, %v654_v30, %v787_v32 }
 0x107   : > { %v1369_v39 = vpack.c.bf16 %v835_v37, %v834_v35  ;;  %v1409_v40 = vpack.c.bf16 %v851_v38, %v850_v36  ;;  %v804_v49 = vsel %vm676_vm9, %v537_v33, %v740_v41  ;;  %v820_v50 = vsel %vm692_vm10, %v577_v34, %v756_v42 }
 0x109   : > { %1437 = vst [vmem:[%s1583_s24 + $0xb0] sm:$0xff] %v1369_v39  }
 0x10a   : > { %1445 = vst [vmem:[%s1583_s24 + $0xf0] sm:$0xff] %v1409_v40  }
 0x10b   : > { %v617_v43 = vpop.f32.mrf.mxu2  ;;  %v657_v44 = vpop.f32.mrf.mxu3 }
 0x10c   : > { %v539_v45 = vpop.f32.mrf.mxu0  ;;  %v579_v46 = vpop.f32.mrf.mxu1  ;;  %v772_v55 = vmul.f32 0.2, %v617_v43  ;;  %v788_v56 = vmul.f32 0.2, %v657_v44  ;;  %vm708_vm13 = vcmp.gt.f32.partialorder %v617_v43, 0.0  ;;  %vm724_vm14 = vcmp.gt.f32.partialorder %v657_v44, 0.0 }
 0x10d   : > { %vm677_vm11 = vcmp.gt.f32.partialorder %v539_v45, 0.0  ;;  %v741_v47 = vmul.f32 0.2, %v539_v45  ;;  %vm693_vm12 = vcmp.gt.f32.partialorder %v579_v46, 0.0  ;;  %v757_v48 = vmul.f32 0.2, %v579_v46 }
 0x10e   : > { %v836_v61 = vsel %vm708_vm13, %v617_v43, %v772_v55  ;;  %v852_v62 = vsel %vm724_vm14, %v657_v44, %v788_v56 }
 0x10f   : > { %v805_v51 = vsel %vm677_vm11, %v539_v45, %v741_v47  ;;  %v821_v52 = vsel %vm693_vm12, %v579_v46, %v757_v48 }
 0x110   : > { %v1294_v53 = vpack.c.bf16 %v805_v51, %v804_v49  ;;  %v1334_v54 = vpack.c.bf16 %v821_v52, %v820_v50 }
 0x112   : > { %1422 = vst [vmem:[%s1583_s24 + $0x38] sm:$0xff] %v1294_v53  }
 0x113   : > { %1430 = vst [vmem:[%s1583_s24 + $0x78] sm:$0xff] %v1334_v54   ;;  %v619_v57 = vpop.f32.mrf.mxu2  ;;  %v659_v58 = vpop.f32.mrf.mxu3 }
 0x114   : > { %vm709_vm15 = vcmp.gt.f32.partialorder %v619_v57, 0.0  ;;  %v773_v59 = vmul.f32 0.2, %v619_v57  ;;  %vm725_vm0 = vcmp.gt.f32.partialorder %v659_v58, 0.0  ;;  %v789_v60 = vmul.f32 0.2, %v659_v58 }
 0x116   : > { %v837_v63 = vsel %vm709_vm15, %v619_v57, %v773_v59  ;;  %v853_v0 = vsel %vm725_vm0, %v659_v58, %v789_v60 }
 0x117   : > { %v1374_v1 = vpack.c.bf16 %v837_v63, %v836_v61  ;;  %v1414_v2 = vpack.c.bf16 %v853_v0, %v852_v62 }
 0x119   : > { %1438 = vst [vmem:[%s1583_s24 + $0xb8] sm:$0xff] %v1374_v1  }
 0x11a   : > { %1446 = vst [vmem:[%s1583_s24 + $0xf8] sm:$0xff] %v1414_v2  }
 0x11b PF: > { %s12_s9 = sadd.s32 1, %s1470_s9  }
 0x11c   : > { %p9_p4 = scmp.ge.s32.totalorder %s12_s9, 6  }
 0x11e   :  { %11 = sbr.rel (!%p9_p4) target bundleno = 1 (0x1), region = 58 }

// kernel: discriminator_forward.9
= control target key start
LH: loop header
LB: loop body
LE: loop exit
PB: predicated region body
PF: predicated region fallthrough
CT: control target
= control target key end

     0   :  { %s1628_s1 = inlined_call_operand.vmem [shape: bf16[128,128], index: 1, kind: input, shape index: {}]   ;;  %s1629_s0 = inlined_call_operand.vmem [shape: bf16[512,128], index: 0, kind: input, shape index: {}]   ;;  %s1630_s2 = inlined_call_operand.vmem [shape: f32[512,128], index: 2, kind: output, shape index: {0}]   ;;  %s1631_s3 = inlined_call_operand.vmem [shape: f32[1,2,128], index: 3, kind: output, shape index: {1}]  }
   0x1   :  { %v977_v0 = vld [vmem:[%s1628_s1 + $0x38] sm:$0xff]  ;;  %v976_v1 = vld [vmem:[%s1628_s1 + $0x30] sm:$0xff]  ;;  %v975_v2 = vld [vmem:[%s1628_s1 + $0x28] sm:$0xff] }
   0x2   :  { %333 = vmatpush.bf16.msra.mxu0 %v977_v0  ;;  %978 = vmatpush.bf16.msra.mxu1 %v977_v0  ;;  %v974_v3 = vld [vmem:[%s1628_s1 + $0x20] sm:$0xff]  ;;  %v973_v4 = vld [vmem:[%s1628_s1 + $0x18] sm:$0xff]  ;;  %v972_v5 = vld [vmem:[%s1628_s1 + $0x10] sm:$0xff] }
   0x3   :  { %979 = vmatpush.bf16.msra.mxu2 %v977_v0  ;;  %980 = vmatpush.bf16.msra.mxu3 %v977_v0  ;;  %v971_v6 = vld [vmem:[%s1628_s1 + $0x8] sm:$0xff]  ;;  %v970_v7 = vld [vmem:[%s1628_s1] sm:$0xff]  ;;  %v940_v13 = vld [vmem:[%s1629_s0 + $0x10] sm:$0xff] }
   0x4   :  { %v938_v8 = vld [vmem:[%s1629_s0] sm:$0xff]  ;;  %v939_v10 = vld [vmem:[%s1629_s0 + $0x8] sm:$0xff]  ;;  %v948_v14 = vld [vmem:[%s1629_s0 + $0x50] sm:$0xff] }
   0x5   :  { %v946_v9 = vld [vmem:[%s1629_s0 + $0x40] sm:$0xff]  ;;  %v947_v11 = vld [vmem:[%s1629_s0 + $0x48] sm:$0xff]  ;;  %v941_v16 = vld [vmem:[%s1629_s0 + $0x18] sm:$0xff] }
   0x6   :  { %334 = vmatpush.bf16.msra.mxu0 %v976_v1  ;;  %981 = vmatpush.bf16.msra.mxu1 %v976_v1  ;;  %v954_v12 = vld [vmem:[%s1629_s0 + $0x80] sm:$0xff]  ;;  %v955_v15 = vld [vmem:[%s1629_s0 + $0x88] sm:$0xff]  ;;  %v949_v17 = vld [vmem:[%s1629_s0 + $0x58] sm:$0xff] }
   0x7   :  { %982 = vmatpush.bf16.msra.mxu2 %v976_v1  ;;  %983 = vmatpush.bf16.msra.mxu3 %v976_v1  ;;  %v956_v18 = vld [vmem:[%s1629_s0 + $0x90] sm:$0xff]  ;;  %v962_v19 = vld [vmem:[%s1629_s0 + $0xc0] sm:$0xff]  ;;  %v957_v22 = vld [vmem:[%s1629_s0 + $0x98] sm:$0xff] }
   0x8   :  { %v942_v20 = vld [vmem:[%s1629_s0 + $0x20] sm:$0xff]  ;;  %v963_v23 = vld [vmem:[%s1629_s0 + $0xc8] sm:$0xff]  ;;  %v964_v27 = vld [vmem:[%s1629_s0 + $0xd0] sm:$0xff] }
   0x9   :  { %v950_v21 = vld [vmem:[%s1629_s0 + $0x60] sm:$0xff]  ;;  %v943_v24 = vld [vmem:[%s1629_s0 + $0x28] sm:$0xff]  ;;  %v944_v28 = vld [vmem:[%s1629_s0 + $0x30] sm:$0xff] }
   0xa   :  { %335 = vmatpush.bf16.msra.mxu0 %v975_v2  ;;  %984 = vmatpush.bf16.msra.mxu1 %v975_v2  ;;  %v951_v25 = vld [vmem:[%s1629_s0 + $0x68] sm:$0xff]  ;;  %v958_v26 = vld [vmem:[%s1629_s0 + $0xa0] sm:$0xff]  ;;  %v952_v29 = vld [vmem:[%s1629_s0 + $0x70] sm:$0xff] }
   0xb   :  { %985 = vmatpush.bf16.msra.mxu2 %v975_v2  ;;  %986 = vmatpush.bf16.msra.mxu3 %v975_v2  ;;  %v959_v30 = vld [vmem:[%s1629_s0 + $0xa8] sm:$0xff]  ;;  %v965_v31 = vld [vmem:[%s1629_s0 + $0xd8] sm:$0xff]  ;;  %v960_v34 = vld [vmem:[%s1629_s0 + $0xb0] sm:$0xff] }
   0xc   :  { %v945_v32 = vld [vmem:[%s1629_s0 + $0x38] sm:$0xff]  ;;  %v966_v35 = vld [vmem:[%s1629_s0 + $0xe0] sm:$0xff]  ;;  %v967_v39 = vld [vmem:[%s1629_s0 + $0xe8] sm:$0xff] }
   0xd   :  { %v953_v33 = vld [vmem:[%s1629_s0 + $0x78] sm:$0xff]  ;;  %v968_v51 = vld [vmem:[%s1629_s0 + $0xf0] sm:$0xff] }
   0xe   :  { %336 = vmatpush.bf16.msra.mxu0 %v974_v3  ;;  %987 = vmatpush.bf16.msra.mxu1 %v974_v3  ;;  %v961_v38 = vld [vmem:[%s1629_s0 + $0xb8] sm:$0xff] }
   0xf   :  { %988 = vmatpush.bf16.msra.mxu2 %v974_v3  ;;  %989 = vmatpush.bf16.msra.mxu3 %v974_v3  ;;  %v969_v0 = vld [vmem:[%s1629_s0 + $0xf8] sm:$0xff] }
  0x12   :  { %337 = vmatpush.bf16.msra.mxu0 %v973_v4  ;;  %990 = vmatpush.bf16.msra.mxu1 %v973_v4 }
  0x13   :  { %991 = vmatpush.bf16.msra.mxu2 %v973_v4  ;;  %992 = vmatpush.bf16.msra.mxu3 %v973_v4 }
  0x16   :  { %338 = vmatpush.bf16.msra.mxu0 %v972_v5  ;;  %993 = vmatpush.bf16.msra.mxu1 %v972_v5 }
  0x17   :  { %994 = vmatpush.bf16.msra.mxu2 %v972_v5  ;;  %995 = vmatpush.bf16.msra.mxu3 %v972_v5 }
  0x1a   :  { %339 = vmatpush.bf16.msra.mxu0 %v971_v6  ;;  %996 = vmatpush.bf16.msra.mxu1 %v971_v6 }
  0x1b   :  { %997 = vmatpush.bf16.msra.mxu2 %v971_v6  ;;  %998 = vmatpush.bf16.msra.mxu3 %v971_v6 }
  0x1e   :  { %340 = vmatpush.bf16.msra.mxu0 %v970_v7  ;;  %999 = vmatpush.bf16.msra.mxu1 %v970_v7 }
  0x1f   :  { %1000 = vmatpush.bf16.msra.mxu2 %v970_v7  ;;  %1001 = vmatpush.bf16.msra.mxu3 %v970_v7 }
  0x21   :  { %341 = vmatmul.bf16.vlgmr.msra.gmra.mxu0 %v938_v8  ;;  %381 = vmatmul.bf16.vlgmr.msra.gmra.mxu1 %v946_v9 }
  0x22   :  { %421 = vmatmul.bf16.vlgmr.msra.gmra.mxu2 %v954_v12  ;;  %461 = vmatmul.bf16.vlgmr.msra.gmra.mxu3 %v962_v19 }
  0x31   :  { %346 = vmatmul.bf16.gmra.mxu0 %v939_v10  ;;  %386 = vmatmul.bf16.gmra.mxu1 %v947_v11 }
  0x32   :  { %426 = vmatmul.bf16.gmra.mxu2 %v955_v15  ;;  %466 = vmatmul.bf16.gmra.mxu3 %v963_v23 }
  0x41   :  { %351 = vmatmul.bf16.gmra.mxu0 %v940_v13  ;;  %391 = vmatmul.bf16.gmra.mxu1 %v948_v14 }
  0x42   :  { %431 = vmatmul.bf16.gmra.mxu2 %v956_v18  ;;  %471 = vmatmul.bf16.gmra.mxu3 %v964_v27 }
  0x51   :  { %356 = vmatmul.bf16.gmra.mxu0 %v941_v16  ;;  %396 = vmatmul.bf16.gmra.mxu1 %v949_v17 }
  0x52   :  { %436 = vmatmul.bf16.gmra.mxu2 %v957_v22  ;;  %476 = vmatmul.bf16.gmra.mxu3 %v965_v31 }
  0x61   :  { %361 = vmatmul.bf16.gmra.mxu0 %v942_v20  ;;  %401 = vmatmul.bf16.gmra.mxu1 %v950_v21 }
  0x62   :  { %441 = vmatmul.bf16.gmra.mxu2 %v958_v26  ;;  %481 = vmatmul.bf16.gmra.mxu3 %v966_v35 }
  0x71   :  { %366 = vmatmul.bf16.gmra.mxu0 %v943_v24  ;;  %406 = vmatmul.bf16.gmra.mxu1 %v951_v25 }
  0x72   :  { %446 = vmatmul.bf16.gmra.mxu2 %v959_v30  ;;  %486 = vmatmul.bf16.gmra.mxu3 %v967_v39 }
  0x81   :  { %371 = vmatmul.bf16.gmra.mxu0 %v944_v28  ;;  %411 = vmatmul.bf16.gmra.mxu1 %v952_v29 }
  0x82   :  { %451 = vmatmul.bf16.gmra.mxu2 %v960_v34  ;;  %491 = vmatmul.bf16.gmra.mxu3 %v968_v51 }
  0x91   :  { %376 = vmatmul.bf16.gmra.mxu0 %v945_v32  ;;  %416 = vmatmul.bf16.gmra.mxu1 %v953_v33 }
  0x92   :  { %456 = vmatmul.bf16.gmra.mxu2 %v961_v38  ;;  %496 = vmatmul.bf16.gmra.mxu3 %v969_v0 }
  0x9e   :  { %v342_v36 = vpop.f32.mrf.mxu0  ;;  %v1130_v37 = vpop.f32.mrf.mxu1 }
  0x9f   :  { %502 = vst [vmem:[%s1630_s2] sm:$0xff] %v342_v36  ;;  %v636_v42 = vmul.f32 %v342_v36, %v342_v36 }
  0xa0   :  { %518 = vst [vmem:[%s1630_s2 + $0x80] sm:$0xff] %v1130_v37 }
  0xa5   :  { %v1171_v56 = vpop.f32.mrf.mxu2  ;;  %v1240_v10 = vpop.f32.mrf.mxu3 }
  0xa6   :  { %v344_v40 = vpop.f32.mrf.mxu0  ;;  %v1145_v41 = vpop.f32.mrf.mxu1  ;;  %534 = vst [vmem:[%s1630_s2 + $0x100] sm:$0xff] %v1171_v56 }
  0xa7   :  { %503 = vst [vmem:[%s1630_s2 + $0x8] sm:$0xff] %v344_v40  ;;  %v566_v43 = vadd.f32 %v344_v40, %v342_v36  ;;  %v637_v44 = vmul.f32 %v344_v40, %v344_v40 }
  0xa8   :  { %519 = vst [vmem:[%s1630_s2 + $0x88] sm:$0xff] %v1145_v41 }
  0xa9   :  { %v700_v45 = vadd.f32 %v637_v44, %v636_v42  ;;  %550 = vst [vmem:[%s1630_s2 + $0x180] sm:$0xff] %v1240_v10 }
  0xad   :  { %v1188_v62 = vpop.f32.mrf.mxu2  ;;  %v1261_v14 = vpop.f32.mrf.mxu3 }
  0xae   :  { %v347_v46 = vpop.f32.mrf.mxu0  ;;  %v1154_v47 = vpop.f32.mrf.mxu1  ;;  %535 = vst [vmem:[%s1630_s2 + $0x108] sm:$0xff] %v1188_v62 }
  0xaf   :  { %504 = vst [vmem:[%s1630_s2 + $0x10] sm:$0xff] %v347_v46  ;;  %v567_v48 = vadd.f32 %v566_v43, %v347_v46  ;;  %v638_v49 = vmul.f32 %v347_v46, %v347_v46 }
  0xb0   :  { %520 = vst [vmem:[%s1630_s2 + $0x90] sm:$0xff] %v1154_v47 }
  0xb1   :  { %v701_v50 = vadd.f32 %v700_v45, %v638_v49  ;;  %551 = vst [vmem:[%s1630_s2 + $0x188] sm:$0xff] %v1261_v14 }
  0xb5   :  { %v1208_v3 = vpop.f32.mrf.mxu2  ;;  %v1282_v18 = vpop.f32.mrf.mxu3 }
  0xb6   :  { %v349_v52 = vpop.f32.mrf.mxu0  ;;  %v1166_v53 = vpop.f32.mrf.mxu1  ;;  %536 = vst [vmem:[%s1630_s2 + $0x110] sm:$0xff] %v1208_v3 }
  0xb7   :  { %505 = vst [vmem:[%s1630_s2 + $0x18] sm:$0xff] %v349_v52  ;;  %v568_v54 = vadd.f32 %v567_v48, %v349_v52  ;;  %v639_v55 = vmul.f32 %v349_v52, %v349_v52 }
  0xb8   :  { %521 = vst [vmem:[%s1630_s2 + $0x98] sm:$0xff] %v1166_v53 }
  0xb9   :  { %v702_v57 = vadd.f32 %v701_v50, %v639_v55  ;;  %552 = vst [vmem:[%s1630_s2 + $0x190] sm:$0xff] %v1282_v18 }
  0xbd   :  { %v1223_v6 = vpop.f32.mrf.mxu2  ;;  %v1303_v22 = vpop.f32.mrf.mxu3 }
  0xbe   :  { %v352_v58 = vpop.f32.mrf.mxu0  ;;  %v1181_v59 = vpop.f32.mrf.mxu1  ;;  %537 = vst [vmem:[%s1630_s2 + $0x118] sm:$0xff] %v1223_v6 }
  0xbf   :  { %506 = vst [vmem:[%s1630_s2 + $0x20] sm:$0xff] %v352_v58  ;;  %v1186_v60 = vadd.f32 %v568_v54, %v352_v58  ;;  %v640_v61 = vmul.f32 %v352_v58, %v352_v58 }
  0xc0   :  { %522 = vst [vmem:[%s1630_s2 + $0xa0] sm:$0xff] %v1181_v59 }
  0xc1   :  { %v1194_v63 = vadd.f32 %v702_v57, %v640_v61  ;;  %553 = vst [vmem:[%s1630_s2 + $0x198] sm:$0xff] %v1303_v22 }
  0xc5   :  { %v1238_v9 = vpop.f32.mrf.mxu2  ;;  %v1324_v26 = vpop.f32.mrf.mxu3 }
  0xc6   :  { %v354_v1 = vpop.f32.mrf.mxu0  ;;  %v1203_v2 = vpop.f32.mrf.mxu1  ;;  %538 = vst [vmem:[%s1630_s2 + $0x120] sm:$0xff] %v1238_v9 }
  0xc7   :  { %507 = vst [vmem:[%s1630_s2 + $0x28] sm:$0xff] %v354_v1  ;;  %v641_v31 = vmul.f32 %v354_v1, %v354_v1  ;;  %v570_v32 = vadd.f32 %v1186_v60, %v354_v1 }
  0xc8   :  { %523 = vst [vmem:[%s1630_s2 + $0xa8] sm:$0xff] %v1203_v2 }
  0xc9   :  { %554 = vst [vmem:[%s1630_s2 + $0x1a0] sm:$0xff] %v1324_v26  ;;  %v704_v34 = vadd.f32 %v1194_v63, %v641_v31 }
  0xcd   :  { %v1259_v13 = vpop.f32.mrf.mxu2  ;;  %v1345_v30 = vpop.f32.mrf.mxu3 }
  0xce   :  { %v357_v4 = vpop.f32.mrf.mxu0  ;;  %v1218_v5 = vpop.f32.mrf.mxu1  ;;  %539 = vst [vmem:[%s1630_s2 + $0x128] sm:$0xff] %v1259_v13 }
  0xcf   :  { %508 = vst [vmem:[%s1630_s2 + $0x30] sm:$0xff] %v357_v4  ;;  %v642_v33 = vmul.f32 %v357_v4, %v357_v4  ;;  %v571_v35 = vadd.f32 %v570_v32, %v357_v4 }
  0xd0   :  { %524 = vst [vmem:[%s1630_s2 + $0xb0] sm:$0xff] %v1218_v5 }
  0xd1   :  { %555 = vst [vmem:[%s1630_s2 + $0x1a8] sm:$0xff] %v1345_v30  ;;  %v705_v40 = vadd.f32 %v704_v34, %v642_v33 }
  0xd5   :  { %v1280_v17 = vpop.f32.mrf.mxu2  ;;  %v1368_v45 = vpop.f32.mrf.mxu3 }
  0xd6   :  { %v359_v7 = vpop.f32.mrf.mxu0  ;;  %v1233_v8 = vpop.f32.mrf.mxu1  ;;  %540 = vst [vmem:[%s1630_s2 + $0x130] sm:$0xff] %v1280_v17 }
  0xd7   :  { %509 = vst [vmem:[%s1630_s2 + $0x38] sm:$0xff] %v359_v7  ;;  %v643_v36 = vmul.f32 %v359_v7, %v359_v7  ;;  %v572_v42 = vadd.f32 %v571_v35, %v359_v7 }
  0xd8   :  { %525 = vst [vmem:[%s1630_s2 + $0xb8] sm:$0xff] %v1233_v8 }
  0xd9   :  { %v706_v46 = vadd.f32 %v705_v40, %v643_v36  ;;  %556 = vst [vmem:[%s1630_s2 + $0x1b0] sm:$0xff] %v1368_v45 }
  0xdd   :  { %v1301_v21 = vpop.f32.mrf.mxu2  ;;  %v1389_v4 = vpop.f32.mrf.mxu3 }
  0xde   :  { %v362_v11 = vpop.f32.mrf.mxu0  ;;  %v1254_v12 = vpop.f32.mrf.mxu1  ;;  %541 = vst [vmem:[%s1630_s2 + $0x138] sm:$0xff] %v1301_v21 }
  0xdf   :  { %510 = vst [vmem:[%s1630_s2 + $0x40] sm:$0xff] %v362_v11  ;;  %v644_v43 = vmul.f32 %v362_v11, %v362_v11  ;;  %v573_v48 = vadd.f32 %v572_v42, %v362_v11 }
  0xe0   :  { %526 = vst [vmem:[%s1630_s2 + $0xc0] sm:$0xff] %v1254_v12 }
  0xe1   :  { %v707_v50 = vadd.f32 %v706_v46, %v644_v43  ;;  %557 = vst [vmem:[%s1630_s2 + $0x1b8] sm:$0xff] %v1389_v4 }
  0xe5   :  { %v1322_v25 = vpop.f32.mrf.mxu2  ;;  %v1410_v43 = vpop.f32.mrf.mxu3 }
  0xe6   :  { %v364_v15 = vpop.f32.mrf.mxu0  ;;  %v1275_v16 = vpop.f32.mrf.mxu1  ;;  %542 = vst [vmem:[%s1630_s2 + $0x140] sm:$0xff] %v1322_v25 }
  0xe7   :  { %511 = vst [vmem:[%s1630_s2 + $0x48] sm:$0xff] %v364_v15  ;;  %v645_v49 = vmul.f32 %v364_v15, %v364_v15  ;;  %v574_v51 = vadd.f32 %v573_v48, %v364_v15 }
  0xe8   :  { %527 = vst [vmem:[%s1630_s2 + $0xc8] sm:$0xff] %v1275_v16 }
  0xe9   :  { %v708_v54 = vadd.f32 %v707_v50, %v645_v49  ;;  %558 = vst [vmem:[%s1630_s2 + $0x1c0] sm:$0xff] %v1410_v43  ;;  %v653_v49 = vmul.f32 %v1145_v41, %v1145_v41 }
  0xed   :  { %v1343_v29 = vpop.f32.mrf.mxu2 }
  0xee   :  { %v367_v19 = vpop.f32.mrf.mxu0  ;;  %v1296_v20 = vpop.f32.mrf.mxu1  ;;  %543 = vst [vmem:[%s1630_s2 + $0x148] sm:$0xff] %v1343_v29 }
  0xef   :  { %512 = vst [vmem:[%s1630_s2 + $0x50] sm:$0xff] %v367_v19  ;;  %v646_v52 = vmul.f32 %v367_v19, %v367_v19  ;;  %v575_v55 = vadd.f32 %v574_v51, %v367_v19 }
  0xf0   :  { %528 = vst [vmem:[%s1630_s2 + $0xd0] sm:$0xff] %v1296_v20 }
  0xf1   :  { %v709_v61 = vadd.f32 %v708_v54, %v646_v52 }
  0xf5   :  { %v1366_v44 = vpop.f32.mrf.mxu2 }
  0xf6   :  { %v369_v23 = vpop.f32.mrf.mxu0  ;;  %v1317_v24 = vpop.f32.mrf.mxu1  ;;  %544 = vst [vmem:[%s1630_s2 + $0x150] sm:$0xff] %v1366_v44 }
  0xf7   :  { %513 = vst [vmem:[%s1630_s2 + $0x58] sm:$0xff] %v369_v23  ;;  %v647_v57 = vmul.f32 %v369_v23, %v369_v23  ;;  %v576_v63 = vadd.f32 %v575_v55, %v369_v23  ;;  %v655_v55 = vmul.f32 %v1166_v53, %v1166_v53 }
  0xf8   :  { %529 = vst [vmem:[%s1630_s2 + $0xd8] sm:$0xff] %v1317_v24 }
  0xf9   :  { %v710_v7 = vadd.f32 %v709_v61, %v647_v57 }
  0xfd   :  { %v1387_v1 = vpop.f32.mrf.mxu2 }
  0xfe   :  { %v372_v27 = vpop.f32.mrf.mxu0  ;;  %v1338_v28 = vpop.f32.mrf.mxu1  ;;  %545 = vst [vmem:[%s1630_s2 + $0x158] sm:$0xff] %v1387_v1 }
  0xff   :  { %514 = vst [vmem:[%s1630_s2 + $0x60] sm:$0xff] %v372_v27  ;;  %v648_v0 = vmul.f32 %v372_v27, %v372_v27  ;;  %v577_v11 = vadd.f32 %v576_v63, %v372_v27  ;;  %v1438_v63 = vpop.f32.mrf.mxu3 }
 0x100   :  { %530 = vst [vmem:[%s1630_s2 + $0xe0] sm:$0xff] %v1338_v28 }
 0x101   :  { %v711_v19 = vadd.f32 %v710_v7, %v648_v0  ;;  %559 = vst [vmem:[%s1630_s2 + $0x1c8] sm:$0xff] %v1438_v63 }
 0x105   :  { %v1408_v42 = vpop.f32.mrf.mxu2 }
 0x106   :  { %v374_v38 = vpop.f32.mrf.mxu0  ;;  %v1361_v39 = vpop.f32.mrf.mxu1  ;;  %546 = vst [vmem:[%s1630_s2 + $0x160] sm:$0xff] %v1408_v42 }
 0x107   :  { %515 = vst [vmem:[%s1630_s2 + $0x68] sm:$0xff] %v374_v38  ;;  %v649_v15 = vmul.f32 %v374_v38, %v374_v38  ;;  %v578_v23 = vadd.f32 %v577_v11, %v374_v38  ;;  %v652_v38 = vmul.f32 %v1130_v37, %v1130_v37 }
 0x108   :  { %531 = vst [vmem:[%s1630_s2 + $0xe8] sm:$0xff] %v1361_v39 }
 0x109   :  { %v712_v32 = vadd.f32 %v711_v19, %v649_v15  ;;  %v658_v15 = vmul.f32 %v1218_v5, %v1218_v5 }
 0x10d   :  { %v1436_v61 = vpop.f32.mrf.mxu2 }
 0x10e   :  { %v377_v58 = vpop.f32.mrf.mxu0  ;;  %v1382_v60 = vpop.f32.mrf.mxu1  ;;  %547 = vst [vmem:[%s1630_s2 + $0x168] sm:$0xff] %v1436_v61 }
 0x10f   :  { %516 = vst [vmem:[%s1630_s2 + $0x70] sm:$0xff] %v377_v58  ;;  %v650_v31 = vmul.f32 %v377_v58, %v377_v58  ;;  %v579_v33 = vadd.f32 %v578_v23, %v377_v58 }
 0x110   :  { %532 = vst [vmem:[%s1630_s2 + $0xf0] sm:$0xff] %v1382_v60 }
 0x111   :  { %v713_v27 = vadd.f32 %v712_v32, %v650_v31 }
 0x116   :  { %v379_v34 = vpop.f32.mrf.mxu0  ;;  %v1403_v35 = vpop.f32.mrf.mxu1 }
 0x117   :  { %517 = vst [vmem:[%s1630_s2 + $0x78] sm:$0xff] %v379_v34  ;;  %v580_v36 = vadd.f32 %v579_v33, %v379_v34  ;;  %v651_v40 = vmul.f32 %v379_v34, %v379_v34  ;;  %v1460_v33 = vpop.f32.mrf.mxu2  ;;  %v1462_v34 = vpop.f32.mrf.mxu3 }
 0x118   :  { %533 = vst [vmem:[%s1630_s2 + $0xf8] sm:$0xff] %v1403_v35 }
 0x119   :  { %v581_v46 = vadd.f32 %v580_v36, %v1130_v37  ;;  %v714_v48 = vadd.f32 %v713_v27, %v651_v40  ;;  %v654_v37 = vmul.f32 %v1154_v47, %v1154_v47  ;;  %548 = vst [vmem:[%s1630_s2 + $0x170] sm:$0xff] %v1460_v33 }
 0x11a   :  { %560 = vst [vmem:[%s1630_s2 + $0x1d0] sm:$0xff] %v1462_v34 }
 0x11b   :  { %v582_v50 = vadd.f32 %v581_v46, %v1145_v41  ;;  %v715_v51 = vadd.f32 %v714_v48, %v652_v38  ;;  %v656_v41 = vmul.f32 %v1181_v59, %v1181_v59  ;;  %v662_v38 = vmul.f32 %v1296_v20, %v1296_v20 }
 0x11d   :  { %v583_v52 = vadd.f32 %v582_v50, %v1154_v47  ;;  %v716_v54 = vadd.f32 %v715_v51, %v653_v49 }
 0x11f   :  { %v584_v57 = vadd.f32 %v583_v52, %v1166_v53  ;;  %v717_v58 = vadd.f32 %v716_v54, %v654_v37  ;;  %v657_v53 = vmul.f32 %v1203_v2, %v1203_v2  ;;  %v1484_v51 = vpop.f32.mrf.mxu2  ;;  %v1486_v37 = vpop.f32.mrf.mxu3 }
 0x120   :  { %549 = vst [vmem:[%s1630_s2 + $0x178] sm:$0xff] %v1484_v51 }
 0x121   :  { %v585_v47 = vadd.f32 %v584_v57, %v1181_v59  ;;  %v718_v0 = vadd.f32 %v717_v58, %v655_v55  ;;  %v659_v59 = vmul.f32 %v1233_v8, %v1233_v8  ;;  %561 = vst [vmem:[%s1630_s2 + $0x1d8] sm:$0xff] %v1486_v37  ;;  %v665_v55 = vmul.f32 %v1361_v39, %v1361_v39 }
 0x123   :  { %v586_v7 = vadd.f32 %v585_v47, %v1203_v2  ;;  %v719_v11 = vadd.f32 %v718_v0, %v656_v41  ;;  %v660_v2 = vmul.f32 %v1254_v12, %v1254_v12  ;;  %v666_v41 = vmul.f32 %v1382_v60, %v1382_v60 }
 0x124   :  { %v667_v0 = vmul.f32 %v1403_v35, %v1403_v35 }
 0x125   :  { %v720_v19 = vadd.f32 %v719_v11, %v657_v53  ;;  %v587_v23 = vadd.f32 %v586_v7, %v1218_v5 }
 0x127   :  { %v588_v31 = vadd.f32 %v587_v23, %v1233_v8  ;;  %v721_v32 = vadd.f32 %v720_v19, %v658_v15  ;;  %v661_v8 = vmul.f32 %v1275_v16, %v1275_v16  ;;  %v1508_v53 = vpop.f32.mrf.mxu3 }
 0x128   :  { %562 = vst [vmem:[%s1630_s2 + $0x1e0] sm:$0xff] %v1508_v53 }
 0x129   :  { %v589_v5 = vadd.f32 %v588_v31, %v1254_v12  ;;  %v722_v27 = vadd.f32 %v721_v32, %v659_v59  ;;  %v663_v12 = vmul.f32 %v1317_v24, %v1317_v24  ;;  %v671_v31 = vmul.f32 %v1223_v6, %v1223_v6 }
 0x12b   :  { %v590_v36 = vadd.f32 %v589_v5, %v1275_v16  ;;  %v723_v40 = vadd.f32 %v722_v27, %v660_v2  ;;  %v673_v27 = vmul.f32 %v1259_v13, %v1259_v13 }
 0x12d   :  { %v591_v46 = vadd.f32 %v590_v36, %v1296_v20  ;;  %v724_v48 = vadd.f32 %v723_v40, %v661_v8  ;;  %v664_v20 = vmul.f32 %v1338_v28, %v1338_v28  ;;  %v674_v36 = vmul.f32 %v1280_v17, %v1280_v17 }
 0x12f   :  { %v592_v49 = vadd.f32 %v591_v46, %v1317_v24  ;;  %v725_v50 = vadd.f32 %v724_v48, %v662_v38  ;;  %v675_v46 = vmul.f32 %v1301_v21, %v1301_v21 }
 0x131   :  { %v593_v16 = vadd.f32 %v592_v49, %v1338_v28  ;;  %v726_v52 = vadd.f32 %v725_v50, %v663_v12 }
 0x133   :  { %v727_v24 = vadd.f32 %v726_v52, %v664_v20  ;;  %v594_v54 = vadd.f32 %v593_v16, %v1361_v39  ;;  %v668_v39 = vmul.f32 %v1171_v56, %v1171_v56  ;;  %v678_v20 = vmul.f32 %v1366_v44, %v1366_v44 }
 0x135   :  { %v728_v57 = vadd.f32 %v727_v24, %v665_v55  ;;  %v595_v58 = vadd.f32 %v594_v54, %v1382_v60  ;;  %v669_v60 = vmul.f32 %v1188_v62, %v1188_v62  ;;  %v679_v55 = vmul.f32 %v1387_v1, %v1387_v1 }
 0x137   :  { %v729_v47 = vadd.f32 %v728_v57, %v666_v41  ;;  %v596_v28 = vadd.f32 %v595_v58, %v1403_v35  ;;  %v670_v35 = vmul.f32 %v1208_v3, %v1208_v3  ;;  %v680_v41 = vmul.f32 %v1408_v42, %v1408_v42 }
 0x139   :  { %v597_v7 = vadd.f32 %v596_v28, %v1171_v56  ;;  %v730_v11 = vadd.f32 %v729_v47, %v667_v0  ;;  %v1526_v56 = vpop.f32.mrf.mxu3  ;;  %v681_v28 = vmul.f32 %v1436_v61, %v1436_v61 }
 0x13a   :  { %563 = vst [vmem:[%s1630_s2 + $0x1e8] sm:$0xff] %v1526_v56 }
 0x13b   :  { %v598_v15 = vadd.f32 %v597_v7, %v1188_v62  ;;  %v731_v19 = vadd.f32 %v730_v11, %v668_v39  ;;  %v672_v62 = vmul.f32 %v1238_v9, %v1238_v9  ;;  %v682_v39 = vmul.f32 %v1460_v33, %v1460_v33 }
 0x13d   :  { %v599_v23 = vadd.f32 %v598_v15, %v1208_v3  ;;  %v732_v59 = vadd.f32 %v731_v19, %v669_v60  ;;  %v683_v60 = vmul.f32 %v1484_v51, %v1484_v51 }
 0x13f   :  { %v600_v32 = vadd.f32 %v599_v23, %v1223_v6  ;;  %v733_v2 = vadd.f32 %v732_v59, %v670_v35 }
 0x141   :  { %v601_v5 = vadd.f32 %v600_v32, %v1238_v9  ;;  %v734_v3 = vadd.f32 %v733_v2, %v671_v31  ;;  %v1544_v9 = vpop.f32.mrf.mxu3 }
 0x142   :  { %564 = vst [vmem:[%s1630_s2 + $0x1f0] sm:$0xff] %v1544_v9 }
 0x143   :  { %v602_v8 = vadd.f32 %v601_v5, %v1259_v13  ;;  %v735_v6 = vadd.f32 %v734_v3, %v672_v62  ;;  %v676_v13 = vmul.f32 %v1322_v25, %v1322_v25 }
 0x145   :  { %v736_v40 = vadd.f32 %v735_v6, %v673_v27  ;;  %v603_v38 = vadd.f32 %v602_v8, %v1280_v17  ;;  %v677_v17 = vmul.f32 %v1343_v29, %v1343_v29 }
 0x147   :  { %v604_v48 = vadd.f32 %v603_v38, %v1301_v21  ;;  %v737_v12 = vadd.f32 %v736_v40, %v674_v36 }
 0x149   :  { %v605_v49 = vadd.f32 %v604_v48, %v1322_v25  ;;  %v738_v50 = vadd.f32 %v737_v12, %v675_v46  ;;  %v499_v25 = vpop.f32.mrf.mxu3 }
 0x14a   :  { %565 = vst [vmem:[%s1630_s2 + $0x1f8] sm:$0xff] %v499_v25 }
 0x14b   :  { %v606_v16 = vadd.f32 %v605_v49, %v1343_v29  ;;  %v739_v21 = vadd.f32 %v738_v50, %v676_v13  ;;  %v695_v50 = vmul.f32 %v1486_v37, %v1486_v37 }
 0x14d   :  { %v607_v52 = vadd.f32 %v606_v16, %v1366_v44  ;;  %v740_v24 = vadd.f32 %v739_v21, %v677_v17  ;;  %v696_v21 = vmul.f32 %v1508_v53, %v1508_v53 }
 0x14f   :  { %v608_v54 = vadd.f32 %v607_v52, %v1387_v1  ;;  %v741_v57 = vadd.f32 %v740_v24, %v678_v20  ;;  %v697_v52 = vmul.f32 %v1526_v56, %v1526_v56 }
 0x151   :  { %v742_v58 = vadd.f32 %v741_v57, %v679_v55  ;;  %v609_v29 = vadd.f32 %v608_v54, %v1408_v42  ;;  %v684_v42 = vmul.f32 %v1240_v10, %v1240_v10  ;;  %v698_v54 = vmul.f32 %v1544_v9, %v1544_v9 }
 0x152   :  { %v699_v57 = vmul.f32 %v499_v25, %v499_v25 }
 0x153   :  { %v743_v47 = vadd.f32 %v742_v58, %v680_v41  ;;  %v610_v44 = vadd.f32 %v609_v29, %v1436_v61  ;;  %v685_v61 = vmul.f32 %v1261_v14, %v1261_v14 }
 0x155   :  { %v744_v0 = vadd.f32 %v743_v47, %v681_v28  ;;  %v611_v1 = vadd.f32 %v610_v44, %v1460_v33  ;;  %v686_v33 = vmul.f32 %v1282_v18, %v1282_v18 }
 0x157   :  { %v745_v7 = vadd.f32 %v744_v0, %v682_v39  ;;  %v612_v11 = vadd.f32 %v611_v1, %v1484_v51  ;;  %v687_v51 = vmul.f32 %v1303_v22, %v1303_v22 }
 0x159   :  { %v613_v15 = vadd.f32 %v612_v11, %v1240_v10  ;;  %v746_v19 = vadd.f32 %v745_v7, %v683_v60  ;;  %v688_v10 = vmul.f32 %v1324_v26, %v1324_v26 }
 0x15b   :  { %v614_v35 = vadd.f32 %v613_v15, %v1261_v14  ;;  %v747_v23 = vadd.f32 %v746_v19, %v684_v42  ;;  %v689_v14 = vmul.f32 %v1345_v30, %v1345_v30 }
 0x15d   :  { %v615_v59 = vadd.f32 %v614_v35, %v1282_v18  ;;  %v748_v31 = vadd.f32 %v747_v23, %v685_v61  ;;  %v690_v18 = vmul.f32 %v1368_v45, %v1368_v45 }
 0x15f   :  { %v616_v32 = vadd.f32 %v615_v59, %v1303_v22  ;;  %v749_v2 = vadd.f32 %v748_v31, %v686_v33  ;;  %v691_v22 = vmul.f32 %v1389_v4, %v1389_v4 }
 0x161   :  { %v617_v62 = vadd.f32 %v616_v32, %v1324_v26  ;;  %v750_v5 = vadd.f32 %v749_v2, %v687_v51  ;;  %v692_v26 = vmul.f32 %v1410_v43, %v1410_v43 }
 0x163   :  { %v618_v3 = vadd.f32 %v617_v62, %v1345_v30  ;;  %v751_v27 = vadd.f32 %v750_v5, %v688_v10  ;;  %v693_v30 = vmul.f32 %v1438_v63, %v1438_v63 }
 0x165   :  { %v752_v8 = vadd.f32 %v751_v27, %v689_v14  ;;  %v619_v6 = vadd.f32 %v618_v3, %v1368_v45  ;;  %v694_v45 = vmul.f32 %v1462_v34, %v1462_v34 }
 0x167   :  { %v620_v36 = vadd.f32 %v619_v6, %v1389_v4  ;;  %v753_v40 = vadd.f32 %v752_v8, %v690_v18 }
 0x169   :  { %v621_v38 = vadd.f32 %v620_v36, %v1410_v43  ;;  %v754_v46 = vadd.f32 %v753_v40, %v691_v22 }
 0x16b   :  { %v622_v48 = vadd.f32 %v621_v38, %v1438_v63  ;;  %v755_v12 = vadd.f32 %v754_v46, %v692_v26 }
 0x16d   :  { %v623_v13 = vadd.f32 %v622_v48, %v1462_v34  ;;  %v756_v49 = vadd.f32 %v755_v12, %v693_v30 }
 0x16f   :  { %v624_v4 = vadd.f32 %v623_v13, %v1486_v37  ;;  %v757_v17 = vadd.f32 %v756_v49, %v694_v45 }
 0x171   :  { %v758_v43 = vadd.f32 %v757_v17, %v695_v50  ;;  %v625_v16 = vadd.f32 %v624_v4, %v1508_v53 }
 0x173   :  { %v759_v63 = vadd.f32 %v758_v43, %v696_v21  ;;  %v626_v20 = vadd.f32 %v625_v16, %v1526_v56 }
 0x175   :  { %v760_v34 = vadd.f32 %v759_v63, %v697_v52  ;;  %v627_v24 = vadd.f32 %v626_v20, %v1544_v9 }
 0x177   :  { %v761_v37 = vadd.f32 %v760_v34, %v698_v54  ;;  %v628_v55 = vadd.f32 %v627_v24, %v499_v25 }
 0x179   :  { %v629_v58 = vrot.slane %v628_v55, 4  ;;  %v762_v29 = vadd.f32 %v761_v37, %v699_v57 }
 0x17b   :  { %v630_v41 = vadd.f32 %v629_v58, %v628_v55  ;;  %v763_v47 = vrot.slane %v762_v29, 4 }
 0x17d   :  { %v631_v53 = vrot.slane %v630_v41, 2  ;;  %v764_v44 = vadd.f32 %v763_v47, %v762_v29 }
 0x17f   :  { %v632_v28 = vadd.f32 %v631_v53, %v630_v41  ;;  %v765_v0 = vrot.slane %v764_v44, 2 }
 0x181   :  { %v633_v1 = vrot.slane %v632_v28, 1  ;;  %v766_v39 = vadd.f32 %v765_v0, %v764_v44 }
 0x183   :  { %v634_v56 = vadd.f32 %v633_v1, %v632_v28  ;;  %v767_v7 = vrot.slane %v766_v39, 1 }
 0x185   :  { %635 = vst [vmem:[%s1631_s3] sm:$0x1] %v634_v56  ;;  %v768_v9 = vadd.f32 %v767_v7, %v766_v39 }
 0x187   :  { %769 = vst [vmem:[%s1631_s3 + $0x1] sm:$0x1] %v768_v9 }

// kernel: discriminator_forward.10
= control target key start
LH: loop header
LB: loop body
LE: loop exit
PB: predicated region body
PF: predicated region fallthrough
CT: control target
= control target key end

     0   :  { %s1178_s0 = inlined_call_operand.vmem [shape: f32[512,128], index: 0, kind: input, shape index: {}]   ;;  %s1179_s1 = inlined_call_operand.vmem [shape: f32[1,128], index: 1, kind: input, shape index: {}]   ;;  %s1180_s2 = inlined_call_operand.vmem [shape: f32[1,128], index: 2, kind: input, shape index: {}]   ;;  %s1181_s3 = inlined_call_operand.vmem [shape: bf16[512,128], index: 3, kind: output, shape index: {}]  }
   0x1   :  { %v14_v0 = vld [vmem:[%s1178_s0] sm:$0xff]  ;;  %v15_v1 = vld [vmem:[%s1178_s0 + $0x8] sm:$0xff]  ;;  %v16_v4 = vld [vmem:[%s1178_s0 + $0x10] sm:$0xff] }
   0x2   :  { %v760_v2 = vld [vmem:[%s1179_s1] ss:$0 sm:$0xff]  ;;  %v17_v5 = vld [vmem:[%s1178_s0 + $0x18] sm:$0xff]  ;;  %v19_v11 = vld [vmem:[%s1178_s0 + $0x28] sm:$0xff] }
   0x3   :  { %v765_v3 = vld [vmem:[%s1180_s2] ss:$0 sm:$0xff]  ;;  %v82_v7 = vmul.f32 %v760_v2, %v14_v0  ;;  %v83_v8 = vmul.f32 %v760_v2, %v15_v1  ;;  %v84_v9 = vmul.f32 %v760_v2, %v16_v4  ;;  %v85_v10 = vmul.f32 %v760_v2, %v17_v5  ;;  %v20_v12 = vld [vmem:[%s1178_s0 + $0x30] sm:$0xff]  ;;  %v21_v13 = vld [vmem:[%s1178_s0 + $0x38] sm:$0xff] }
   0x4   :  { %v18_v6 = vld [vmem:[%s1178_s0 + $0x20] sm:$0xff]  ;;  %v87_v15 = vmul.f32 %v760_v2, %v19_v11  ;;  %v88_v16 = vmul.f32 %v760_v2, %v20_v12  ;;  %v89_v17 = vmul.f32 %v760_v2, %v21_v13  ;;  %v23_v37 = vld [vmem:[%s1178_s0 + $0x48] sm:$0xff]  ;;  %v24_v38 = vld [vmem:[%s1178_s0 + $0x50] sm:$0xff] }
   0x5   :  { %v86_v14 = vmul.f32 %v760_v2, %v18_v6  ;;  %v150_v18 = vadd.f32 %v765_v3, %v82_v7  ;;  %v151_v19 = vadd.f32 %v765_v3, %v83_v8  ;;  %v152_v20 = vadd.f32 %v765_v3, %v84_v9  ;;  %v22_v32 = vld [vmem:[%s1178_s0 + $0x40] sm:$0xff]  ;;  %v25_v39 = vld [vmem:[%s1178_s0 + $0x58] sm:$0xff]  ;;  %v27_v51 = vld [vmem:[%s1178_s0 + $0x68] sm:$0xff] }
   0x6   :  { %v153_v21 = vadd.f32 %v765_v3, %v85_v10  ;;  %v155_v23 = vadd.f32 %v765_v3, %v87_v15  ;;  %v156_v24 = vadd.f32 %v765_v3, %v88_v16  ;;  %v157_v25 = vadd.f32 %v765_v3, %v89_v17  ;;  %v26_v50 = vld [vmem:[%s1178_s0 + $0x60] sm:$0xff]  ;;  %v28_v63 = vld [vmem:[%s1178_s0 + $0x70] sm:$0xff]  ;;  %v29_v0 = vld [vmem:[%s1178_s0 + $0x78] sm:$0xff] }
   0x7   :  { %v154_v22 = vadd.f32 %v765_v3, %v86_v14  ;;  %vm214_vm0 = vcmp.gt.f32.partialorder %v150_v18, 0.0  ;;  %vm215_vm1 = vcmp.gt.f32.partialorder %v151_v19, 0.0  ;;  %v278_v26 = vmul.f32 0.2, %v150_v18  ;;  %v30_v12 = vld [vmem:[%s1178_s0 + $0x80] sm:$0xff]  ;;  %v31_v13 = vld [vmem:[%s1178_s0 + $0x88] sm:$0xff] }
   0x8   :  { %v279_v27 = vmul.f32 0.2, %v151_v19  ;;  %vm216_vm2 = vcmp.gt.f32.partialorder %v152_v20, 0.0  ;;  %vm217_vm3 = vcmp.gt.f32.partialorder %v153_v21, 0.0  ;;  %v280_v28 = vmul.f32 0.2, %v152_v20 }
   0x9   :  { %v281_v29 = vmul.f32 0.2, %v153_v21  ;;  %v342_v30 = vsel %vm214_vm0, %v150_v18, %v278_v26  ;;  %vm218_vm4 = vcmp.gt.f32.partialorder %v154_v22, 0.0  ;;  %vm219_vm5 = vcmp.gt.f32.partialorder %v155_v23, 0.0  ;;  %v32_v17 = vld [vmem:[%s1178_s0 + $0x90] sm:$0xff]  ;;  %v33_v18 = vld [vmem:[%s1178_s0 + $0x98] sm:$0xff] }
   0xa   :  { %v343_v31 = vsel %vm215_vm1, %v151_v19, %v279_v27  ;;  %v344_v34 = vsel %vm216_vm2, %v152_v20, %v280_v28  ;;  %v282_v36 = vmul.f32 0.2, %v154_v22  ;;  %v283_v41 = vmul.f32 0.2, %v155_v23 }
   0xb   :  { %v541_v33 = vpack.c.bf16 %v343_v31, %v342_v30  ;;  %v345_v35 = vsel %vm217_vm3, %v153_v21, %v281_v29  ;;  %vm220_vm6 = vcmp.gt.f32.partialorder %v156_v24, 0.0  ;;  %vm221_vm7 = vcmp.gt.f32.partialorder %v157_v25, 0.0  ;;  %v34_v30 = vld [vmem:[%s1178_s0 + $0xa0] sm:$0xff]  ;;  %v35_v31 = vld [vmem:[%s1178_s0 + $0xa8] sm:$0xff] }
   0xc   :  { %v546_v40 = vpack.c.bf16 %v345_v35, %v344_v34  ;;  %v346_v42 = vsel %vm218_vm4, %v154_v22, %v282_v36  ;;  %v284_v43 = vmul.f32 0.2, %v156_v24  ;;  %v285_v44 = vmul.f32 0.2, %v157_v25 }
   0xd   :  { %542 = vst [vmem:[%s1181_s3] sm:$0xff] %v541_v33   ;;  %v90_v45 = vmul.f32 %v760_v2, %v22_v32  ;;  %v347_v46 = vsel %vm219_vm5, %v155_v23, %v283_v41  ;;  %v91_v47 = vmul.f32 %v760_v2, %v23_v37  ;;  %v92_v48 = vmul.f32 %v760_v2, %v24_v38 }
   0xe   :  { %698 = vst [vmem:[%s1181_s3 + $0x8] sm:$0xff] %v546_v40   ;;  %v93_v49 = vmul.f32 %v760_v2, %v25_v39  ;;  %v551_v52 = vpack.c.bf16 %v347_v46, %v346_v42  ;;  %v348_v53 = vsel %vm220_vm6, %v156_v24, %v284_v43  ;;  %v349_v54 = vsel %vm221_vm7, %v157_v25, %v285_v44  ;;  %v36_v44 = vld [vmem:[%s1178_s0 + $0xb0] sm:$0xff] }
   0xf   :  { %v158_v55 = vadd.f32 %v765_v3, %v90_v45  ;;  %v556_v56 = vpack.c.bf16 %v349_v54, %v348_v53  ;;  %v159_v57 = vadd.f32 %v765_v3, %v91_v47  ;;  %v160_v58 = vadd.f32 %v765_v3, %v92_v48  ;;  %v37_v45 = vld [vmem:[%s1178_s0 + $0xb8] sm:$0xff] }
  0x10   :  { %v161_v59 = vadd.f32 %v765_v3, %v93_v49  ;;  %699 = vst [vmem:[%s1181_s3 + $0x10] sm:$0xff] %v551_v52   ;;  %v94_v61 = vmul.f32 %v760_v2, %v26_v50  ;;  %v95_v62 = vmul.f32 %v760_v2, %v27_v51  ;;  %v96_v10 = vmul.f32 %v760_v2, %v28_v63 }
  0x11   :  { %vm222_vm8 = vcmp.gt.f32.partialorder %v158_v55, 0.0  ;;  %v286_v60 = vmul.f32 0.2, %v158_v55  ;;  %700 = vst [vmem:[%s1181_s3 + $0x18] sm:$0xff] %v556_v56   ;;  %vm223_vm9 = vcmp.gt.f32.partialorder %v159_v57, 0.0  ;;  %vm224_vm10 = vcmp.gt.f32.partialorder %v160_v58, 0.0 }
  0x12   :  { %v287_v1 = vmul.f32 0.2, %v159_v57  ;;  %vm225_vm11 = vcmp.gt.f32.partialorder %v161_v59, 0.0  ;;  %v288_v5 = vmul.f32 0.2, %v160_v58  ;;  %v162_v7 = vadd.f32 %v765_v3, %v94_v61  ;;  %v38_v56 = vld [vmem:[%s1178_s0 + $0xc0] sm:$0xff] }
  0x13   :  { %v350_v4 = vsel %vm222_vm8, %v158_v55, %v286_v60  ;;  %v289_v6 = vmul.f32 0.2, %v161_v59  ;;  %v163_v9 = vadd.f32 %v765_v3, %v95_v62  ;;  %v97_v11 = vmul.f32 %v760_v2, %v29_v0  ;;  %v40_v61 = vld [vmem:[%s1178_s0 + $0xd0] sm:$0xff]  ;;  %v41_v62 = vld [vmem:[%s1178_s0 + $0xd8] sm:$0xff] }
  0x14   :  { %v351_v8 = vsel %vm223_vm9, %v159_v57, %v287_v1  ;;  %v352_v15 = vsel %vm224_vm10, %v160_v58, %v288_v5  ;;  %vm226_vm12 = vcmp.gt.f32.partialorder %v162_v7, 0.0  ;;  %v290_v20 = vmul.f32 0.2, %v162_v7  ;;  %v39_v57 = vld [vmem:[%s1178_s0 + $0xc8] sm:$0xff] }
  0x15   :  { %v561_v14 = vpack.c.bf16 %v351_v8, %v350_v4  ;;  %v353_v16 = vsel %vm225_vm11, %v161_v59, %v289_v6  ;;  %vm227_vm13 = vcmp.gt.f32.partialorder %v163_v9, 0.0  ;;  %v291_v21 = vmul.f32 0.2, %v163_v9 }
  0x16   :  { %v566_v19 = vpack.c.bf16 %v353_v16, %v352_v15  ;;  %v164_v22 = vadd.f32 %v765_v3, %v96_v10  ;;  %v165_v23 = vadd.f32 %v765_v3, %v97_v11  ;;  %v98_v24 = vmul.f32 %v760_v2, %v30_v12  ;;  %v42_v12 = vld [vmem:[%s1178_s0 + $0xe0] sm:$0xff] }
  0x17   :  { %701 = vst [vmem:[%s1181_s3 + $0x20] sm:$0xff] %v561_v14   ;;  %v99_v25 = vmul.f32 %v760_v2, %v31_v13  ;;  %v354_v26 = vsel %vm226_vm12, %v162_v7, %v290_v20  ;;  %v355_v27 = vsel %vm227_vm13, %v163_v9, %v291_v21  ;;  %v100_v28 = vmul.f32 %v760_v2, %v32_v17  ;;  %v43_v13 = vld [vmem:[%s1178_s0 + $0xe8] sm:$0xff] }
  0x18   :  { %702 = vst [vmem:[%s1181_s3 + $0x28] sm:$0xff] %v566_v19   ;;  %v101_v29 = vmul.f32 %v760_v2, %v33_v18  ;;  %v571_v32 = vpack.c.bf16 %v355_v27, %v354_v26  ;;  %vm228_vm14 = vcmp.gt.f32.partialorder %v164_v22, 0.0  ;;  %vm229_vm15 = vcmp.gt.f32.partialorder %v165_v23, 0.0  ;;  %v44_v26 = vld [vmem:[%s1178_s0 + $0xf0] sm:$0xff]  ;;  %v45_v27 = vld [vmem:[%s1178_s0 + $0xf8] sm:$0xff] }
  0x19   :  { %v292_v33 = vmul.f32 0.2, %v164_v22  ;;  %v293_v34 = vmul.f32 0.2, %v165_v23  ;;  %v166_v35 = vadd.f32 %v765_v3, %v98_v24  ;;  %v167_v36 = vadd.f32 %v765_v3, %v99_v25 }
  0x1a   :  { %v168_v37 = vadd.f32 %v765_v3, %v100_v28  ;;  %703 = vst [vmem:[%s1181_s3 + $0x30] sm:$0xff] %v571_v32   ;;  %v169_v39 = vadd.f32 %v765_v3, %v101_v29  ;;  %v102_v40 = vmul.f32 %v760_v2, %v34_v30  ;;  %v103_v41 = vmul.f32 %v760_v2, %v35_v31 }
  0x1b   :  { %v356_v38 = vsel %vm228_vm14, %v164_v22, %v292_v33  ;;  %v357_v42 = vsel %vm229_vm15, %v165_v23, %v293_v34  ;;  %vm230_vm0 = vcmp.gt.f32.partialorder %v166_v35, 0.0  ;;  %vm231_vm1 = vcmp.gt.f32.partialorder %v167_v36, 0.0 }
  0x1c   :  { %v294_v43 = vmul.f32 0.2, %v166_v35  ;;  %v576_v46 = vpack.c.bf16 %v357_v42, %v356_v38  ;;  %v295_v47 = vmul.f32 0.2, %v167_v36  ;;  %vm232_vm2 = vcmp.gt.f32.partialorder %v168_v37, 0.0  ;;  %v46_v38 = vld [vmem:[%s1178_s0 + $0x100] sm:$0xff] }
  0x1d   :  { %vm233_vm3 = vcmp.gt.f32.partialorder %v169_v39, 0.0  ;;  %v296_v49 = vmul.f32 0.2, %v168_v37  ;;  %v297_v50 = vmul.f32 0.2, %v169_v39  ;;  %v170_v51 = vadd.f32 %v765_v3, %v102_v40 }
  0x1e   :  { %v358_v48 = vsel %vm230_vm0, %v166_v35, %v294_v43  ;;  %704 = vst [vmem:[%s1181_s3 + $0x38] sm:$0xff] %v576_v46   ;;  %v359_v52 = vsel %vm231_vm1, %v167_v36, %v295_v47  ;;  %v171_v53 = vadd.f32 %v765_v3, %v103_v41  ;;  %v104_v54 = vmul.f32 %v760_v2, %v36_v44  ;;  %v48_v43 = vld [vmem:[%s1178_s0 + $0x110] sm:$0xff]  ;;  %v49_v44 = vld [vmem:[%s1178_s0 + $0x118] sm:$0xff] }
  0x1f   :  { %v105_v55 = vmul.f32 %v760_v2, %v37_v45  ;;  %v581_v58 = vpack.c.bf16 %v359_v52, %v358_v48  ;;  %v360_v59 = vsel %vm232_vm2, %v168_v37, %v296_v49  ;;  %v361_v60 = vsel %vm233_vm3, %v169_v39, %v297_v50  ;;  %v47_v39 = vld [vmem:[%s1178_s0 + $0x108] sm:$0xff] }
  0x20   :  { %vm234_vm4 = vcmp.gt.f32.partialorder %v170_v51, 0.0  ;;  %v586_v63 = vpack.c.bf16 %v361_v60, %v360_v59  ;;  %vm235_vm5 = vcmp.gt.f32.partialorder %v171_v53, 0.0  ;;  %v298_v0 = vmul.f32 0.2, %v170_v51 }
  0x21   :  { %v299_v1 = vmul.f32 0.2, %v171_v53  ;;  %705 = vst [vmem:[%s1181_s3 + $0x40] sm:$0xff] %v581_v58   ;;  %v172_v4 = vadd.f32 %v765_v3, %v104_v54  ;;  %v173_v5 = vadd.f32 %v765_v3, %v105_v55  ;;  %v106_v6 = vmul.f32 %v760_v2, %v38_v56  ;;  %v50_v56 = vld [vmem:[%s1178_s0 + $0x120] sm:$0xff] }
  0x22   :  { %v107_v7 = vmul.f32 %v760_v2, %v39_v57  ;;  %706 = vst [vmem:[%s1181_s3 + $0x48] sm:$0xff] %v586_v63   ;;  %v362_v8 = vsel %vm234_vm4, %v170_v51, %v298_v0  ;;  %v108_v10 = vmul.f32 %v760_v2, %v40_v61  ;;  %v109_v11 = vmul.f32 %v760_v2, %v41_v62  ;;  %v51_v57 = vld [vmem:[%s1178_s0 + $0x128] sm:$0xff] }
  0x23   :  { %v363_v9 = vsel %vm235_vm5, %v171_v53, %v299_v1  ;;  %vm236_vm6 = vcmp.gt.f32.partialorder %v172_v4, 0.0  ;;  %vm237_vm7 = vcmp.gt.f32.partialorder %v173_v5, 0.0  ;;  %v300_v15 = vmul.f32 0.2, %v172_v4 }
  0x24   :  { %v591_v14 = vpack.c.bf16 %v363_v9, %v362_v8  ;;  %v301_v16 = vmul.f32 0.2, %v173_v5  ;;  %v174_v17 = vadd.f32 %v765_v3, %v106_v6  ;;  %v175_v18 = vadd.f32 %v765_v3, %v107_v7  ;;  %v52_v8 = vld [vmem:[%s1178_s0 + $0x130] sm:$0xff]  ;;  %v53_v9 = vld [vmem:[%s1178_s0 + $0x138] sm:$0xff] }
  0x25   :  { %v176_v19 = vadd.f32 %v765_v3, %v108_v10  ;;  %v364_v20 = vsel %vm236_vm6, %v172_v4, %v300_v15  ;;  %v177_v21 = vadd.f32 %v765_v3, %v109_v11  ;;  %v110_v22 = vmul.f32 %v760_v2, %v42_v12 }
  0x26   :  { %707 = vst [vmem:[%s1181_s3 + $0x50] sm:$0xff] %v591_v14   ;;  %v111_v23 = vmul.f32 %v760_v2, %v43_v13  ;;  %v365_v24 = vsel %vm237_vm7, %v173_v5, %v301_v16  ;;  %vm238_vm8 = vcmp.gt.f32.partialorder %v174_v17, 0.0  ;;  %vm239_vm9 = vcmp.gt.f32.partialorder %v175_v18, 0.0 }
  0x27   :  { %v302_v25 = vmul.f32 0.2, %v174_v17  ;;  %v596_v28 = vpack.c.bf16 %v365_v24, %v364_v20  ;;  %v303_v29 = vmul.f32 0.2, %v175_v18  ;;  %vm240_vm10 = vcmp.gt.f32.partialorder %v176_v19, 0.0  ;;  %v54_v20 = vld [vmem:[%s1178_s0 + $0x140] sm:$0xff] }
  0x28   :  { %vm241_vm11 = vcmp.gt.f32.partialorder %v177_v21, 0.0  ;;  %v304_v31 = vmul.f32 0.2, %v176_v19  ;;  %v305_v32 = vmul.f32 0.2, %v177_v21  ;;  %v178_v33 = vadd.f32 %v765_v3, %v110_v22 }
  0x29   :  { %v366_v30 = vsel %vm238_vm8, %v174_v17, %v302_v25  ;;  %708 = vst [vmem:[%s1181_s3 + $0x58] sm:$0xff] %v596_v28   ;;  %v367_v34 = vsel %vm239_vm9, %v175_v18, %v303_v29  ;;  %v179_v35 = vadd.f32 %v765_v3, %v111_v23  ;;  %v112_v36 = vmul.f32 %v760_v2, %v44_v26  ;;  %v56_v25 = vld [vmem:[%s1178_s0 + $0x150] sm:$0xff]  ;;  %v57_v26 = vld [vmem:[%s1178_s0 + $0x158] sm:$0xff] }
  0x2a   :  { %v113_v37 = vmul.f32 %v760_v2, %v45_v27  ;;  %v601_v40 = vpack.c.bf16 %v367_v34, %v366_v30  ;;  %v368_v41 = vsel %vm240_vm10, %v176_v19, %v304_v31  ;;  %v369_v42 = vsel %vm241_vm11, %v177_v21, %v305_v32  ;;  %v55_v21 = vld [vmem:[%s1178_s0 + $0x148] sm:$0xff] }
  0x2b   :  { %vm242_vm12 = vcmp.gt.f32.partialorder %v178_v33, 0.0  ;;  %v606_v45 = vpack.c.bf16 %v369_v42, %v368_v41  ;;  %vm243_vm13 = vcmp.gt.f32.partialorder %v179_v35, 0.0  ;;  %v306_v46 = vmul.f32 0.2, %v178_v33 }
  0x2c   :  { %v307_v47 = vmul.f32 0.2, %v179_v35  ;;  %709 = vst [vmem:[%s1181_s3 + $0x60] sm:$0xff] %v601_v40   ;;  %v180_v48 = vadd.f32 %v765_v3, %v112_v36  ;;  %v181_v49 = vadd.f32 %v765_v3, %v113_v37  ;;  %v114_v50 = vmul.f32 %v760_v2, %v46_v38  ;;  %v58_v38 = vld [vmem:[%s1178_s0 + $0x160] sm:$0xff] }
  0x2d   :  { %v115_v51 = vmul.f32 %v760_v2, %v47_v39  ;;  %710 = vst [vmem:[%s1181_s3 + $0x68] sm:$0xff] %v606_v45   ;;  %v370_v52 = vsel %vm242_vm12, %v178_v33, %v306_v46  ;;  %v116_v54 = vmul.f32 %v760_v2, %v48_v43  ;;  %v117_v55 = vmul.f32 %v760_v2, %v49_v44  ;;  %v59_v39 = vld [vmem:[%s1178_s0 + $0x168] sm:$0xff] }
  0x2e   :  { %v371_v53 = vsel %vm243_vm13, %v179_v35, %v307_v47  ;;  %vm244_vm14 = vcmp.gt.f32.partialorder %v180_v48, 0.0  ;;  %vm245_vm15 = vcmp.gt.f32.partialorder %v181_v49, 0.0  ;;  %v308_v59 = vmul.f32 0.2, %v180_v48 }
  0x2f   :  { %v611_v58 = vpack.c.bf16 %v371_v53, %v370_v52  ;;  %v309_v60 = vmul.f32 0.2, %v181_v49  ;;  %v182_v61 = vadd.f32 %v765_v3, %v114_v50  ;;  %v183_v62 = vadd.f32 %v765_v3, %v115_v51  ;;  %v60_v52 = vld [vmem:[%s1178_s0 + $0x170] sm:$0xff]  ;;  %v61_v53 = vld [vmem:[%s1178_s0 + $0x178] sm:$0xff] }
  0x30   :  { %v184_v63 = vadd.f32 %v765_v3, %v116_v54  ;;  %v372_v0 = vsel %vm244_vm14, %v180_v48, %v308_v59  ;;  %v185_v1 = vadd.f32 %v765_v3, %v117_v55  ;;  %v118_v4 = vmul.f32 %v760_v2, %v50_v56 }
  0x31   :  { %711 = vst [vmem:[%s1181_s3 + $0x70] sm:$0xff] %v611_v58   ;;  %v119_v5 = vmul.f32 %v760_v2, %v51_v57  ;;  %v373_v6 = vsel %vm245_vm15, %v181_v49, %v309_v60  ;;  %vm246_vm0 = vcmp.gt.f32.partialorder %v182_v61, 0.0  ;;  %vm247_vm1 = vcmp.gt.f32.partialorder %v183_v62, 0.0 }
  0x32   :  { %v310_v7 = vmul.f32 0.2, %v182_v61  ;;  %v616_v10 = vpack.c.bf16 %v373_v6, %v372_v0  ;;  %v311_v11 = vmul.f32 0.2, %v183_v62  ;;  %vm248_vm2 = vcmp.gt.f32.partialorder %v184_v63, 0.0  ;;  %v62_v0 = vld [vmem:[%s1178_s0 + $0x180] sm:$0xff] }
  0x33   :  { %vm249_vm3 = vcmp.gt.f32.partialorder %v185_v1, 0.0  ;;  %v312_v13 = vmul.f32 0.2, %v184_v63  ;;  %v313_v14 = vmul.f32 0.2, %v185_v1  ;;  %v186_v15 = vadd.f32 %v765_v3, %v118_v4 }
  0x34   :  { %v374_v12 = vsel %vm246_vm0, %v182_v61, %v310_v7  ;;  %712 = vst [vmem:[%s1181_s3 + $0x78] sm:$0xff] %v616_v10   ;;  %v375_v16 = vsel %vm247_vm1, %v183_v62, %v311_v11  ;;  %v187_v17 = vadd.f32 %v765_v3, %v119_v5  ;;  %v120_v18 = vmul.f32 %v760_v2, %v52_v8  ;;  %v64_v7 = vld [vmem:[%s1178_s0 + $0x190] sm:$0xff]  ;;  %v65_v8 = vld [vmem:[%s1178_s0 + $0x198] sm:$0xff] }
  0x35   :  { %v121_v19 = vmul.f32 %v760_v2, %v53_v9  ;;  %v621_v22 = vpack.c.bf16 %v375_v16, %v374_v12  ;;  %v376_v23 = vsel %vm248_vm2, %v184_v63, %v312_v13  ;;  %v377_v24 = vsel %vm249_vm3, %v185_v1, %v313_v14  ;;  %v63_v1 = vld [vmem:[%s1178_s0 + $0x188] sm:$0xff] }
  0x36   :  { %vm250_vm4 = vcmp.gt.f32.partialorder %v186_v15, 0.0  ;;  %v626_v27 = vpack.c.bf16 %v377_v24, %v376_v23  ;;  %vm251_vm5 = vcmp.gt.f32.partialorder %v187_v17, 0.0  ;;  %v314_v28 = vmul.f32 0.2, %v186_v15 }
  0x37   :  { %v315_v29 = vmul.f32 0.2, %v187_v17  ;;  %713 = vst [vmem:[%s1181_s3 + $0x80] sm:$0xff] %v621_v22   ;;  %v188_v30 = vadd.f32 %v765_v3, %v120_v18  ;;  %v189_v31 = vadd.f32 %v765_v3, %v121_v19  ;;  %v122_v32 = vmul.f32 %v760_v2, %v54_v20  ;;  %v66_v20 = vld [vmem:[%s1178_s0 + $0x1a0] sm:$0xff] }
  0x38   :  { %v123_v33 = vmul.f32 %v760_v2, %v55_v21  ;;  %714 = vst [vmem:[%s1181_s3 + $0x88] sm:$0xff] %v626_v27   ;;  %v378_v34 = vsel %vm250_vm4, %v186_v15, %v314_v28  ;;  %v124_v36 = vmul.f32 %v760_v2, %v56_v25  ;;  %v125_v37 = vmul.f32 %v760_v2, %v57_v26  ;;  %v67_v21 = vld [vmem:[%s1178_s0 + $0x1a8] sm:$0xff] }
  0x39   :  { %v379_v35 = vsel %vm251_vm5, %v187_v17, %v315_v29  ;;  %vm252_vm6 = vcmp.gt.f32.partialorder %v188_v30, 0.0  ;;  %vm253_vm7 = vcmp.gt.f32.partialorder %v189_v31, 0.0  ;;  %v316_v41 = vmul.f32 0.2, %v188_v30 }
  0x3a   :  { %v631_v40 = vpack.c.bf16 %v379_v35, %v378_v34  ;;  %v317_v42 = vmul.f32 0.2, %v189_v31  ;;  %v190_v43 = vadd.f32 %v765_v3, %v122_v32  ;;  %v191_v44 = vadd.f32 %v765_v3, %v123_v33  ;;  %v68_v34 = vld [vmem:[%s1178_s0 + $0x1b0] sm:$0xff]  ;;  %v69_v35 = vld [vmem:[%s1178_s0 + $0x1b8] sm:$0xff] }
  0x3b   :  { %v192_v45 = vadd.f32 %v765_v3, %v124_v36  ;;  %v380_v46 = vsel %vm252_vm6, %v188_v30, %v316_v41  ;;  %v193_v47 = vadd.f32 %v765_v3, %v125_v37  ;;  %v126_v48 = vmul.f32 %v760_v2, %v58_v38 }
  0x3c   :  { %715 = vst [vmem:[%s1181_s3 + $0x90] sm:$0xff] %v631_v40   ;;  %v127_v49 = vmul.f32 %v760_v2, %v59_v39  ;;  %v381_v50 = vsel %vm253_vm7, %v189_v31, %v317_v42  ;;  %vm254_vm8 = vcmp.gt.f32.partialorder %v190_v43, 0.0  ;;  %vm255_vm9 = vcmp.gt.f32.partialorder %v191_v44, 0.0 }
  0x3d   :  { %v318_v51 = vmul.f32 0.2, %v190_v43  ;;  %v636_v54 = vpack.c.bf16 %v381_v50, %v380_v46  ;;  %v319_v55 = vmul.f32 0.2, %v191_v44  ;;  %vm256_vm10 = vcmp.gt.f32.partialorder %v192_v45, 0.0  ;;  %v70_v46 = vld [vmem:[%s1178_s0 + $0x1c0] sm:$0xff] }
  0x3e   :  { %vm257_vm11 = vcmp.gt.f32.partialorder %v193_v47, 0.0  ;;  %v320_v57 = vmul.f32 0.2, %v192_v45  ;;  %v321_v58 = vmul.f32 0.2, %v193_v47  ;;  %v194_v59 = vadd.f32 %v765_v3, %v126_v48 }
  0x3f   :  { %v382_v56 = vsel %vm254_vm8, %v190_v43, %v318_v51  ;;  %716 = vst [vmem:[%s1181_s3 + $0x98] sm:$0xff] %v636_v54   ;;  %v383_v60 = vsel %vm255_vm9, %v191_v44, %v319_v55  ;;  %v195_v61 = vadd.f32 %v765_v3, %v127_v49  ;;  %v128_v62 = vmul.f32 %v760_v2, %v60_v52  ;;  %v72_v51 = vld [vmem:[%s1178_s0 + $0x1d0] sm:$0xff]  ;;  %v73_v52 = vld [vmem:[%s1178_s0 + $0x1d8] sm:$0xff] }
  0x40   :  { %v129_v63 = vmul.f32 %v760_v2, %v61_v53  ;;  %v641_v4 = vpack.c.bf16 %v383_v60, %v382_v56  ;;  %v384_v5 = vsel %vm256_vm10, %v192_v45, %v320_v57  ;;  %v385_v6 = vsel %vm257_vm11, %v193_v47, %v321_v58  ;;  %v71_v47 = vld [vmem:[%s1178_s0 + $0x1c8] sm:$0xff] }
  0x41   :  { %vm258_vm12 = vcmp.gt.f32.partialorder %v194_v59, 0.0  ;;  %v646_v9 = vpack.c.bf16 %v385_v6, %v384_v5  ;;  %vm259_vm13 = vcmp.gt.f32.partialorder %v195_v61, 0.0  ;;  %v322_v10 = vmul.f32 0.2, %v194_v59 }
  0x42   :  { %v323_v11 = vmul.f32 0.2, %v195_v61  ;;  %717 = vst [vmem:[%s1181_s3 + $0xa0] sm:$0xff] %v641_v4   ;;  %v196_v12 = vadd.f32 %v765_v3, %v128_v62  ;;  %v197_v13 = vadd.f32 %v765_v3, %v129_v63  ;;  %v130_v14 = vmul.f32 %v760_v2, %v62_v0  ;;  %v74_v0 = vld [vmem:[%s1178_s0 + $0x1e0] sm:$0xff] }
  0x43   :  { %v131_v15 = vmul.f32 %v760_v2, %v63_v1  ;;  %718 = vst [vmem:[%s1181_s3 + $0xa8] sm:$0xff] %v646_v9   ;;  %v386_v16 = vsel %vm258_vm12, %v194_v59, %v322_v10  ;;  %v132_v18 = vmul.f32 %v760_v2, %v64_v7  ;;  %v133_v19 = vmul.f32 %v760_v2, %v65_v8  ;;  %v75_v1 = vld [vmem:[%s1178_s0 + $0x1e8] sm:$0xff] }
  0x44   :  { %v387_v17 = vsel %vm259_vm13, %v195_v61, %v323_v11  ;;  %vm260_vm14 = vcmp.gt.f32.partialorder %v196_v12, 0.0  ;;  %vm261_vm15 = vcmp.gt.f32.partialorder %v197_v13, 0.0  ;;  %v324_v23 = vmul.f32 0.2, %v196_v12 }
  0x45   :  { %v651_v22 = vpack.c.bf16 %v387_v17, %v386_v16  ;;  %v325_v24 = vmul.f32 0.2, %v197_v13  ;;  %v198_v25 = vadd.f32 %v765_v3, %v130_v14  ;;  %v199_v26 = vadd.f32 %v765_v3, %v131_v15  ;;  %v76_v16 = vld [vmem:[%s1178_s0 + $0x1f0] sm:$0xff]  ;;  %v77_v17 = vld [vmem:[%s1178_s0 + $0x1f8] sm:$0xff] }
  0x46   :  { %v200_v27 = vadd.f32 %v765_v3, %v132_v18  ;;  %v388_v28 = vsel %vm260_vm14, %v196_v12, %v324_v23  ;;  %v201_v29 = vadd.f32 %v765_v3, %v133_v19  ;;  %v134_v30 = vmul.f32 %v760_v2, %v66_v20 }
  0x47   :  { %719 = vst [vmem:[%s1181_s3 + $0xb0] sm:$0xff] %v651_v22   ;;  %v135_v31 = vmul.f32 %v760_v2, %v67_v21  ;;  %v389_v32 = vsel %vm261_vm15, %v197_v13, %v325_v24  ;;  %vm262_vm0 = vcmp.gt.f32.partialorder %v198_v25, 0.0  ;;  %vm263_vm1 = vcmp.gt.f32.partialorder %v199_v26, 0.0 }
  0x48   :  { %v326_v33 = vmul.f32 0.2, %v198_v25  ;;  %v656_v36 = vpack.c.bf16 %v389_v32, %v388_v28  ;;  %v327_v37 = vmul.f32 0.2, %v199_v26  ;;  %vm264_vm2 = vcmp.gt.f32.partialorder %v200_v27, 0.0 }
  0x49   :  { %vm265_vm3 = vcmp.gt.f32.partialorder %v201_v29, 0.0  ;;  %v328_v39 = vmul.f32 0.2, %v200_v27  ;;  %v329_v40 = vmul.f32 0.2, %v201_v29  ;;  %v202_v41 = vadd.f32 %v765_v3, %v134_v30 }
  0x4a   :  { %v390_v38 = vsel %vm262_vm0, %v198_v25, %v326_v33  ;;  %720 = vst [vmem:[%s1181_s3 + $0xb8] sm:$0xff] %v656_v36   ;;  %v391_v42 = vsel %vm263_vm1, %v199_v26, %v327_v37  ;;  %v203_v43 = vadd.f32 %v765_v3, %v135_v31  ;;  %v136_v44 = vmul.f32 %v760_v2, %v68_v34 }
  0x4b   :  { %v137_v45 = vmul.f32 %v760_v2, %v69_v35  ;;  %v661_v48 = vpack.c.bf16 %v391_v42, %v390_v38  ;;  %v392_v49 = vsel %vm264_vm2, %v200_v27, %v328_v39  ;;  %v393_v50 = vsel %vm265_vm3, %v201_v29, %v329_v40 }
  0x4c   :  { %vm266_vm4 = vcmp.gt.f32.partialorder %v202_v41, 0.0  ;;  %v666_v53 = vpack.c.bf16 %v393_v50, %v392_v49  ;;  %vm267_vm5 = vcmp.gt.f32.partialorder %v203_v43, 0.0  ;;  %v330_v54 = vmul.f32 0.2, %v202_v41 }
  0x4d   :  { %v331_v55 = vmul.f32 0.2, %v203_v43  ;;  %721 = vst [vmem:[%s1181_s3 + $0xc0] sm:$0xff] %v661_v48   ;;  %v204_v56 = vadd.f32 %v765_v3, %v136_v44  ;;  %v205_v57 = vadd.f32 %v765_v3, %v137_v45  ;;  %v138_v58 = vmul.f32 %v760_v2, %v70_v46 }
  0x4e   :  { %v139_v59 = vmul.f32 %v760_v2, %v71_v47  ;;  %722 = vst [vmem:[%s1181_s3 + $0xc8] sm:$0xff] %v666_v53   ;;  %v394_v60 = vsel %vm266_vm4, %v202_v41, %v330_v54  ;;  %v140_v62 = vmul.f32 %v760_v2, %v72_v51  ;;  %v141_v63 = vmul.f32 %v760_v2, %v73_v52 }
  0x4f   :  { %v395_v61 = vsel %vm267_vm5, %v203_v43, %v331_v55  ;;  %vm268_vm6 = vcmp.gt.f32.partialorder %v204_v56, 0.0  ;;  %vm269_vm7 = vcmp.gt.f32.partialorder %v205_v57, 0.0  ;;  %v332_v5 = vmul.f32 0.2, %v204_v56 }
  0x50   :  { %v671_v4 = vpack.c.bf16 %v395_v61, %v394_v60  ;;  %v333_v6 = vmul.f32 0.2, %v205_v57  ;;  %v206_v7 = vadd.f32 %v765_v3, %v138_v58  ;;  %v207_v8 = vadd.f32 %v765_v3, %v139_v59 }
  0x51   :  { %v208_v9 = vadd.f32 %v765_v3, %v140_v62  ;;  %v396_v10 = vsel %vm268_vm6, %v204_v56, %v332_v5  ;;  %v209_v11 = vadd.f32 %v765_v3, %v141_v63  ;;  %v142_v12 = vmul.f32 %v760_v2, %v74_v0 }
  0x52   :  { %723 = vst [vmem:[%s1181_s3 + $0xd0] sm:$0xff] %v671_v4   ;;  %v143_v13 = vmul.f32 %v760_v2, %v75_v1  ;;  %v397_v14 = vsel %vm269_vm7, %v205_v57, %v333_v6  ;;  %vm270_vm8 = vcmp.gt.f32.partialorder %v206_v7, 0.0  ;;  %vm271_vm9 = vcmp.gt.f32.partialorder %v207_v8, 0.0 }
  0x53   :  { %v334_v15 = vmul.f32 0.2, %v206_v7  ;;  %v676_v18 = vpack.c.bf16 %v397_v14, %v396_v10  ;;  %v335_v19 = vmul.f32 0.2, %v207_v8  ;;  %vm272_vm10 = vcmp.gt.f32.partialorder %v208_v9, 0.0 }
  0x54   :  { %vm273_vm11 = vcmp.gt.f32.partialorder %v209_v11, 0.0  ;;  %v336_v21 = vmul.f32 0.2, %v208_v9  ;;  %v337_v22 = vmul.f32 0.2, %v209_v11  ;;  %v210_v23 = vadd.f32 %v765_v3, %v142_v12 }
  0x55   :  { %v398_v20 = vsel %vm270_vm8, %v206_v7, %v334_v15  ;;  %724 = vst [vmem:[%s1181_s3 + $0xd8] sm:$0xff] %v676_v18   ;;  %v399_v24 = vsel %vm271_vm9, %v207_v8, %v335_v19  ;;  %v211_v25 = vadd.f32 %v765_v3, %v143_v13  ;;  %v144_v26 = vmul.f32 %v760_v2, %v76_v16 }
  0x56   :  { %v145_v27 = vmul.f32 %v760_v2, %v77_v17  ;;  %v681_v28 = vpack.c.bf16 %v399_v24, %v398_v20  ;;  %v400_v29 = vsel %vm272_vm10, %v208_v9, %v336_v21  ;;  %v401_v30 = vsel %vm273_vm11, %v209_v11, %v337_v22 }
  0x57   :  { %vm274_vm12 = vcmp.gt.f32.partialorder %v210_v23, 0.0  ;;  %v686_v31 = vpack.c.bf16 %v401_v30, %v400_v29  ;;  %vm275_vm13 = vcmp.gt.f32.partialorder %v211_v25, 0.0  ;;  %v338_v32 = vmul.f32 0.2, %v210_v23 }
  0x58   :  { %v339_v33 = vmul.f32 0.2, %v211_v25  ;;  %725 = vst [vmem:[%s1181_s3 + $0xe0] sm:$0xff] %v681_v28   ;;  %v212_v34 = vadd.f32 %v765_v3, %v144_v26  ;;  %v213_v35 = vadd.f32 %v765_v3, %v145_v27 }
  0x59   :  { %726 = vst [vmem:[%s1181_s3 + $0xe8] sm:$0xff] %v686_v31   ;;  %v402_v2 = vsel %vm274_vm12, %v210_v23, %v338_v32 }
  0x5a   :  { %v403_v36 = vsel %vm275_vm13, %v211_v25, %v339_v33  ;;  %vm276_vm14 = vcmp.gt.f32.partialorder %v212_v34, 0.0  ;;  %vm277_vm15 = vcmp.gt.f32.partialorder %v213_v35, 0.0  ;;  %v340_v38 = vmul.f32 0.2, %v212_v34 }
  0x5b   :  { %v691_v37 = vpack.c.bf16 %v403_v36, %v402_v2  ;;  %v341_v39 = vmul.f32 0.2, %v213_v35 }
  0x5c   :  { %v404_v40 = vsel %vm276_vm14, %v212_v34, %v340_v38 }
  0x5d   :  { %727 = vst [vmem:[%s1181_s3 + $0xf0] sm:$0xff] %v691_v37   ;;  %v405_v41 = vsel %vm277_vm15, %v213_v35, %v341_v39 }
  0x5e   :  { %v696_v42 = vpack.c.bf16 %v405_v41, %v404_v40 }
  0x60   :  { %728 = vst [vmem:[%s1181_s3 + $0xf8] sm:$0xff] %v696_v42  }

// kernel: discriminator_forward.11
= control target key start
LH: loop header
LB: loop body
LE: loop exit
PB: predicated region body
PF: predicated region fallthrough
CT: control target
= control target key end

     0   :  { %s837_s1 = inlined_call_operand.vmem [shape: bf16[256,128], index: 1, kind: input, shape index: {}]   ;;  %s838_s0 = inlined_call_operand.vmem [shape: bf16[128,256], index: 0, kind: input, shape index: {}]   ;;  %s839_s2 = inlined_call_operand.vmem [shape: f32[128,128], index: 2, kind: output, shape index: {0}]   ;;  %s840_s3 = inlined_call_operand.vmem [shape: f32[1,2,128], index: 3, kind: output, shape index: {1}]  }
   0x1   :  { %v570_v0 = vld [vmem:[%s837_s1 + $0x38] sm:$0xff]  ;;  %v569_v2 = vld [vmem:[%s837_s1 + $0x30] sm:$0xff]  ;;  %v568_v4 = vld [vmem:[%s837_s1 + $0x28] sm:$0xff] }
   0x2   :  { %v578_v1 = vld [vmem:[%s837_s1 + $0x78] sm:$0xff]  ;;  %237 = vmatpush.bf16.msra.mxu0 %v570_v0  ;;  %v577_v3 = vld [vmem:[%s837_s1 + $0x70] sm:$0xff]  ;;  %579 = vmatpush.bf16.msra.mxu2 %v570_v0  ;;  %v576_v5 = vld [vmem:[%s837_s1 + $0x68] sm:$0xff] }
   0x3   :  { %286 = vmatpush.bf16.msra.mxu1 %v578_v1  ;;  %587 = vmatpush.bf16.msra.mxu3 %v578_v1  ;;  %v567_v6 = vld [vmem:[%s837_s1 + $0x20] sm:$0xff]  ;;  %v566_v8 = vld [vmem:[%s837_s1 + $0x18] sm:$0xff]  ;;  %v565_v10 = vld [vmem:[%s837_s1 + $0x10] sm:$0xff] }
   0x4   :  { %v575_v7 = vld [vmem:[%s837_s1 + $0x60] sm:$0xff]  ;;  %v574_v9 = vld [vmem:[%s837_s1 + $0x58] sm:$0xff]  ;;  %v573_v11 = vld [vmem:[%s837_s1 + $0x50] sm:$0xff] }
   0x5   :  { %v564_v12 = vld [vmem:[%s837_s1 + $0x8] sm:$0xff]  ;;  %v563_v14 = vld [vmem:[%s837_s1] sm:$0xff]  ;;  %v429_v28 = vld [vmem:[%s838_s0 + $0x10] sm:$0xf] }
   0x6   :  { %238 = vmatpush.bf16.msra.mxu0 %v569_v2  ;;  %580 = vmatpush.bf16.msra.mxu2 %v569_v2  ;;  %v572_v13 = vld [vmem:[%s837_s1 + $0x48] sm:$0xff]  ;;  %v571_v15 = vld [vmem:[%s837_s1 + $0x40] sm:$0xff]  ;;  %v550_v29 = vld [vmem:[%s838_s0 + $0x14] sm:$0xf0] }
   0x7   :  { %287 = vmatpush.bf16.msra.mxu1 %v577_v3  ;;  %588 = vmatpush.bf16.msra.mxu3 %v577_v3  ;;  %v421_v16 = vld [vmem:[%s838_s0] sm:$0xf]  ;;  %v548_v17 = vld [vmem:[%s838_s0 + $0x4] sm:$0xf0]  ;;  %v547_v18 = vld [vmem:[%s838_s0 + $0x4] sm:$0xf]  ;;  %v430_v36 = vor.u32 %v550_v29, %v429_v28 }
   0x8   :  { %v423_v19 = vld [vmem:[%s838_s0 + $0x8] sm:$0xf0]  ;;  %v453_v20 = vld [vmem:[%s838_s0 + $0x40] sm:$0xf]  ;;  %v556_v21 = vld [vmem:[%s838_s0 + $0x44] sm:$0xf0]  ;;  %v422_v24 = vor.u32 %v548_v17, %v421_v16 }
   0x9   :  { %v555_v22 = vld [vmem:[%s838_s0 + $0x44] sm:$0xf]  ;;  %v455_v23 = vld [vmem:[%s838_s0 + $0x48] sm:$0xf0]  ;;  %v426_v25 = vor.u32 %v547_v18, %v423_v19  ;;  %v454_v26 = vor.u32 %v556_v21, %v453_v20  ;;  %v549_v30 = vld [vmem:[%s838_s0 + $0x14] sm:$0xf] }
   0xa   :  { %239 = vmatpush.bf16.msra.mxu0 %v568_v4  ;;  %581 = vmatpush.bf16.msra.mxu2 %v568_v4  ;;  %v458_v27 = vor.u32 %v555_v22, %v455_v23  ;;  %v431_v31 = vld [vmem:[%s838_s0 + $0x18] sm:$0xf0]  ;;  %v461_v32 = vld [vmem:[%s838_s0 + $0x50] sm:$0xf]  ;;  %v558_v33 = vld [vmem:[%s838_s0 + $0x54] sm:$0xf0] }
   0xb   :  { %288 = vmatpush.bf16.msra.mxu1 %v576_v5  ;;  %589 = vmatpush.bf16.msra.mxu3 %v576_v5  ;;  %v557_v34 = vld [vmem:[%s838_s0 + $0x54] sm:$0xf]  ;;  %v463_v35 = vld [vmem:[%s838_s0 + $0x58] sm:$0xf0]  ;;  %v434_v37 = vor.u32 %v549_v30, %v431_v31  ;;  %v462_v38 = vor.u32 %v558_v33, %v461_v32  ;;  %v437_v40 = vld [vmem:[%s838_s0 + $0x20] sm:$0xf] }
   0xc   :  { %v466_v39 = vor.u32 %v557_v34, %v463_v35  ;;  %v552_v41 = vld [vmem:[%s838_s0 + $0x24] sm:$0xf0]  ;;  %v551_v42 = vld [vmem:[%s838_s0 + $0x24] sm:$0xf]  ;;  %v439_v43 = vld [vmem:[%s838_s0 + $0x28] sm:$0xf0] }
   0xd   :  { %v469_v44 = vld [vmem:[%s838_s0 + $0x60] sm:$0xf]  ;;  %v560_v45 = vld [vmem:[%s838_s0 + $0x64] sm:$0xf0]  ;;  %v559_v46 = vld [vmem:[%s838_s0 + $0x64] sm:$0xf]  ;;  %v438_v48 = vor.u32 %v552_v41, %v437_v40  ;;  %v442_v49 = vor.u32 %v551_v42, %v439_v43 }
   0xe   :  { %240 = vmatpush.bf16.msra.mxu0 %v567_v6  ;;  %582 = vmatpush.bf16.msra.mxu2 %v567_v6  ;;  %v471_v47 = vld [vmem:[%s838_s0 + $0x68] sm:$0xf0]  ;;  %v470_v50 = vor.u32 %v560_v45, %v469_v44  ;;  %v445_v52 = vld [vmem:[%s838_s0 + $0x30] sm:$0xf]  ;;  %v554_v53 = vld [vmem:[%s838_s0 + $0x34] sm:$0xf0] }
   0xf   :  { %289 = vmatpush.bf16.msra.mxu1 %v575_v7  ;;  %590 = vmatpush.bf16.msra.mxu3 %v575_v7  ;;  %v474_v51 = vor.u32 %v559_v46, %v471_v47  ;;  %v553_v54 = vld [vmem:[%s838_s0 + $0x34] sm:$0xf]  ;;  %v447_v55 = vld [vmem:[%s838_s0 + $0x38] sm:$0xf0]  ;;  %v477_v56 = vld [vmem:[%s838_s0 + $0x70] sm:$0xf]  ;;  %v446_v60 = vor.u32 %v554_v53, %v445_v52 }
  0x10   :  { %v562_v57 = vld [vmem:[%s838_s0 + $0x74] sm:$0xf0]  ;;  %v561_v58 = vld [vmem:[%s838_s0 + $0x74] sm:$0xf]  ;;  %v479_v59 = vld [vmem:[%s838_s0 + $0x78] sm:$0xf0]  ;;  %v450_v61 = vor.u32 %v553_v54, %v447_v55 }
  0x11   :  { %v478_v62 = vor.u32 %v562_v57, %v477_v56  ;;  %v482_v63 = vor.u32 %v561_v58, %v479_v59 }
  0x12   :  { %241 = vmatpush.bf16.msra.mxu0 %v566_v8  ;;  %583 = vmatpush.bf16.msra.mxu2 %v566_v8 }
  0x13   :  { %290 = vmatpush.bf16.msra.mxu1 %v574_v9  ;;  %591 = vmatpush.bf16.msra.mxu3 %v574_v9 }
  0x16   :  { %242 = vmatpush.bf16.msra.mxu0 %v565_v10  ;;  %584 = vmatpush.bf16.msra.mxu2 %v565_v10 }
  0x17   :  { %291 = vmatpush.bf16.msra.mxu1 %v573_v11  ;;  %592 = vmatpush.bf16.msra.mxu3 %v573_v11 }
  0x1a   :  { %243 = vmatpush.bf16.msra.mxu0 %v564_v12  ;;  %585 = vmatpush.bf16.msra.mxu2 %v564_v12 }
  0x1b   :  { %292 = vmatpush.bf16.msra.mxu1 %v572_v13  ;;  %593 = vmatpush.bf16.msra.mxu3 %v572_v13 }
  0x1e   :  { %244 = vmatpush.bf16.msra.mxu0 %v563_v14  ;;  %586 = vmatpush.bf16.msra.mxu2 %v563_v14 }
  0x1f   :  { %293 = vmatpush.bf16.msra.mxu1 %v571_v15  ;;  %594 = vmatpush.bf16.msra.mxu3 %v571_v15 }
  0x21   :  { %245 = vmatmul.bf16.vlgmr.msra.gmra.mxu0 %v422_v24  ;;  %265 = vmatmul.bf16.vlgmr.msra.gmra.mxu2 %v454_v26 }
  0x22   :  { %294 = vmatmul.bf16.vlgmr.msra.gmra.mxu1 %v426_v25  ;;  %314 = vmatmul.bf16.vlgmr.msra.gmra.mxu3 %v458_v27 }
  0x31   :  { %250 = vmatmul.bf16.gmra.mxu0 %v430_v36  ;;  %270 = vmatmul.bf16.gmra.mxu2 %v462_v38 }
  0x32   :  { %299 = vmatmul.bf16.gmra.mxu1 %v434_v37  ;;  %319 = vmatmul.bf16.gmra.mxu3 %v466_v39 }
  0x41   :  { %255 = vmatmul.bf16.gmra.mxu0 %v438_v48  ;;  %275 = vmatmul.bf16.gmra.mxu2 %v470_v50 }
  0x42   :  { %304 = vmatmul.bf16.gmra.mxu1 %v442_v49  ;;  %324 = vmatmul.bf16.gmra.mxu3 %v474_v51 }
  0x51   :  { %260 = vmatmul.bf16.gmra.mxu0 %v446_v60  ;;  %280 = vmatmul.bf16.gmra.mxu2 %v478_v62 }
  0x52   :  { %309 = vmatmul.bf16.gmra.mxu1 %v450_v61  ;;  %329 = vmatmul.bf16.gmra.mxu3 %v482_v63 }
  0x9e   :  { %v246_v0 = vpop.f32.mrf.mxu0 }
  0x9f   :  { %v295_v1 = vpop.f32.mrf.mxu1 }
  0xa0   :  { %v296_v2 = vadd.f32 %v295_v1, %v246_v0 }
  0xa2   :  { %335 = vst [vmem:[%s839_s2] sm:$0xff] %v296_v2  ;;  %v373_v34 = vmul.f32 %v296_v2, %v296_v2 }
  0xa4   :  { %v266_v3 = vpop.f32.mrf.mxu2 }
  0xa5   :  { %v315_v4 = vpop.f32.mrf.mxu3 }
  0xa6   :  { %v248_v5 = vpop.f32.mrf.mxu0  ;;  %v762_v7 = vadd.f32 %v315_v4, %v266_v3 }
  0xa7   :  { %v297_v6 = vpop.f32.mrf.mxu1 }
  0xa8   :  { %v298_v8 = vadd.f32 %v297_v6, %v248_v5  ;;  %343 = vst [vmem:[%s839_s2 + $0x40] sm:$0xff] %v762_v7 }
  0xaa   :  { %336 = vst [vmem:[%s839_s2 + $0x8] sm:$0xff] %v298_v8  ;;  %v374_v33 = vmul.f32 %v298_v8, %v298_v8  ;;  %v351_v35 = vadd.f32 %v298_v8, %v296_v2  ;;  %v381_v2 = vmul.f32 %v762_v7, %v762_v7 }
  0xac   :  { %v268_v9 = vpop.f32.mrf.mxu2  ;;  %v389_v42 = vadd.f32 %v374_v33, %v373_v34 }
  0xad   :  { %v317_v10 = vpop.f32.mrf.mxu3 }
  0xae   :  { %v251_v11 = vpop.f32.mrf.mxu0  ;;  %v771_v13 = vadd.f32 %v317_v10, %v268_v9 }
  0xaf   :  { %v300_v12 = vpop.f32.mrf.mxu1 }
  0xb0   :  { %v301_v14 = vadd.f32 %v300_v12, %v251_v11  ;;  %344 = vst [vmem:[%s839_s2 + $0x48] sm:$0xff] %v771_v13  ;;  %v382_v5 = vmul.f32 %v771_v13, %v771_v13 }
  0xb2   :  { %337 = vst [vmem:[%s839_s2 + $0x10] sm:$0xff] %v301_v14  ;;  %v375_v36 = vmul.f32 %v301_v14, %v301_v14  ;;  %v352_v43 = vadd.f32 %v351_v35, %v301_v14 }
  0xb4   :  { %v271_v15 = vpop.f32.mrf.mxu2  ;;  %v390_v46 = vadd.f32 %v389_v42, %v375_v36 }
  0xb5   :  { %v320_v16 = vpop.f32.mrf.mxu3 }
  0xb6   :  { %v253_v17 = vpop.f32.mrf.mxu0  ;;  %v780_v19 = vadd.f32 %v320_v16, %v271_v15 }
  0xb7   :  { %v302_v18 = vpop.f32.mrf.mxu1 }
  0xb8   :  { %v303_v20 = vadd.f32 %v302_v18, %v253_v17  ;;  %345 = vst [vmem:[%s839_s2 + $0x50] sm:$0xff] %v780_v19  ;;  %v383_v12 = vmul.f32 %v780_v19, %v780_v19 }
  0xba   :  { %338 = vst [vmem:[%s839_s2 + $0x18] sm:$0xff] %v303_v20  ;;  %v376_v44 = vmul.f32 %v303_v20, %v303_v20  ;;  %v353_v47 = vadd.f32 %v352_v43, %v303_v20 }
  0xbc   :  { %v273_v21 = vpop.f32.mrf.mxu2  ;;  %v391_v49 = vadd.f32 %v390_v46, %v376_v44 }
  0xbd   :  { %v322_v22 = vpop.f32.mrf.mxu3 }
  0xbe   :  { %v256_v23 = vpop.f32.mrf.mxu0  ;;  %v789_v25 = vadd.f32 %v322_v22, %v273_v21 }
  0xbf   :  { %v305_v24 = vpop.f32.mrf.mxu1 }
  0xc0   :  { %v306_v26 = vadd.f32 %v305_v24, %v256_v23  ;;  %346 = vst [vmem:[%s839_s2 + $0x58] sm:$0xff] %v789_v25 }
  0xc2   :  { %339 = vst [vmem:[%s839_s2 + $0x20] sm:$0xff] %v306_v26  ;;  %v377_v48 = vmul.f32 %v306_v26, %v306_v26  ;;  %v354_v50 = vadd.f32 %v353_v47, %v306_v26 }
  0xc4   :  { %v276_v27 = vpop.f32.mrf.mxu2  ;;  %v392_v52 = vadd.f32 %v391_v49, %v377_v48 }
  0xc5   :  { %v325_v28 = vpop.f32.mrf.mxu3 }
  0xc6   :  { %v258_v29 = vpop.f32.mrf.mxu0  ;;  %v326_v31 = vadd.f32 %v325_v28, %v276_v27 }
  0xc7   :  { %v307_v30 = vpop.f32.mrf.mxu1 }
  0xc8   :  { %v308_v32 = vadd.f32 %v307_v30, %v258_v29  ;;  %347 = vst [vmem:[%s839_s2 + $0x60] sm:$0xff] %v326_v31  ;;  %v385_v17 = vmul.f32 %v326_v31, %v326_v31 }
  0xca   :  { %340 = vst [vmem:[%s839_s2 + $0x28] sm:$0xff] %v308_v32  ;;  %v378_v51 = vmul.f32 %v308_v32, %v308_v32  ;;  %v355_v53 = vadd.f32 %v354_v50, %v308_v32 }
  0xcc   :  { %v278_v37 = vpop.f32.mrf.mxu2  ;;  %v393_v60 = vadd.f32 %v392_v52, %v378_v51 }
  0xcd   :  { %v327_v38 = vpop.f32.mrf.mxu3 }
  0xce   :  { %v261_v39 = vpop.f32.mrf.mxu0  ;;  %v328_v41 = vadd.f32 %v327_v38, %v278_v37 }
  0xcf   :  { %v310_v40 = vpop.f32.mrf.mxu1 }
  0xd0   :  { %v311_v45 = vadd.f32 %v310_v40, %v261_v39  ;;  %348 = vst [vmem:[%s839_s2 + $0x68] sm:$0xff] %v328_v41  ;;  %v386_v21 = vmul.f32 %v328_v41, %v328_v41 }
  0xd2   :  { %341 = vst [vmem:[%s839_s2 + $0x30] sm:$0xff] %v311_v45  ;;  %v379_v54 = vmul.f32 %v311_v45, %v311_v45  ;;  %v356_v61 = vadd.f32 %v355_v53, %v311_v45 }
  0xd4   :  { %v281_v55 = vpop.f32.mrf.mxu2  ;;  %v394_v63 = vadd.f32 %v393_v60, %v379_v54 }
  0xd5   :  { %v330_v56 = vpop.f32.mrf.mxu3 }
  0xd6   :  { %v263_v57 = vpop.f32.mrf.mxu0  ;;  %v331_v59 = vadd.f32 %v330_v56, %v281_v55 }
  0xd7   :  { %v312_v58 = vpop.f32.mrf.mxu1 }
  0xd8   :  { %v313_v62 = vadd.f32 %v312_v58, %v263_v57  ;;  %349 = vst [vmem:[%s839_s2 + $0x70] sm:$0xff] %v331_v59  ;;  %v387_v26 = vmul.f32 %v331_v59, %v331_v59 }
  0xda   :  { %342 = vst [vmem:[%s839_s2 + $0x38] sm:$0xff] %v313_v62  ;;  %v357_v0 = vadd.f32 %v356_v61, %v313_v62  ;;  %v380_v1 = vmul.f32 %v313_v62, %v313_v62 }
  0xdc   :  { %v358_v3 = vadd.f32 %v357_v0, %v762_v7  ;;  %v395_v4 = vadd.f32 %v394_v63, %v380_v1  ;;  %v283_v9 = vpop.f32.mrf.mxu2  ;;  %v384_v7 = vmul.f32 %v789_v25, %v789_v25 }
  0xdd   :  { %v332_v10 = vpop.f32.mrf.mxu3 }
  0xde   :  { %v359_v6 = vadd.f32 %v358_v3, %v771_v13  ;;  %v396_v8 = vadd.f32 %v395_v4, %v381_v2  ;;  %v333_v11 = vadd.f32 %v332_v10, %v283_v9 }
  0xe0   :  { %v360_v14 = vadd.f32 %v359_v6, %v780_v19  ;;  %v397_v15 = vadd.f32 %v396_v8, %v382_v5  ;;  %350 = vst [vmem:[%s839_s2 + $0x78] sm:$0xff] %v333_v11  ;;  %v388_v29 = vmul.f32 %v333_v11, %v333_v11 }
  0xe2   :  { %v398_v16 = vadd.f32 %v397_v15, %v383_v12  ;;  %v361_v13 = vadd.f32 %v360_v14, %v789_v25 }
  0xe4   :  { %v362_v18 = vadd.f32 %v361_v13, %v326_v31  ;;  %v399_v20 = vadd.f32 %v398_v16, %v384_v7 }
  0xe6   :  { %v363_v22 = vadd.f32 %v362_v18, %v328_v41  ;;  %v400_v23 = vadd.f32 %v399_v20, %v385_v17 }
  0xe8   :  { %v364_v24 = vadd.f32 %v363_v22, %v331_v59  ;;  %v401_v19 = vadd.f32 %v400_v23, %v386_v21 }
  0xea   :  { %v402_v27 = vadd.f32 %v401_v19, %v387_v26  ;;  %v365_v28 = vadd.f32 %v364_v24, %v333_v11 }
  0xec   :  { %v366_v30 = vrot.slane %v365_v28, 4  ;;  %v403_v32 = vadd.f32 %v402_v27, %v388_v29 }
  0xee   :  { %v367_v33 = vadd.f32 %v366_v30, %v365_v28  ;;  %v404_v34 = vrot.slane %v403_v32, 4 }
  0xf0   :  { %v368_v35 = vrot.slane %v367_v33, 2  ;;  %v405_v36 = vadd.f32 %v404_v34, %v403_v32 }
  0xf2   :  { %v369_v37 = vadd.f32 %v368_v35, %v367_v33  ;;  %v406_v25 = vrot.slane %v405_v36, 2 }
  0xf4   :  { %v370_v38 = vrot.slane %v369_v37, 1  ;;  %v407_v31 = vadd.f32 %v406_v25, %v405_v36 }
  0xf6   :  { %v371_v39 = vadd.f32 %v370_v38, %v369_v37  ;;  %v408_v40 = vrot.slane %v407_v31, 1 }
  0xf8   :  { %372 = vst [vmem:[%s840_s3] sm:$0x1] %v371_v39  ;;  %v409_v41 = vadd.f32 %v408_v40, %v407_v31 }
  0xfa   :  { %410 = vst [vmem:[%s840_s3 + $0x1] sm:$0x1] %v409_v41 }

// kernel: discriminator_forward.12
= control target key start
LH: loop header
LB: loop body
LE: loop exit
PB: predicated region body
PF: predicated region fallthrough
CT: control target
= control target key end

     0   :  { %s338_s0 = inlined_call_operand.vmem [shape: f32[128,128], index: 0, kind: input, shape index: {}]   ;;  %s339_s1 = inlined_call_operand.vmem [shape: f32[1,128], index: 1, kind: input, shape index: {}]   ;;  %s340_s2 = inlined_call_operand.vmem [shape: f32[1,128], index: 2, kind: input, shape index: {}]   ;;  %s341_s3 = inlined_call_operand.vmem [shape: bf16[128,128], index: 3, kind: output, shape index: {}]  }
   0x1   :  { %v14_v0 = vld [vmem:[%s338_s0] sm:$0xff]  ;;  %v15_v1 = vld [vmem:[%s338_s0 + $0x8] sm:$0xff]  ;;  %v16_v4 = vld [vmem:[%s338_s0 + $0x10] sm:$0xff] }
   0x2   :  { %v232_v2 = vld [vmem:[%s339_s1] ss:$0 sm:$0xff]  ;;  %v17_v5 = vld [vmem:[%s338_s0 + $0x18] sm:$0xff]  ;;  %v19_v11 = vld [vmem:[%s338_s0 + $0x28] sm:$0xff] }
   0x3   :  { %v237_v3 = vld [vmem:[%s340_s2] ss:$0 sm:$0xff]  ;;  %v34_v7 = vmul.f32 %v232_v2, %v14_v0  ;;  %v35_v8 = vmul.f32 %v232_v2, %v15_v1  ;;  %v36_v9 = vmul.f32 %v232_v2, %v16_v4  ;;  %v37_v10 = vmul.f32 %v232_v2, %v17_v5  ;;  %v20_v12 = vld [vmem:[%s338_s0 + $0x30] sm:$0xff]  ;;  %v21_v13 = vld [vmem:[%s338_s0 + $0x38] sm:$0xff] }
   0x4   :  { %v18_v6 = vld [vmem:[%s338_s0 + $0x20] sm:$0xff]  ;;  %v39_v15 = vmul.f32 %v232_v2, %v19_v11  ;;  %v40_v16 = vmul.f32 %v232_v2, %v20_v12  ;;  %v41_v17 = vmul.f32 %v232_v2, %v21_v13  ;;  %v23_v37 = vld [vmem:[%s338_s0 + $0x48] sm:$0xff]  ;;  %v24_v38 = vld [vmem:[%s338_s0 + $0x50] sm:$0xff] }
   0x5   :  { %v38_v14 = vmul.f32 %v232_v2, %v18_v6  ;;  %v54_v18 = vadd.f32 %v237_v3, %v34_v7  ;;  %v55_v19 = vadd.f32 %v237_v3, %v35_v8  ;;  %v56_v20 = vadd.f32 %v237_v3, %v36_v9  ;;  %v22_v32 = vld [vmem:[%s338_s0 + $0x40] sm:$0xff]  ;;  %v25_v39 = vld [vmem:[%s338_s0 + $0x58] sm:$0xff]  ;;  %v27_v51 = vld [vmem:[%s338_s0 + $0x68] sm:$0xff] }
   0x6   :  { %v57_v21 = vadd.f32 %v237_v3, %v37_v10  ;;  %v59_v23 = vadd.f32 %v237_v3, %v39_v15  ;;  %v60_v24 = vadd.f32 %v237_v3, %v40_v16  ;;  %v61_v25 = vadd.f32 %v237_v3, %v41_v17  ;;  %v26_v50 = vld [vmem:[%s338_s0 + $0x60] sm:$0xff]  ;;  %v28_v63 = vld [vmem:[%s338_s0 + $0x70] sm:$0xff]  ;;  %v29_v0 = vld [vmem:[%s338_s0 + $0x78] sm:$0xff] }
   0x7   :  { %v58_v22 = vadd.f32 %v237_v3, %v38_v14  ;;  %vm70_vm0 = vcmp.gt.f32.partialorder %v54_v18, 0.0  ;;  %vm71_vm1 = vcmp.gt.f32.partialorder %v55_v19, 0.0  ;;  %v86_v26 = vmul.f32 0.2, %v54_v18 }
   0x8   :  { %v87_v27 = vmul.f32 0.2, %v55_v19  ;;  %vm72_vm2 = vcmp.gt.f32.partialorder %v56_v20, 0.0  ;;  %vm73_vm3 = vcmp.gt.f32.partialorder %v57_v21, 0.0  ;;  %v88_v28 = vmul.f32 0.2, %v56_v20 }
   0x9   :  { %v89_v29 = vmul.f32 0.2, %v57_v21  ;;  %v102_v30 = vsel %vm70_vm0, %v54_v18, %v86_v26  ;;  %vm74_vm4 = vcmp.gt.f32.partialorder %v58_v22, 0.0  ;;  %vm75_vm5 = vcmp.gt.f32.partialorder %v59_v23, 0.0 }
   0xa   :  { %v103_v31 = vsel %vm71_vm1, %v55_v19, %v87_v27  ;;  %v104_v34 = vsel %vm72_vm2, %v56_v20, %v88_v28  ;;  %v90_v36 = vmul.f32 0.2, %v58_v22  ;;  %v91_v41 = vmul.f32 0.2, %v59_v23 }
   0xb   :  { %v157_v33 = vpack.c.bf16 %v103_v31, %v102_v30  ;;  %v105_v35 = vsel %vm73_vm3, %v57_v21, %v89_v29  ;;  %vm76_vm6 = vcmp.gt.f32.partialorder %v60_v24, 0.0  ;;  %vm77_vm7 = vcmp.gt.f32.partialorder %v61_v25, 0.0 }
   0xc   :  { %v162_v40 = vpack.c.bf16 %v105_v35, %v104_v34  ;;  %v106_v42 = vsel %vm74_vm4, %v58_v22, %v90_v36  ;;  %v92_v43 = vmul.f32 0.2, %v60_v24  ;;  %v93_v44 = vmul.f32 0.2, %v61_v25 }
   0xd   :  { %158 = vst [vmem:[%s341_s3] sm:$0xff] %v157_v33   ;;  %v42_v45 = vmul.f32 %v232_v2, %v22_v32  ;;  %v107_v46 = vsel %vm75_vm5, %v59_v23, %v91_v41  ;;  %v43_v47 = vmul.f32 %v232_v2, %v23_v37  ;;  %v44_v48 = vmul.f32 %v232_v2, %v24_v38 }
   0xe   :  { %194 = vst [vmem:[%s341_s3 + $0x8] sm:$0xff] %v162_v40   ;;  %v45_v49 = vmul.f32 %v232_v2, %v25_v39  ;;  %v167_v52 = vpack.c.bf16 %v107_v46, %v106_v42  ;;  %v108_v53 = vsel %vm76_vm6, %v60_v24, %v92_v43  ;;  %v109_v54 = vsel %vm77_vm7, %v61_v25, %v93_v44 }
   0xf   :  { %v62_v55 = vadd.f32 %v237_v3, %v42_v45  ;;  %v172_v56 = vpack.c.bf16 %v109_v54, %v108_v53  ;;  %v63_v57 = vadd.f32 %v237_v3, %v43_v47  ;;  %v64_v58 = vadd.f32 %v237_v3, %v44_v48 }
  0x10   :  { %v65_v59 = vadd.f32 %v237_v3, %v45_v49  ;;  %195 = vst [vmem:[%s341_s3 + $0x10] sm:$0xff] %v167_v52   ;;  %v46_v61 = vmul.f32 %v232_v2, %v26_v50  ;;  %v47_v62 = vmul.f32 %v232_v2, %v27_v51  ;;  %v48_v10 = vmul.f32 %v232_v2, %v28_v63 }
  0x11   :  { %vm78_vm8 = vcmp.gt.f32.partialorder %v62_v55, 0.0  ;;  %v94_v60 = vmul.f32 0.2, %v62_v55  ;;  %196 = vst [vmem:[%s341_s3 + $0x18] sm:$0xff] %v172_v56   ;;  %vm79_vm9 = vcmp.gt.f32.partialorder %v63_v57, 0.0  ;;  %vm80_vm10 = vcmp.gt.f32.partialorder %v64_v58, 0.0 }
  0x12   :  { %v95_v1 = vmul.f32 0.2, %v63_v57  ;;  %vm81_vm11 = vcmp.gt.f32.partialorder %v65_v59, 0.0  ;;  %v96_v5 = vmul.f32 0.2, %v64_v58  ;;  %v66_v7 = vadd.f32 %v237_v3, %v46_v61 }
  0x13   :  { %v110_v4 = vsel %vm78_vm8, %v62_v55, %v94_v60  ;;  %v97_v6 = vmul.f32 0.2, %v65_v59  ;;  %v67_v9 = vadd.f32 %v237_v3, %v47_v62  ;;  %v49_v11 = vmul.f32 %v232_v2, %v29_v0 }
  0x14   :  { %v111_v8 = vsel %vm79_vm9, %v63_v57, %v95_v1  ;;  %v112_v13 = vsel %vm80_vm10, %v64_v58, %v96_v5  ;;  %vm82_vm12 = vcmp.gt.f32.partialorder %v66_v7, 0.0  ;;  %v98_v16 = vmul.f32 0.2, %v66_v7 }
  0x15   :  { %v177_v12 = vpack.c.bf16 %v111_v8, %v110_v4  ;;  %v113_v14 = vsel %vm81_vm11, %v65_v59, %v97_v6  ;;  %vm83_vm13 = vcmp.gt.f32.partialorder %v67_v9, 0.0  ;;  %v99_v17 = vmul.f32 0.2, %v67_v9 }
  0x16   :  { %v182_v15 = vpack.c.bf16 %v113_v14, %v112_v13  ;;  %v68_v18 = vadd.f32 %v237_v3, %v48_v10  ;;  %v69_v19 = vadd.f32 %v237_v3, %v49_v11  ;;  %v114_v2 = vsel %vm82_vm12, %v66_v7, %v98_v16 }
  0x17   :  { %197 = vst [vmem:[%s341_s3 + $0x20] sm:$0xff] %v177_v12   ;;  %v115_v20 = vsel %vm83_vm13, %v67_v9, %v99_v17 }
  0x18   :  { %198 = vst [vmem:[%s341_s3 + $0x28] sm:$0xff] %v182_v15   ;;  %v187_v21 = vpack.c.bf16 %v115_v20, %v114_v2  ;;  %vm84_vm14 = vcmp.gt.f32.partialorder %v68_v18, 0.0  ;;  %vm85_vm15 = vcmp.gt.f32.partialorder %v69_v19, 0.0  ;;  %v100_v22 = vmul.f32 0.2, %v68_v18 }
  0x19   :  { %v101_v23 = vmul.f32 0.2, %v69_v19 }
  0x1a   :  { %199 = vst [vmem:[%s341_s3 + $0x30] sm:$0xff] %v187_v21   ;;  %v116_v24 = vsel %vm84_vm14, %v68_v18, %v100_v22 }
  0x1b   :  { %v117_v25 = vsel %vm85_vm15, %v69_v19, %v101_v23 }
  0x1c   :  { %v192_v26 = vpack.c.bf16 %v117_v25, %v116_v24 }
  0x1e   :  { %200 = vst [vmem:[%s341_s3 + $0x38] sm:$0xff] %v192_v26  }

// kernel: discriminator_forward.14
= control target key start
LH: loop header
LB: loop body
LE: loop exit
PB: predicated region body
PF: predicated region fallthrough
CT: control target
= control target key end

     0   :  { %s115_s0 = inlined_call_operand.vmem [shape: f32[32,128], index: 0, kind: input, shape index: {}]   ;;  %s116_s1 = inlined_call_operand.vmem [shape: f32[1,128], index: 1, kind: input, shape index: {}]   ;;  %s117_s2 = inlined_call_operand.vmem [shape: f32[1,128], index: 2, kind: input, shape index: {}]   ;;  %s118_s3 = inlined_call_operand.vmem [shape: bf16[32,128], index: 3, kind: output, shape index: {}]  }
   0x1   :  { %v14_v0 = vld [vmem:[%s115_s0] sm:$0xff]  ;;  %v15_v1 = vld [vmem:[%s115_s0 + $0x8] sm:$0xff]  ;;  %v16_v4 = vld [vmem:[%s115_s0 + $0x10] sm:$0xff] }
   0x2   :  { %v69_v2 = vld [vmem:[%s116_s1] ss:$0 sm:$0xff]  ;;  %v17_v5 = vld [vmem:[%s115_s0 + $0x18] sm:$0xff] }
   0x3   :  { %v70_v3 = vld [vmem:[%s117_s2] ss:$0 sm:$0xff]  ;;  %v22_v6 = vmul.f32 %v69_v2, %v14_v0  ;;  %v23_v7 = vmul.f32 %v69_v2, %v15_v1  ;;  %v24_v8 = vmul.f32 %v69_v2, %v16_v4  ;;  %v25_v9 = vmul.f32 %v69_v2, %v17_v5 }
   0x5   :  { %v30_v10 = vadd.f32 %v70_v3, %v22_v6  ;;  %v31_v11 = vadd.f32 %v70_v3, %v23_v7  ;;  %v32_v12 = vadd.f32 %v70_v3, %v24_v8  ;;  %v33_v13 = vadd.f32 %v70_v3, %v25_v9 }
   0x7   :  { %vm34_vm0 = vcmp.gt.f32.partialorder %v30_v10, 0.0  ;;  %vm35_vm1 = vcmp.gt.f32.partialorder %v31_v11, 0.0  ;;  %v38_v14 = vmul.f32 0.2, %v30_v10  ;;  %v39_v15 = vmul.f32 0.2, %v31_v11 }
   0x8   :  { %vm36_vm2 = vcmp.gt.f32.partialorder %v32_v12, 0.0  ;;  %vm37_vm3 = vcmp.gt.f32.partialorder %v33_v13, 0.0  ;;  %v40_v16 = vmul.f32 0.2, %v32_v12  ;;  %v41_v17 = vmul.f32 0.2, %v33_v13 }
   0x9   :  { %v42_v18 = vsel %vm34_vm0, %v30_v10, %v38_v14  ;;  %v43_v19 = vsel %vm35_vm1, %v31_v11, %v39_v15 }
   0xa   :  { %v61_v20 = vpack.c.bf16 %v43_v19, %v42_v18  ;;  %v44_v21 = vsel %vm36_vm2, %v32_v12, %v40_v16  ;;  %v45_v22 = vsel %vm37_vm3, %v33_v13, %v41_v17 }
   0xb   :  { %v66_v23 = vpack.c.bf16 %v45_v22, %v44_v21 }
   0xc   :  { %62 = vst [vmem:[%s118_s3] sm:$0xff] %v61_v20  }
   0xd   :  { %68 = vst [vmem:[%s118_s3 + $0x8] sm:$0xff] %v66_v23  }

// kernel: discriminator_forward.13
= control target key start
LH: loop header
LB: loop body
LE: loop exit
PB: predicated region body
PF: predicated region fallthrough
CT: control target
= control target key end

     0   :  { %s811_s1 = inlined_call_operand.vmem [shape: bf16[512,128], index: 1, kind: input, shape index: {}]   ;;  %s812_s0 = inlined_call_operand.vmem [shape: bf16[32,512], index: 0, kind: input, shape index: {}]   ;;  %s813_s2 = inlined_call_operand.vmem [shape: f32[32,128], index: 2, kind: output, shape index: {0}]   ;;  %s814_s3 = inlined_call_operand.vmem [shape: f32[1,2,128], index: 3, kind: output, shape index: {1}]  }
   0x1   :  { %v604_v0 = vld [vmem:[%s811_s1 + $0x38] sm:$0xff]  ;;  %v603_v4 = vld [vmem:[%s811_s1 + $0x30] sm:$0xff]  ;;  %v602_v8 = vld [vmem:[%s811_s1 + $0x28] sm:$0xff] }
   0x2   :  { %v612_v1 = vld [vmem:[%s811_s1 + $0x78] sm:$0xff]  ;;  %317 = vmatpush.bf16.msra.mxu0 %v604_v0  ;;  %v611_v5 = vld [vmem:[%s811_s1 + $0x70] sm:$0xff]  ;;  %v610_v9 = vld [vmem:[%s811_s1 + $0x68] sm:$0xff] }
   0x3   :  { %v620_v2 = vld [vmem:[%s811_s1 + $0xb8] sm:$0xff]  ;;  %336 = vmatpush.bf16.msra.mxu1 %v612_v1  ;;  %v619_v6 = vld [vmem:[%s811_s1 + $0xb0] sm:$0xff]  ;;  %v618_v10 = vld [vmem:[%s811_s1 + $0xa8] sm:$0xff] }
   0x4   :  { %v628_v3 = vld [vmem:[%s811_s1 + $0xf8] sm:$0xff]  ;;  %355 = vmatpush.bf16.msra.mxu2 %v620_v2  ;;  %v627_v7 = vld [vmem:[%s811_s1 + $0xf0] sm:$0xff]  ;;  %v626_v11 = vld [vmem:[%s811_s1 + $0xe8] sm:$0xff] }
   0x5   :  { %374 = vmatpush.bf16.msra.mxu3 %v628_v3  ;;  %v601_v12 = vld [vmem:[%s811_s1 + $0x20] sm:$0xff]  ;;  %v600_v16 = vld [vmem:[%s811_s1 + $0x18] sm:$0xff]  ;;  %v599_v20 = vld [vmem:[%s811_s1 + $0x10] sm:$0xff] }
   0x6   :  { %318 = vmatpush.bf16.msra.mxu0 %v603_v4  ;;  %v609_v13 = vld [vmem:[%s811_s1 + $0x60] sm:$0xff]  ;;  %v608_v17 = vld [vmem:[%s811_s1 + $0x58] sm:$0xff]  ;;  %v607_v21 = vld [vmem:[%s811_s1 + $0x50] sm:$0xff] }
   0x7   :  { %337 = vmatpush.bf16.msra.mxu1 %v611_v5  ;;  %v617_v14 = vld [vmem:[%s811_s1 + $0xa0] sm:$0xff]  ;;  %v616_v18 = vld [vmem:[%s811_s1 + $0x98] sm:$0xff]  ;;  %v615_v22 = vld [vmem:[%s811_s1 + $0x90] sm:$0xff] }
   0x8   :  { %356 = vmatpush.bf16.msra.mxu2 %v619_v6  ;;  %v625_v15 = vld [vmem:[%s811_s1 + $0xe0] sm:$0xff]  ;;  %v624_v19 = vld [vmem:[%s811_s1 + $0xd8] sm:$0xff]  ;;  %v623_v23 = vld [vmem:[%s811_s1 + $0xd0] sm:$0xff] }
   0x9   :  { %375 = vmatpush.bf16.msra.mxu3 %v627_v7  ;;  %v598_v24 = vld [vmem:[%s811_s1 + $0x8] sm:$0xff]  ;;  %v597_v28 = vld [vmem:[%s811_s1] sm:$0xff]  ;;  %v591_v33 = vld [vmem:[%s812_s0 + $0xc] sm:$0xf0] }
   0xa   :  { %319 = vmatpush.bf16.msra.mxu0 %v602_v8  ;;  %v606_v25 = vld [vmem:[%s811_s1 + $0x48] sm:$0xff]  ;;  %v605_v29 = vld [vmem:[%s811_s1 + $0x40] sm:$0xff]  ;;  %v433_v35 = vld [vmem:[%s812_s0 + $0x10] sm:$0xf0] }
   0xb   :  { %338 = vmatpush.bf16.msra.mxu1 %v610_v9  ;;  %v614_v26 = vld [vmem:[%s811_s1 + $0x88] sm:$0xff]  ;;  %v613_v30 = vld [vmem:[%s811_s1 + $0x80] sm:$0xff]  ;;  %v592_v37 = vld [vmem:[%s812_s0 + $0x14] sm:$0xf0] }
   0xc   :  { %357 = vmatpush.bf16.msra.mxu2 %v618_v10  ;;  %v622_v27 = vld [vmem:[%s811_s1 + $0xc8] sm:$0xff]  ;;  %v621_v31 = vld [vmem:[%s811_s1 + $0xc0] sm:$0xff]  ;;  %v441_v39 = vld [vmem:[%s812_s0 + $0x18] sm:$0xf0] }
   0xd   :  { %376 = vmatpush.bf16.msra.mxu3 %v626_v11  ;;  %v431_v32 = vld [vmem:[%s812_s0] sm:$0xf]  ;;  %v589_v34 = vld [vmem:[%s812_s0 + $0x4] sm:$0xf]  ;;  %v439_v36 = vld [vmem:[%s812_s0 + $0x8] sm:$0xf] }
   0xe   :  { %320 = vmatpush.bf16.msra.mxu0 %v601_v12  ;;  %v590_v38 = vld [vmem:[%s812_s0 + $0xc] sm:$0xf]  ;;  %v432_v40 = vor.u32 %v591_v33, %v431_v32  ;;  %v436_v41 = vor.u32 %v589_v34, %v433_v35  ;;  %v440_v42 = vor.u32 %v592_v37, %v439_v36  ;;  %v447_v44 = vld [vmem:[%s812_s0 + $0x20] sm:$0xf]  ;;  %v595_v45 = vld [vmem:[%s812_s0 + $0x2c] sm:$0xf0] }
   0xf   :  { %339 = vmatpush.bf16.msra.mxu1 %v609_v13  ;;  %v444_v43 = vor.u32 %v590_v38, %v441_v39  ;;  %v593_v46 = vld [vmem:[%s812_s0 + $0x24] sm:$0xf]  ;;  %v449_v47 = vld [vmem:[%s812_s0 + $0x30] sm:$0xf0]  ;;  %v455_v48 = vld [vmem:[%s812_s0 + $0x28] sm:$0xf]  ;;  %v448_v52 = vor.u32 %v595_v45, %v447_v44 }
  0x10   :  { %358 = vmatpush.bf16.msra.mxu2 %v617_v14  ;;  %v596_v49 = vld [vmem:[%s812_s0 + $0x34] sm:$0xf0]  ;;  %v594_v50 = vld [vmem:[%s812_s0 + $0x2c] sm:$0xf]  ;;  %v457_v51 = vld [vmem:[%s812_s0 + $0x38] sm:$0xf0]  ;;  %v452_v53 = vor.u32 %v593_v46, %v449_v47 }
  0x11   :  { %377 = vmatpush.bf16.msra.mxu3 %v625_v15  ;;  %v456_v54 = vor.u32 %v596_v49, %v455_v48  ;;  %v460_v55 = vor.u32 %v594_v50, %v457_v51 }
  0x12   :  { %321 = vmatpush.bf16.msra.mxu0 %v600_v16 }
  0x13   :  { %340 = vmatpush.bf16.msra.mxu1 %v608_v17 }
  0x14   :  { %359 = vmatpush.bf16.msra.mxu2 %v616_v18 }
  0x15   :  { %378 = vmatpush.bf16.msra.mxu3 %v624_v19 }
  0x16   :  { %322 = vmatpush.bf16.msra.mxu0 %v599_v20 }
  0x17   :  { %341 = vmatpush.bf16.msra.mxu1 %v607_v21 }
  0x18   :  { %360 = vmatpush.bf16.msra.mxu2 %v615_v22 }
  0x19   :  { %379 = vmatpush.bf16.msra.mxu3 %v623_v23 }
  0x1a   :  { %323 = vmatpush.bf16.msra.mxu0 %v598_v24 }
  0x1b   :  { %342 = vmatpush.bf16.msra.mxu1 %v606_v25 }
  0x1c   :  { %361 = vmatpush.bf16.msra.mxu2 %v614_v26 }
  0x1d   :  { %380 = vmatpush.bf16.msra.mxu3 %v622_v27 }
  0x1e   :  { %324 = vmatpush.bf16.msra.mxu0 %v597_v28 }
  0x1f   :  { %343 = vmatpush.bf16.msra.mxu1 %v605_v29 }
  0x20   :  { %362 = vmatpush.bf16.msra.mxu2 %v613_v30 }
  0x21   :  { %381 = vmatpush.bf16.msra.mxu3 %v621_v31  ;;  %325 = vmatmul.bf16.vlgmr.msra.gmra.mxu0 %v432_v40 }
  0x22   :  { %344 = vmatmul.bf16.vlgmr.msra.gmra.mxu1 %v436_v41 }
  0x23   :  { %363 = vmatmul.bf16.vlgmr.msra.gmra.mxu2 %v440_v42 }
  0x24   :  { %382 = vmatmul.bf16.vlgmr.msra.gmra.mxu3 %v444_v43 }
  0x31   :  { %330 = vmatmul.bf16.gmra.mxu0 %v448_v52 }
  0x32   :  { %349 = vmatmul.bf16.gmra.mxu1 %v452_v53 }
  0x33   :  { %368 = vmatmul.bf16.gmra.mxu2 %v456_v54 }
  0x34   :  { %387 = vmatmul.bf16.gmra.mxu3 %v460_v55 }
  0x9e   :  { %v326_v56 = vpop.f32.mrf.mxu0 }
  0x9f   :  { %v345_v57 = vpop.f32.mrf.mxu1 }
  0xa0   :  { %v346_v58 = vadd.f32 %v345_v57, %v326_v56 }
  0xa6   :  { %v364_v59 = vpop.f32.mrf.mxu2  ;;  %v328_v62 = vpop.f32.mrf.mxu0 }
  0xa7   :  { %v383_v60 = vpop.f32.mrf.mxu3  ;;  %v365_v61 = vadd.f32 %v364_v59, %v346_v58  ;;  %v347_v63 = vpop.f32.mrf.mxu1 }
  0xa8   :  { %v348_v1 = vadd.f32 %v347_v63, %v328_v62 }
  0xa9   :  { %v384_v0 = vadd.f32 %v383_v60, %v365_v61 }
  0xab   :  { %393 = vst [vmem:[%s813_s2] sm:$0xff] %v384_v0  ;;  %v407_v18 = vmul.f32 %v384_v0, %v384_v0 }
  0xae   :  { %v366_v2 = vpop.f32.mrf.mxu2  ;;  %v331_v5 = vpop.f32.mrf.mxu0 }
  0xaf   :  { %v385_v3 = vpop.f32.mrf.mxu3  ;;  %v367_v4 = vadd.f32 %v366_v2, %v348_v1  ;;  %v350_v6 = vpop.f32.mrf.mxu1 }
  0xb0   :  { %v351_v8 = vadd.f32 %v350_v6, %v331_v5 }
  0xb1   :  { %v386_v7 = vadd.f32 %v385_v3, %v367_v4 }
  0xb3   :  { %394 = vst [vmem:[%s813_s2 + $0x8] sm:$0xff] %v386_v7  ;;  %v408_v15 = vmul.f32 %v386_v7, %v386_v7  ;;  %v397_v19 = vadd.f32 %v386_v7, %v384_v0 }
  0xb5   :  { %v411_v23 = vadd.f32 %v408_v15, %v407_v18 }
  0xb6   :  { %v369_v9 = vpop.f32.mrf.mxu2  ;;  %v333_v13 = vpop.f32.mrf.mxu0 }
  0xb7   :  { %v388_v10 = vpop.f32.mrf.mxu3  ;;  %v370_v11 = vadd.f32 %v369_v9, %v351_v8  ;;  %v352_v14 = vpop.f32.mrf.mxu1 }
  0xb8   :  { %v353_v16 = vadd.f32 %v352_v14, %v333_v13 }
  0xb9   :  { %v389_v12 = vadd.f32 %v388_v10, %v370_v11 }
  0xbb   :  { %395 = vst [vmem:[%s813_s2 + $0x10] sm:$0xff] %v389_v12  ;;  %v409_v20 = vmul.f32 %v389_v12, %v389_v12  ;;  %v398_v24 = vadd.f32 %v397_v19, %v389_v12 }
  0xbd   :  { %v412_v26 = vadd.f32 %v411_v23, %v409_v20 }
  0xbe   :  { %v371_v17 = vpop.f32.mrf.mxu2 }
  0xbf   :  { %v372_v21 = vadd.f32 %v371_v17, %v353_v16  ;;  %v390_v22 = vpop.f32.mrf.mxu3 }
  0xc1   :  { %v391_v25 = vadd.f32 %v390_v22, %v372_v21 }
  0xc3   :  { %396 = vst [vmem:[%s813_s2 + $0x18] sm:$0xff] %v391_v25  ;;  %v399_v27 = vadd.f32 %v398_v24, %v391_v25  ;;  %v410_v28 = vmul.f32 %v391_v25, %v391_v25 }
  0xc5   :  { %v400_v29 = vrot.slane %v399_v27, 4  ;;  %v413_v30 = vadd.f32 %v412_v26, %v410_v28 }
  0xc7   :  { %v401_v31 = vadd.f32 %v400_v29, %v399_v27  ;;  %v414_v32 = vrot.slane %v413_v30, 4 }
  0xc9   :  { %v402_v33 = vrot.slane %v401_v31, 2  ;;  %v415_v34 = vadd.f32 %v414_v32, %v413_v30 }
  0xcb   :  { %v403_v35 = vadd.f32 %v402_v33, %v401_v31  ;;  %v416_v36 = vrot.slane %v415_v34, 2 }
  0xcd   :  { %v404_v37 = vrot.slane %v403_v35, 1  ;;  %v417_v38 = vadd.f32 %v416_v36, %v415_v34 }
  0xcf   :  { %v405_v39 = vadd.f32 %v404_v37, %v403_v35  ;;  %v418_v40 = vrot.slane %v417_v38, 1 }
  0xd1   :  { %406 = vst [vmem:[%s814_s3] sm:$0x1] %v405_v39  ;;  %v419_v41 = vadd.f32 %v418_v40, %v417_v38 }
  0xd3   :  { %420 = vst [vmem:[%s814_s3 + $0x1] sm:$0x1] %v419_v41 }

// kernel: discriminator_forward.15
= control target key start
LH: loop header
LB: loop body
LE: loop exit
PB: predicated region body
PF: predicated region fallthrough
CT: control target
= control target key end

     0   :  { %s1328_s1 = inlined_call_operand.vmem [shape: bf16[1024,128], index: 1, kind: input, shape index: {}]   ;;  %s1329_s0 = inlined_call_operand.vmem [shape: bf16[16,1024], index: 0, kind: input, shape index: {}]   ;;  %s1330_s2 = inlined_call_operand.vmem [shape: f32[16,128], index: 2, kind: output, shape index: {}]  }
   0x1   :  { %v1002_v0 = vld [vmem:[%s1328_s1 + $0x38] sm:$0xff]  ;;  %v1001_v4 = vld [vmem:[%s1328_s1 + $0x30] sm:$0xff]  ;;  %v1000_v8 = vld [vmem:[%s1328_s1 + $0x28] sm:$0xff] }
   0x2   :  { %v1010_v1 = vld [vmem:[%s1328_s1 + $0x78] sm:$0xff]  ;;  %571 = vmatpush.bf16.msra.mxu0 %v1002_v0  ;;  %v1009_v5 = vld [vmem:[%s1328_s1 + $0x70] sm:$0xff]  ;;  %v1008_v9 = vld [vmem:[%s1328_s1 + $0x68] sm:$0xff] }
   0x3   :  { %v1018_v2 = vld [vmem:[%s1328_s1 + $0xb8] sm:$0xff]  ;;  %585 = vmatpush.bf16.msra.mxu1 %v1010_v1  ;;  %v1017_v6 = vld [vmem:[%s1328_s1 + $0xb0] sm:$0xff]  ;;  %v1016_v10 = vld [vmem:[%s1328_s1 + $0xa8] sm:$0xff] }
   0x4   :  { %v1026_v3 = vld [vmem:[%s1328_s1 + $0xf8] sm:$0xff]  ;;  %599 = vmatpush.bf16.msra.mxu2 %v1018_v2  ;;  %v1025_v7 = vld [vmem:[%s1328_s1 + $0xf0] sm:$0xff]  ;;  %v1024_v11 = vld [vmem:[%s1328_s1 + $0xe8] sm:$0xff] }
   0x5   :  { %613 = vmatpush.bf16.msra.mxu3 %v1026_v3  ;;  %v999_v12 = vld [vmem:[%s1328_s1 + $0x20] sm:$0xff]  ;;  %v998_v16 = vld [vmem:[%s1328_s1 + $0x18] sm:$0xff]  ;;  %v997_v20 = vld [vmem:[%s1328_s1 + $0x10] sm:$0xff] }
   0x6   :  { %572 = vmatpush.bf16.msra.mxu0 %v1001_v4  ;;  %v1007_v13 = vld [vmem:[%s1328_s1 + $0x60] sm:$0xff]  ;;  %v1006_v17 = vld [vmem:[%s1328_s1 + $0x58] sm:$0xff]  ;;  %v1005_v21 = vld [vmem:[%s1328_s1 + $0x50] sm:$0xff] }
   0x7   :  { %586 = vmatpush.bf16.msra.mxu1 %v1009_v5  ;;  %v1015_v14 = vld [vmem:[%s1328_s1 + $0xa0] sm:$0xff]  ;;  %v1014_v18 = vld [vmem:[%s1328_s1 + $0x98] sm:$0xff]  ;;  %v1013_v22 = vld [vmem:[%s1328_s1 + $0x90] sm:$0xff] }
   0x8   :  { %600 = vmatpush.bf16.msra.mxu2 %v1017_v6  ;;  %v1023_v15 = vld [vmem:[%s1328_s1 + $0xe0] sm:$0xff]  ;;  %v1022_v19 = vld [vmem:[%s1328_s1 + $0xd8] sm:$0xff]  ;;  %v1021_v23 = vld [vmem:[%s1328_s1 + $0xd0] sm:$0xff] }
   0x9   :  { %614 = vmatpush.bf16.msra.mxu3 %v1025_v7  ;;  %v996_v24 = vld [vmem:[%s1328_s1 + $0x8] sm:$0xff]  ;;  %v995_v28 = vld [vmem:[%s1328_s1] sm:$0xff]  ;;  %v1034_v32 = vld [vmem:[%s1328_s1 + $0x138] sm:$0xff] }
   0xa   :  { %573 = vmatpush.bf16.msra.mxu0 %v1000_v8  ;;  %v1004_v25 = vld [vmem:[%s1328_s1 + $0x48] sm:$0xff]  ;;  %v1003_v29 = vld [vmem:[%s1328_s1 + $0x40] sm:$0xff]  ;;  %v1042_v33 = vld [vmem:[%s1328_s1 + $0x178] sm:$0xff] }
   0xb   :  { %587 = vmatpush.bf16.msra.mxu1 %v1008_v9  ;;  %v1012_v26 = vld [vmem:[%s1328_s1 + $0x88] sm:$0xff]  ;;  %v1011_v30 = vld [vmem:[%s1328_s1 + $0x80] sm:$0xff]  ;;  %v1050_v42 = vld [vmem:[%s1328_s1 + $0x1b8] sm:$0xff] }
   0xc   :  { %601 = vmatpush.bf16.msra.mxu2 %v1016_v10  ;;  %v1020_v27 = vld [vmem:[%s1328_s1 + $0xc8] sm:$0xff]  ;;  %v1019_v31 = vld [vmem:[%s1328_s1 + $0xc0] sm:$0xff]  ;;  %v1058_v43 = vld [vmem:[%s1328_s1 + $0x1f8] sm:$0xff] }
   0xd   :  { %615 = vmatpush.bf16.msra.mxu3 %v1024_v11  ;;  %v709_v34 = vld [vmem:[%s1329_s0 + $0x8] sm:$0xf]  ;;  %v988_v36 = vld [vmem:[%s1329_s0 + $0xc] sm:$0xf]  ;;  %v701_v38 = vld [vmem:[%s1329_s0] sm:$0xf] }
   0xe   :  { %574 = vmatpush.bf16.msra.mxu0 %v999_v12  ;;  %v992_v35 = vld [vmem:[%s1329_s0 + $0x24] sm:$0xf0]  ;;  %v711_v37 = vld [vmem:[%s1329_s0 + $0x28] sm:$0xf0]  ;;  %v991_v39 = vld [vmem:[%s1329_s0 + $0x1c] sm:$0xf0] }
   0xf   :  { %588 = vmatpush.bf16.msra.mxu1 %v1007_v13  ;;  %v987_v40 = vld [vmem:[%s1329_s0 + $0x4] sm:$0xf]  ;;  %v710_v44 = vor.u32 %v992_v35, %v709_v34  ;;  %v714_v45 = vor.u32 %v988_v36, %v711_v37  ;;  %v702_v46 = vor.u32 %v991_v39, %v701_v38  ;;  %v1033_v48 = vld [vmem:[%s1328_s1 + $0x130] sm:$0xff]  ;;  %v1032_v52 = vld [vmem:[%s1328_s1 + $0x128] sm:$0xff] }
  0x10   :  { %602 = vmatpush.bf16.msra.mxu2 %v1015_v14  ;;  %v703_v41 = vld [vmem:[%s1329_s0 + $0x20] sm:$0xf0]  ;;  %v1041_v49 = vld [vmem:[%s1328_s1 + $0x170] sm:$0xff]  ;;  %v1040_v53 = vld [vmem:[%s1328_s1 + $0x168] sm:$0xff] }
  0x11   :  { %616 = vmatpush.bf16.msra.mxu3 %v1023_v15  ;;  %v706_v47 = vor.u32 %v987_v40, %v703_v41  ;;  %v1049_v50 = vld [vmem:[%s1328_s1 + $0x1b0] sm:$0xff]  ;;  %v1048_v54 = vld [vmem:[%s1328_s1 + $0x1a8] sm:$0xff]  ;;  %v1031_v56 = vld [vmem:[%s1328_s1 + $0x120] sm:$0xff] }
  0x12   :  { %575 = vmatpush.bf16.msra.mxu0 %v998_v16  ;;  %v1057_v51 = vld [vmem:[%s1328_s1 + $0x1f0] sm:$0xff]  ;;  %v1056_v55 = vld [vmem:[%s1328_s1 + $0x1e8] sm:$0xff]  ;;  %v1039_v57 = vld [vmem:[%s1328_s1 + $0x160] sm:$0xff] }
  0x13   :  { %589 = vmatpush.bf16.msra.mxu1 %v1006_v17  ;;  %v1047_v58 = vld [vmem:[%s1328_s1 + $0x1a0] sm:$0xff]  ;;  %v1030_v60 = vld [vmem:[%s1328_s1 + $0x118] sm:$0xff]  ;;  %v1029_v0 = vld [vmem:[%s1328_s1 + $0x110] sm:$0xff] }
  0x14   :  { %603 = vmatpush.bf16.msra.mxu2 %v1014_v18  ;;  %v1055_v59 = vld [vmem:[%s1328_s1 + $0x1e0] sm:$0xff]  ;;  %v1038_v61 = vld [vmem:[%s1328_s1 + $0x158] sm:$0xff]  ;;  %v1037_v1 = vld [vmem:[%s1328_s1 + $0x150] sm:$0xff] }
  0x15   :  { %617 = vmatpush.bf16.msra.mxu3 %v1022_v19  ;;  %v1046_v62 = vld [vmem:[%s1328_s1 + $0x198] sm:$0xff]  ;;  %v1045_v2 = vld [vmem:[%s1328_s1 + $0x190] sm:$0xff]  ;;  %v1028_v4 = vld [vmem:[%s1328_s1 + $0x108] sm:$0xff] }
  0x16   :  { %576 = vmatpush.bf16.msra.mxu0 %v997_v20  ;;  %v1054_v63 = vld [vmem:[%s1328_s1 + $0x1d8] sm:$0xff]  ;;  %v1053_v3 = vld [vmem:[%s1328_s1 + $0x1d0] sm:$0xff]  ;;  %v1036_v5 = vld [vmem:[%s1328_s1 + $0x148] sm:$0xff] }
  0x17   :  { %590 = vmatpush.bf16.msra.mxu1 %v1005_v21  ;;  %v1044_v6 = vld [vmem:[%s1328_s1 + $0x188] sm:$0xff]  ;;  %v1027_v8 = vld [vmem:[%s1328_s1 + $0x100] sm:$0xff]  ;;  %v717_v12 = vld [vmem:[%s1329_s0 + $0x10] sm:$0xf] }
  0x18   :  { %604 = vmatpush.bf16.msra.mxu2 %v1013_v22  ;;  %v1052_v7 = vld [vmem:[%s1328_s1 + $0x1c8] sm:$0xff]  ;;  %v1035_v9 = vld [vmem:[%s1328_s1 + $0x140] sm:$0xff]  ;;  %v993_v13 = vld [vmem:[%s1329_s0 + $0x2c] sm:$0xf0] }
  0x19   :  { %618 = vmatpush.bf16.msra.mxu3 %v1021_v23  ;;  %v1043_v10 = vld [vmem:[%s1328_s1 + $0x180] sm:$0xff]  ;;  %v989_v14 = vld [vmem:[%s1329_s0 + $0x14] sm:$0xf]  ;;  %v725_v16 = vld [vmem:[%s1329_s0 + $0x18] sm:$0xf]  ;;  %v718_v20 = vor.u32 %v993_v13, %v717_v12 }
  0x1a   :  { %577 = vmatpush.bf16.msra.mxu0 %v996_v24  ;;  %v1051_v11 = vld [vmem:[%s1328_s1 + $0x1c0] sm:$0xff]  ;;  %v719_v15 = vld [vmem:[%s1329_s0 + $0x30] sm:$0xf0]  ;;  %v994_v17 = vld [vmem:[%s1329_s0 + $0x34] sm:$0xf0] }
  0x1b   :  { %591 = vmatpush.bf16.msra.mxu1 %v1004_v25  ;;  %v990_v18 = vld [vmem:[%s1329_s0 + $0x1c] sm:$0xf]  ;;  %v722_v21 = vor.u32 %v989_v14, %v719_v15  ;;  %v726_v22 = vor.u32 %v994_v17, %v725_v16 }
  0x1c   :  { %605 = vmatpush.bf16.msra.mxu2 %v1012_v26  ;;  %v727_v19 = vld [vmem:[%s1329_s0 + $0x38] sm:$0xf0] }
  0x1d   :  { %619 = vmatpush.bf16.msra.mxu3 %v1020_v27  ;;  %v730_v23 = vor.u32 %v990_v18, %v727_v19 }
  0x1e   :  { %578 = vmatpush.bf16.msra.mxu0 %v995_v28 }
  0x1f   :  { %592 = vmatpush.bf16.msra.mxu1 %v1003_v29 }
  0x20   :  { %606 = vmatpush.bf16.msra.mxu2 %v1011_v30 }
  0x21   :  { %620 = vmatpush.bf16.msra.mxu3 %v1019_v31  ;;  %579 = vmatmul.bf16.vlgmr.msra.gmra.mxu0 %v702_v46 }
  0x22   :  { %627 = vmatpush.bf16.msrb.mxu0 %v1034_v32  ;;  %593 = vmatmul.bf16.vlgmr.msra.gmra.mxu1 %v706_v47 }
  0x23   :  { %641 = vmatpush.bf16.msrb.mxu1 %v1042_v33  ;;  %607 = vmatmul.bf16.vlgmr.msra.gmra.mxu2 %v710_v44 }
  0x24   :  { %655 = vmatpush.bf16.msrb.mxu2 %v1050_v42  ;;  %621 = vmatmul.bf16.vlgmr.msra.gmra.mxu3 %v714_v45 }
  0x25   :  { %669 = vmatpush.bf16.msrb.mxu3 %v1058_v43 }
  0x26   :  { %628 = vmatpush.bf16.msrb.mxu0 %v1033_v48 }
  0x27   :  { %642 = vmatpush.bf16.msrb.mxu1 %v1041_v49 }
  0x28   :  { %656 = vmatpush.bf16.msrb.mxu2 %v1049_v50 }
  0x29   :  { %670 = vmatpush.bf16.msrb.mxu3 %v1057_v51 }
  0x2a   :  { %629 = vmatpush.bf16.msrb.mxu0 %v1032_v52 }
  0x2b   :  { %643 = vmatpush.bf16.msrb.mxu1 %v1040_v53 }
  0x2c   :  { %657 = vmatpush.bf16.msrb.mxu2 %v1048_v54 }
  0x2d   :  { %671 = vmatpush.bf16.msrb.mxu3 %v1056_v55 }
  0x2e   :  { %630 = vmatpush.bf16.msrb.mxu0 %v1031_v56 }
  0x2f   :  { %644 = vmatpush.bf16.msrb.mxu1 %v1039_v57 }
  0x30   :  { %658 = vmatpush.bf16.msrb.mxu2 %v1047_v58 }
  0x31   :  { %672 = vmatpush.bf16.msrb.mxu3 %v1055_v59 }
  0x32   :  { %631 = vmatpush.bf16.msrb.mxu0 %v1030_v60 }
  0x33   :  { %645 = vmatpush.bf16.msrb.mxu1 %v1038_v61 }
  0x34   :  { %659 = vmatpush.bf16.msrb.mxu2 %v1046_v62 }
  0x35   :  { %673 = vmatpush.bf16.msrb.mxu3 %v1054_v63 }
  0x36   :  { %632 = vmatpush.bf16.msrb.mxu0 %v1029_v0 }
  0x37   :  { %646 = vmatpush.bf16.msrb.mxu1 %v1037_v1 }
  0x38   :  { %660 = vmatpush.bf16.msrb.mxu2 %v1045_v2 }
  0x39   :  { %674 = vmatpush.bf16.msrb.mxu3 %v1053_v3 }
  0x3a   :  { %633 = vmatpush.bf16.msrb.mxu0 %v1028_v4 }
  0x3b   :  { %647 = vmatpush.bf16.msrb.mxu1 %v1036_v5 }
  0x3c   :  { %661 = vmatpush.bf16.msrb.mxu2 %v1044_v6 }
  0x3d   :  { %675 = vmatpush.bf16.msrb.mxu3 %v1052_v7 }
  0x3e   :  { %634 = vmatpush.bf16.msrb.mxu0 %v1027_v8 }
  0x3f   :  { %648 = vmatpush.bf16.msrb.mxu1 %v1035_v9 }
  0x40   :  { %662 = vmatpush.bf16.msrb.mxu2 %v1043_v10 }
  0x41   :  { %676 = vmatpush.bf16.msrb.mxu3 %v1051_v11  ;;  %635 = vmatmul.bf16.vlgmr.msrb.gmra.mxu0 %v718_v20 }
  0x42   :  { %649 = vmatmul.bf16.vlgmr.msrb.gmra.mxu1 %v722_v21 }
  0x43   :  { %663 = vmatmul.bf16.vlgmr.msrb.gmra.mxu2 %v726_v22 }
  0x44   :  { %677 = vmatmul.bf16.vlgmr.msrb.gmra.mxu3 %v730_v23 }
  0x9e   :  { %v580_v24 = vpop.f32.mrf.mxu0 }
  0x9f   :  { %v594_v25 = vpop.f32.mrf.mxu1 }
  0xa0   :  { %v595_v28 = vadd.f32 %v594_v25, %v580_v24 }
  0xa6   :  { %v608_v26 = vpop.f32.mrf.mxu2  ;;  %v582_v29 = vpop.f32.mrf.mxu0 }
  0xa7   :  { %v622_v27 = vpop.f32.mrf.mxu3  ;;  %v596_v30 = vpop.f32.mrf.mxu1  ;;  %v609_v31 = vadd.f32 %v608_v26, %v595_v28 }
  0xa8   :  { %v597_v35 = vadd.f32 %v596_v30, %v582_v29 }
  0xa9   :  { %v623_v34 = vadd.f32 %v622_v27, %v609_v31 }
  0xae   :  { %v610_v32 = vpop.f32.mrf.mxu2 }
  0xaf   :  { %v624_v33 = vpop.f32.mrf.mxu3  ;;  %v611_v39 = vadd.f32 %v610_v32, %v597_v35 }
  0xb1   :  { %v625_v43 = vadd.f32 %v624_v33, %v611_v39 }
  0xbe   :  { %v636_v36 = vpop.f32.mrf.mxu0 }
  0xbf   :  { %v637_v37 = vadd.f32 %v636_v36, %v623_v34  ;;  %v650_v38 = vpop.f32.mrf.mxu1 }
  0xc1   :  { %v651_v40 = vadd.f32 %v650_v38, %v637_v37 }
  0xc6   :  { %v664_v41 = vpop.f32.mrf.mxu2  ;;  %v638_v45 = vpop.f32.mrf.mxu0 }
  0xc7   :  { %v678_v42 = vpop.f32.mrf.mxu3  ;;  %v665_v44 = vadd.f32 %v664_v41, %v651_v40  ;;  %v639_v47 = vadd.f32 %v638_v45, %v625_v43  ;;  %v652_v49 = vpop.f32.mrf.mxu1 }
  0xc9   :  { %v679_v46 = vadd.f32 %v678_v42, %v665_v44  ;;  %v653_v51 = vadd.f32 %v652_v49, %v639_v47 }
  0xcb   :  { %v683_v48 = vsub.f32 0.0, %v679_v46 }
  0xcd   :  { %v685_v50 = vmul.f32 1.442695, %v683_v48 }
  0xce   :  { %v666_v52 = vpop.f32.mrf.mxu2 }
  0xcf   :  { %1059 = vpow2.f32 %v685_v50  ;;  %v667_v53 = vadd.f32 %v666_v52, %v653_v51  ;;  %v680_v54 = vpop.f32.mrf.mxu3 }
  0xd1   :  { %v681_v55 = vadd.f32 %v680_v54, %v667_v53 }
  0xd3   :  { %v684_v56 = vsub.f32 0.0, %v681_v55 }
  0xd5   :  { %v1060_v57 = vpop.eup %1059  ;;  %v687_v58 = vmul.f32 1.442695, %v684_v56 }
  0xd6   :  { %v689_v59 = vadd.f32 1.0, %v1060_v57 }
  0xd7   :  { %1061 = vpow2.f32 %v687_v58 }
  0xd8   :  { %1063 = vrcp.f32 %v689_v59 }
  0xdd   :  { %v1062_v60 = vpop.eup %1061 }
  0xde   :  { %v1064_v61 = vpop.eup %1063  ;;  %v690_v62 = vadd.f32 1.0, %v1062_v60 }
  0xdf   :  { %693 = vst [vmem:[%s1330_s2] sm:$0xff] %v1064_v61 }
  0xe0   :  { %1065 = vrcp.f32 %v690_v62 }
  0xe6   :  { %v1066_v63 = vpop.eup %1065 }
  0xe7   :  { %694 = vst [vmem:[%s1330_s2 + $0x8] sm:$0xff] %v1066_v63 }

</bundles_post_ra>
